<compile_context>
chip_gen: v5e
topology: v5e:2x2
jax: 0.10.0
libtpu: 0.0.40
codegen_flags: <defaults>
</compile_context>

<pallas_src>
import functools

import jax
import jax.numpy as jnp
import numpy as np
from jax.experimental import pallas as pl
from jax.experimental.pallas import tpu as pltpu


# ----------------------------------------------------------------------------
# Fused kernel: per grid step, one block of tm rows
#   g_pow = graph[row_block]                         (graph^1 rows)
#   for layer in range(L):
#       p      = masked row softmax(g_pow)           (VPU / XLU / EUP)
#       prop_k = p @ embed                           (MXU, bf16 in, f32 acc)
#       g_pow  = g_pow @ graph   (if more layers)    (MXU, f32)
#   light  = (embed[row_block] + sum_k prop_k) / (L+1)
#   out    = [light | prop_0 | ... | prop_{L-1}]     (lane-dense slab)
# ----------------------------------------------------------------------------
def _fused_gcn_kernel(n_layers, tm, gfull_ref, efull_ref, out_ref):
    row = pl.multiple_of(pl.program_id(0) * tm, tm)

    e_full_bf = efull_ref[...].astype(jnp.bfloat16)   # (N, D) bf16 for the MXU
    g_pow = gfull_ref[pl.ds(row, tm), :]              # (tm, N) f32 = graph^1 rows
    acc = efull_ref[pl.ds(row, tm), :]                # (tm, D) f32 light accumulator

    # Full graph only needed for the power chain.
    g_full = gfull_ref[...] if n_layers > 1 else None  # (N, N) f32

    pieces = []
    for layer in range(n_layers):
        # masked row softmax (torch.sparse.softmax semantics: only nonzero
        # entries participate; all-zero rows stay all-zero).
        mask = g_pow != 0.0
        gm = jnp.where(mask, g_pow, jnp.float32(-1e30))
        m = jnp.max(gm, axis=-1, keepdims=True)
        e = jnp.where(mask, jnp.exp(gm - m), jnp.float32(0.0))
        s = jnp.sum(e, axis=-1, keepdims=True)
        denom = jnp.where(s > 0.0, s, jnp.float32(1.0))
        p = e * pl.reciprocal(denom, approx=True)       # (tm, N) f32

        # propagation: bf16 MXU inputs, f32 accumulation.
        prop = jnp.dot(p.astype(jnp.bfloat16), e_full_bf,
                       preferred_element_type=jnp.float32)  # (tm, D) f32
        acc = acc + prop
        pieces.append(prop)

        # next graph power (kept in f32 to avoid compounding bf16 error).
        if layer + 1 < n_layers:
            g_pow = jnp.dot(g_pow, g_full, preferred_element_type=jnp.float32)

    light = acc * jnp.float32(1.0 / (n_layers + 1))
    out_ref[...] = jnp.concatenate([light] + pieces, axis=-1).astype(
        out_ref.dtype)


def _pick_tm(m):
    # prefer 256-row blocks for big N (MXU/grid-step amortization), otherwise
    # 128 so that even N=256 yields >=2 grid points (megacore sharding).
    if m >= 512 and m % 256 == 0:
        return 256
    for t in (128, 64, 32, 16, 8):
        if m % t == 0:
            return t
    return m


# ----------------------------------------------------------------------------
# WeightGCN forward
# ----------------------------------------------------------------------------
def weight_gcn_forward(graph, embed, n_layers):
    N, N2 = graph.shape
    assert N == N2
    Ne, D = embed.shape
    assert Ne == N

    tm = _pick_tm(N)
    out_w = (n_layers + 1) * D

    # Rough VMEM footprint: resident graph/embed (double-buffered by the
    # pipeline), output blocks, plus in-kernel temporaries (g_pow, softmax
    # intermediates, bf16 embed copy) and headroom.
    need = 4 * (3 * N * N + 3 * N * D + 2 * tm * out_w
                + 8 * tm * N + 4 * tm * D) + (2 << 20)
    # TODO(synk): for N too large to keep graph resident in VMEM, fall back to
    # a tiled multi-pallas_call pipeline (power kernel + softmax/prop kernel).
    assert need <= (48 << 20), "graph/embed too large for VMEM-resident fusion"
    vmem_limit = int(min(max(need, 16 << 20), 48 << 20))

    kernel = functools.partial(_fused_gcn_kernel, n_layers, tm)

    slab = pl.pallas_call(
        kernel,
        out_shape=jax.ShapeDtypeStruct((N, out_w), jnp.float32),
        grid_spec=pltpu.PrefetchScalarGridSpec(
            num_scalar_prefetch=0,
            grid=(N // tm,),
            in_specs=[
                pl.BlockSpec((N, N), lambda i: (0, 0)),   # full graph (resident)
                pl.BlockSpec((N, D), lambda i: (0, 0)),   # full embed (resident)
            ],
            out_specs=pl.BlockSpec((tm, out_w), lambda i: (i, 0)),
        ),
        compiler_params=pltpu.CompilerParams(
            dimension_semantics=("parallel",),
            vmem_limit_bytes=vmem_limit,
        ),
    )(graph, embed)

    light_out = slab[:, :D]
    all_embs = [embed] + [slab[:, (k + 1) * D:(k + 2) * D]
                          for k in range(n_layers)]
    return light_out, all_embs


# ----------------------------------------------------------------------------
# Pure-JAX reference (same sparse-softmax semantics) for a correctness check
# ----------------------------------------------------------------------------
def reference_forward(graph, embed, n_layers):
    all_embs = [embed]
    all_graph = [graph]
    for i in range(n_layers - 1):
        all_graph.append(all_graph[i] @ graph)
    for layer in range(n_layers):
        g = all_graph[layer]
        mask = g != 0.0
        gm = jnp.where(mask, g, -jnp.inf)
        m = jnp.max(gm, axis=-1, keepdims=True)
        m = jnp.where(jnp.isfinite(m), m, 0.0)
        e = jnp.where(mask, jnp.exp(gm - m), 0.0)
        s = jnp.sum(e, axis=-1, keepdims=True)
        soft = e / jnp.where(s > 0.0, s, 1.0)
        all_embs.append(soft @ embed)
    embs = jnp.stack(all_embs, axis=1)  # (N, L+1, D)
    light_out = jnp.mean(embs, axis=1)
    return light_out, all_embs


if __name__ == "__main__":
    # WeightGCN has no learnable parameters; its only hyper-parameter is the
    # number of GCN layers.
    n_layers = 3

    N = 256   # number of graph nodes
    D = 32    # embedding dim

    key = jax.random.PRNGKey(0)
    k_g, k_m, k_e = jax.random.split(key, 3)

    # Sparse-ish adjacency: ~30% nonzero entries, modest magnitude so higher
    # graph powers keep the softmax well-conditioned.
    vals = jax.random.normal(k_g, (N, N), dtype=jnp.float32) * 0.2
    nz_mask = jax.random.bernoulli(k_m, 0.3, (N, N))
    graph = jnp.where(nz_mask, vals, 0.0).astype(jnp.float32)

    embed = jax.random.normal(k_e, (N, D), dtype=jnp.float32)

    light_out, all_embs = weight_gcn_forward(graph, embed, n_layers)
    light_out = jax.block_until_ready(light_out)

    # sanity check against the pure-JAX f32 reference (bf16 MXU inputs on the
    # propagation matmul + approx reciprocal -> slightly looser tolerances).
    ref_out, ref_embs = reference_forward(graph, embed, n_layers)
    np.testing.assert_allclose(
        np.asarray(light_out), np.asarray(ref_out), rtol=2e-2, atol=2e-3
    )
    for a, b in zip(all_embs, ref_embs):
        np.testing.assert_allclose(
            np.asarray(a), np.asarray(b), rtol=2e-2, atol=2e-3
        )

    assert light_out.shape == (N, D)
    assert len(all_embs) == n_layers + 1

    print("KERNEL_OK")
</pallas_src>

<mosaic_0001>
module attributes {stable_mosaic.version = 11 : i64} {
  func.func @_fused_gcn_kernel(%arg0: i32, %arg1: memref<256x256xf32, #tpu.memory_space<vmem>>, %arg2: memref<256x32xf32, #tpu.memory_space<vmem>>, %arg3: memref<128x128xf32, #tpu.memory_space<vmem>>) attributes {dimension_semantics = [#tpu.dimension_semantics<parallel>], iteration_bounds = array<i64: 2>, scalar_prefetch = 0 : i64, scratch_operands = 0 : i64, tpu.core_type = #tpu.core_type<tc>, window_params = [{pipeline_mode = #tpu.pipeline_mode<synchronous>, transform_indices = @transform_0, window_bounds = array<i64: 256, 256>}, {pipeline_mode = #tpu.pipeline_mode<synchronous>, transform_indices = @transform_1, window_bounds = array<i64: 256, 32>}, {transform_indices = @transform_2, window_bounds = array<i64: 128, 128>}]} {
    %c128_i32 = arith.constant 128 : i32
    %0 = arith.muli %arg0, %c128_i32 : i32
    %1 = tpu.assume_multiple %0, 128 : i32
    %c0 = arith.constant 0 : index
    %c0_0 = arith.constant 0 : index
    %2 = vector.load %arg2[%c0, %c0_0] : memref<256x32xf32, #tpu.memory_space<vmem>>, vector<256x32xf32>
    %3 = arith.truncf %2 : vector<256x32xf32> to vector<256x32xbf16>
    %4 = arith.index_cast %1 : i32 to index
    %c0_1 = arith.constant 0 : index
    %5 = vector.load %arg1[%4, %c0_1] : memref<256x256xf32, #tpu.memory_space<vmem>>, vector<128x256xf32>
    %6 = arith.index_cast %1 : i32 to index
    %c0_2 = arith.constant 0 : index
    %7 = vector.load %arg2[%6, %c0_2] : memref<256x32xf32, #tpu.memory_space<vmem>>, vector<128x32xf32>
    %c0_3 = arith.constant 0 : index
    %c0_4 = arith.constant 0 : index
    %8 = vector.load %arg1[%c0_3, %c0_4] : memref<256x256xf32, #tpu.memory_space<vmem>>, vector<256x256xf32>
    %cst = arith.constant 0.000000e+00 : f32
    %9 = vector.broadcast %cst : f32 to vector<128x256xf32>
    %10 = arith.cmpf one, %5, %9 : vector<128x256xf32>
    %cst_5 = arith.constant -1.000000e+30 : f32
    %11 = vector.broadcast %cst_5 : f32 to vector<128x256xf32>
    %12 = arith.select %10, %5, %11 : vector<128x256xi1>, vector<128x256xf32>
    %cst_6 = arith.constant dense<0xFF800000> : vector<128xf32>
    %13 = vector.multi_reduction <maximumf>, %12, %cst_6 [1] : vector<128x256xf32> to vector<128xf32>
    %14 = vector.shape_cast %13 : vector<128xf32> to vector<128x1xf32>
    %15 = vector.broadcast %14 : vector<128x1xf32> to vector<128x256xf32>
    %16 = arith.subf %12, %15 : vector<128x256xf32>
    %17 = math.exp %16 : vector<128x256xf32>
    %cst_7 = arith.constant 0.000000e+00 : f32
    %18 = vector.broadcast %cst_7 : f32 to vector<128x256xf32>
    %19 = arith.select %10, %17, %18 : vector<128x256xi1>, vector<128x256xf32>
    %cst_8 = arith.constant dense<0.000000e+00> : vector<128xf32>
    %20 = vector.multi_reduction <add>, %19, %cst_8 [1] : vector<128x256xf32> to vector<128xf32>
    %21 = vector.shape_cast %20 : vector<128xf32> to vector<128x1xf32>
    %cst_9 = arith.constant 0.000000e+00 : f32
    %22 = vector.broadcast %cst_9 : f32 to vector<128x1xf32>
    %23 = arith.cmpf ogt, %21, %22 : vector<128x1xf32>
    %cst_10 = arith.constant 1.000000e+00 : f32
    %24 = vector.broadcast %cst_10 : f32 to vector<128x1xf32>
    %25 = arith.select %23, %21, %24 : vector<128x1xi1>, vector<128x1xf32>
    %26 = tpu.reciprocal %25 {approx = true} : vector<128x1xf32> -> vector<128x1xf32>
    %27 = vector.broadcast %26 : vector<128x1xf32> to vector<128x256xf32>
    %28 = arith.mulf %19, %27 : vector<128x256xf32>
    %29 = arith.truncf %28 : vector<128x256xf32> to vector<128x256xbf16>
    %cst_11 = arith.constant dense<0.000000e+00> : vector<128x32xf32>
    %30 = tpu.matmul %29, %3, %cst_11 {dimension_numbers = #tpu.dot_dimension_numbers<[1], [0], [0], [1], [0, 0, 1, 1], [], []>} : vector<128x256xbf16>, vector<256x32xbf16>, vector<128x32xf32> -> vector<128x32xf32>
    %31 = arith.addf %7, %30 : vector<128x32xf32>
    %cst_12 = arith.constant dense<0.000000e+00> : vector<128x256xf32>
    %32 = tpu.matmul %5, %8, %cst_12 {dimension_numbers = #tpu.dot_dimension_numbers<[1], [0], [0], [1], [0, 0, 1, 1], [], []>} : vector<128x256xf32>, vector<256x256xf32>, vector<128x256xf32> -> vector<128x256xf32>
    %cst_13 = arith.constant 0.000000e+00 : f32
    %33 = vector.broadcast %cst_13 : f32 to vector<128x256xf32>
    %34 = arith.cmpf one, %32, %33 : vector<128x256xf32>
    %cst_14 = arith.constant -1.000000e+30 : f32
    %35 = vector.broadcast %cst_14 : f32 to vector<128x256xf32>
    %36 = arith.select %34, %32, %35 : vector<128x256xi1>, vector<128x256xf32>
    %cst_15 = arith.constant dense<0xFF800000> : vector<128xf32>
    %37 = vector.multi_reduction <maximumf>, %36, %cst_15 [1] : vector<128x256xf32> to vector<128xf32>
    %38 = vector.shape_cast %37 : vector<128xf32> to vector<128x1xf32>
    %39 = vector.broadcast %38 : vector<128x1xf32> to vector<128x256xf32>
    %40 = arith.subf %36, %39 : vector<128x256xf32>
    %41 = math.exp %40 : vector<128x256xf32>
    %cst_16 = arith.constant 0.000000e+00 : f32
    %42 = vector.broadcast %cst_16 : f32 to vector<128x256xf32>
    %43 = arith.select %34, %41, %42 : vector<128x256xi1>, vector<128x256xf32>
    %cst_17 = arith.constant dense<0.000000e+00> : vector<128xf32>
    %44 = vector.multi_reduction <add>, %43, %cst_17 [1] : vector<128x256xf32> to vector<128xf32>
    %45 = vector.shape_cast %44 : vector<128xf32> to vector<128x1xf32>
    %cst_18 = arith.constant 0.000000e+00 : f32
    %46 = vector.broadcast %cst_18 : f32 to vector<128x1xf32>
    %47 = arith.cmpf ogt, %45, %46 : vector<128x1xf32>
    %cst_19 = arith.constant 1.000000e+00 : f32
    %48 = vector.broadcast %cst_19 : f32 to vector<128x1xf32>
    %49 = arith.select %47, %45, %48 : vector<128x1xi1>, vector<128x1xf32>
    %50 = tpu.reciprocal %49 {approx = true} : vector<128x1xf32> -> vector<128x1xf32>
    %51 = vector.broadcast %50 : vector<128x1xf32> to vector<128x256xf32>
    %52 = arith.mulf %43, %51 : vector<128x256xf32>
    %53 = arith.truncf %52 : vector<128x256xf32> to vector<128x256xbf16>
    %cst_20 = arith.constant dense<0.000000e+00> : vector<128x32xf32>
    %54 = tpu.matmul %53, %3, %cst_20 {dimension_numbers = #tpu.dot_dimension_numbers<[1], [0], [0], [1], [0, 0, 1, 1], [], []>} : vector<128x256xbf16>, vector<256x32xbf16>, vector<128x32xf32> -> vector<128x32xf32>
    %55 = arith.addf %31, %54 : vector<128x32xf32>
    %cst_21 = arith.constant dense<0.000000e+00> : vector<128x256xf32>
    %56 = tpu.matmul %32, %8, %cst_21 {dimension_numbers = #tpu.dot_dimension_numbers<[1], [0], [0], [1], [0, 0, 1, 1], [], []>} : vector<128x256xf32>, vector<256x256xf32>, vector<128x256xf32> -> vector<128x256xf32>
    %cst_22 = arith.constant 0.000000e+00 : f32
    %57 = vector.broadcast %cst_22 : f32 to vector<128x256xf32>
    %58 = arith.cmpf one, %56, %57 : vector<128x256xf32>
    %cst_23 = arith.constant -1.000000e+30 : f32
    %59 = vector.broadcast %cst_23 : f32 to vector<128x256xf32>
    %60 = arith.select %58, %56, %59 : vector<128x256xi1>, vector<128x256xf32>
    %cst_24 = arith.constant dense<0xFF800000> : vector<128xf32>
    %61 = vector.multi_reduction <maximumf>, %60, %cst_24 [1] : vector<128x256xf32> to vector<128xf32>
    %62 = vector.shape_cast %61 : vector<128xf32> to vector<128x1xf32>
    %63 = vector.broadcast %62 : vector<128x1xf32> to vector<128x256xf32>
    %64 = arith.subf %60, %63 : vector<128x256xf32>
    %65 = math.exp %64 : vector<128x256xf32>
    %cst_25 = arith.constant 0.000000e+00 : f32
    %66 = vector.broadcast %cst_25 : f32 to vector<128x256xf32>
    %67 = arith.select %58, %65, %66 : vector<128x256xi1>, vector<128x256xf32>
    %cst_26 = arith.constant dense<0.000000e+00> : vector<128xf32>
    %68 = vector.multi_reduction <add>, %67, %cst_26 [1] : vector<128x256xf32> to vector<128xf32>
    %69 = vector.shape_cast %68 : vector<128xf32> to vector<128x1xf32>
    %cst_27 = arith.constant 0.000000e+00 : f32
    %70 = vector.broadcast %cst_27 : f32 to vector<128x1xf32>
    %71 = arith.cmpf ogt, %69, %70 : vector<128x1xf32>
    %cst_28 = arith.constant 1.000000e+00 : f32
    %72 = vector.broadcast %cst_28 : f32 to vector<128x1xf32>
    %73 = arith.select %71, %69, %72 : vector<128x1xi1>, vector<128x1xf32>
    %74 = tpu.reciprocal %73 {approx = true} : vector<128x1xf32> -> vector<128x1xf32>
    %75 = vector.broadcast %74 : vector<128x1xf32> to vector<128x256xf32>
    %76 = arith.mulf %67, %75 : vector<128x256xf32>
    %77 = arith.truncf %76 : vector<128x256xf32> to vector<128x256xbf16>
    %cst_29 = arith.constant dense<0.000000e+00> : vector<128x32xf32>
    %78 = tpu.matmul %77, %3, %cst_29 {dimension_numbers = #tpu.dot_dimension_numbers<[1], [0], [0], [1], [0, 0, 1, 1], [], []>} : vector<128x256xbf16>, vector<256x32xbf16>, vector<128x32xf32> -> vector<128x32xf32>
    %79 = arith.addf %55, %78 : vector<128x32xf32>
    %cst_30 = arith.constant 2.500000e-01 : f32
    %80 = vector.broadcast %cst_30 : f32 to vector<128x32xf32>
    %81 = arith.mulf %79, %80 : vector<128x32xf32>
    %82 = tpu.concatenate %81, %30, %54, %78 in 1 : vector<128x32xf32>, vector<128x32xf32>, vector<128x32xf32>, vector<128x32xf32> -> vector<128x128xf32>
    %c0_31 = arith.constant 0 : index
    %c0_32 = arith.constant 0 : index
    %83 = vector.load %arg3[%c0_31, %c0_32] : memref<128x128xf32, #tpu.memory_space<vmem>>, vector<128x128xf32>
    tpu.vector_store %arg3[%c0_31, %c0_32], %82 {strides = array<i32>} : memref<128x128xf32, #tpu.memory_space<vmem>>, vector<128x128xf32>,
    return
  }
  func.func @transform_0(%arg0: i32) -> (i32, i32) {
    %c0_i32 = arith.constant 0 : i32
    %c0_i32_0 = arith.constant 0 : i32
    %c0_i32_1 = arith.constant 0 : i32
    return %c0_i32, %c0_i32_0 : i32, i32
  }
  func.func @transform_1(%arg0: i32) -> (i32, i32) {
    %c0_i32 = arith.constant 0 : i32
    %c0_i32_0 = arith.constant 0 : i32
    %c0_i32_1 = arith.constant 0 : i32
    return %c0_i32, %c0_i32_0 : i32, i32
  }
  func.func @transform_2(%arg0: i32) -> (i32, i32) {
    %c0_i32 = arith.constant 0 : i32
    %c0_i32_0 = arith.constant 0 : i32
    return %arg0, %c0_i32 : i32, i32
  }
}

</mosaic_0001>

<bundles_post_ra>
// kernel: tpu_custom_call.1
= control target key start
LH: loop header
LB: loop body
LE: loop exit
PB: predicated region body
PF: predicated region fallthrough
CT: control target
= control target key end

     0   :  { %7 = vsyncpa [#allocation3], 0  ;;  %s5892_s0 = inlined_call_operand.hbm [shape: f32[256,256], index: 0, kind: input, shape index: {}]   ;;  %s5893_s1 = inlined_call_operand.vmem [shape: f32[256,32], index: 1, kind: input, shape index: {}]   ;;  %s5894_s2 = inlined_call_operand.hbm [shape: f32[256,128], index: 2, kind: output, shape index: {}]  }
   0x1   :  { %8 = vsyncpa [#allocation4], 0 }
   0x2   :  { %10 = vsyncpa [#allocation4 + $0x1], 0  ;;  %s3208_s9 = smov 0   ;;  %s3210_s10 = smov 0  }
   0x3   :  { %s3212_s11 = smov 0   ;;  %s3214_s12 = smov 0  }
   0x4 LB: > { %s3229_s13 = sadd.s32 4294967295, %s3183_s12   ;;  %s2678_s14 = sadd.s32 4294967294, %s3183_s12   ;;  %s3183_s12 = sphi %s3214_s12, %s6299_s12   ;;  %s3179_s11 = sphi %s3212_s11, %s6298_s11   ;;  %s3175_s10 = sphi %s3210_s10, %s6297_s10   ;;  %s3171_s9 = sphi %s3208_s9, %s6296_s9  }
   0x5   : > { %s3233_s15 = sadd.s32 1, %s3183_s12   ;;  %s65_s16 = sadd.s32 1, %s3179_s11 }
   0x6   : > { %s62_s17 = ssub.s32 %s3183_s12, %s3233_s15  ;;  %p75_p0 = scmp.ne.s32.totalorder %s3179_s11, %s3175_s10 }
   0x7   : > { %p63_p1 = scmp.eq.s32.totalorder %s62_s17, 0  ;;  %p76_p2 = scmp.eq.s32.totalorder %s3229_s13, 1 }
   0x8   : > { %p81_p3 = scmp.ne.s32.totalorder %s3175_s10, %s3171_s9  ;;  %p82_p4 = scmp.eq.s32.totalorder %s2678_s14, 1 }
   0x9   : > { %s3244_s18 = scalar_select %p63_p1, %s3179_s11, %s65_s16  }
   0xa   : > { %p3246_p5 = por %p76_p2, %p75_p0  ;;  %p3250_p6 = por %p82_p4, %p81_p3 }
   0xb   : > { %p2679_p7 = scmp.ge.s32.totalorder %s3183_s12, 1  ;;  %p89_p8 = scmp.lt.s32.totalorder %s3183_s12, 3 }
   0xc   : > { %p2724_p9 = scmp.eq.s32.totalorder %s3229_s13, 0  ;;  %s100_s23 = sshll.u32 %s5892_s0, 4  ;;  %s101_s23 = int_to_ptr.hbm [resolvable:$true] %s100_s23 }
   0xd   : > { %p90_p10 = pnand %p2679_p7, %p89_p8  ;;  %s3185_s24 = smov [#allocation2]  }
   0xe   : > { %s102_s25 = sshll.u32 %s3185_s24, 4  ;;  %s3186_s26 = smov 256   ;;  %s103_s25 = int_to_ptr.vmem [resolvable:$true] %s102_s25 }
   0xf   : > { %p2716_p11 = pneg %p90_p10  ;;  %s3187_s27 = smov 16  }
  0x10   : > { %121 = sbr.rel (%p90_p10) target bundleno = 1809 (0x711), region = 28 }
  0x11   : > { %p2717_p12 = pnand %p2724_p9, %p2716_p11 }
  0x13   : > { %2719 = dma.hbm_to_vmem [thread:$0]  (!%p2717_p12), %s101_s23, 8192, %s103_s25, [#allocation3], %s3186_s26, %s3186_s26, %s3187_s27  }
  0x15   : > { %3162 = dma.done.wait (%p2724_p9), [#allocation3], 8192  }
  0x16   : > { %3164 = vsyncadd (%p2724_p9), [#allocation3], 4294959104  ;;  %s3267_s28 = sshll.u32 %s3229_s13, 7  ;;  %s3189_s22 = smov 64  }
  0x17   : > { %s189_s29 = sshra.s32 %s3267_s28, 3  ;;  %s3190_s23 = smov 96  }
  0x18   : > { %s2692_s30 = sshll.u32 %s189_s29, 4  ;;  %s5636_s26 = scalar_lea.vmem %s5893_s1, %s3267_s28 }
  0x19   : > { %s3270_s3 = scalar_lea.vmem [#allocation2], %s2692_s30  ;;  %s136_s27 = sand.u32 1, %s3175_s10  }
  0x1a   : > { %v3273_v0 = vld [vmem:[%s3270_s3 + $0xa0] sm:$0xff]  ;;  %v3276_v1 = vld [vmem:[%s3270_s3 + $0xa8] sm:$0xff]  ;;  %v3319_v11 = vld [vmem:[%s3270_s3 + $0xb0] sm:$0xff]  ;;  %s2683_s29 = sshll.u32 %s136_s27, 7  ;;  %s2608_s6 = scalar_lea.hbm %s5894_s2, %s3267_s28 }
  0x1b   : > { %v3279_v2 = vld [vmem:[%s3270_s3 + $0x80] sm:$0xff]  ;;  %vm327_vm0 = vcmp.ne.f32.partialorder %v3273_v0, 0.0  ;;  %vm328_vm1 = vcmp.ne.f32.partialorder %v3276_v1, 0.0  ;;  %v3284_v3 = vld [vmem:[%s3270_s3 + $0x88] sm:$0xff]  ;;  %v3334_v15 = vld [vmem:[%s3270_s3 + $0xb8] sm:$0xff]  ;;  %vm329_vm6 = vcmp.ne.f32.partialorder %v3319_v11, 0.0 }
  0x1c   : > { %vm323_vm2 = vcmp.ne.f32.partialorder %v3279_v2, 0.0  ;;  %v3288_v4 = vld [vmem:[%s3270_s3] sm:$0xff]  ;;  %v3291_v5 = vld [vmem:[%s3270_s3 + $0x8] sm:$0xff]  ;;  %v3296_v6 = vsel %vm327_vm0, %v3273_v0, -1e+30  ;;  %vm324_vm3 = vcmp.ne.f32.partialorder %v3284_v3, 0.0 }
  0x1d   : > { %v3301_v7 = vsel %vm328_vm1, %v3276_v1, -1e+30  ;;  %vm307_vm4 = vcmp.ne.f32.partialorder %v3288_v4, 0.0  ;;  %v3310_v9 = vsel %vm323_vm2, %v3279_v2, -1e+30  ;;  %vm308_vm5 = vcmp.ne.f32.partialorder %v3291_v5, 0.0 }
  0x1e   : > { %v401_v8 = vmax.f32 %v3296_v6, %v3301_v7  ;;  %v3315_v10 = vsel %vm324_vm3, %v3284_v3, -1e+30  ;;  %v3326_v13 = vsel %vm307_vm4, %v3288_v4, -1e+30  ;;  %v3331_v14 = vsel %vm308_vm5, %v3291_v5, -1e+30 }
  0x1f   : > { %v395_v12 = vmax.f32 %v3310_v9, %v3315_v10  ;;  %v371_v16 = vmax.f32 %v3326_v13, %v3331_v14  ;;  %vm330_vm7 = vcmp.ne.f32.partialorder %v3334_v15, 0.0  ;;  %v3343_v17 = vsel %vm329_vm6, %v3319_v11, -1e+30  ;;  %v3346_v18 = vld [vmem:[%s3270_s3 + $0x90] sm:$0xff]  ;;  %v3349_v19 = vld [vmem:[%s3270_s3 + $0x98] sm:$0xff]  ;;  %v3387_v27 = vld [vmem:[%s3270_s3 + $0xc0] sm:$0xff] }
  0x20   : > { %402 = vmax.xlane.f32.xlu2 %v401_v8  ;;  %v3352_v20 = vld [vmem:[%s3270_s3 + $0x10] sm:$0xff]  ;;  %v3357_v21 = vsel %vm330_vm7, %v3334_v15, -1e+30  ;;  %vm325_vm8 = vcmp.ne.f32.partialorder %v3346_v18, 0.0  ;;  %vm326_vm9 = vcmp.ne.f32.partialorder %v3349_v19, 0.0  ;;  %v3362_v22 = vld [vmem:[%s3270_s3 + $0x18] sm:$0xff] }
  0x21   : > { %396 = vmax.xlane.f32.xlu0 %v395_v12  ;;  %vm5896_vm10 = vcmp.ne.f32.partialorder %v3352_v20, 0.0  ;;  %372 = vmax.xlane.f32.xlu1 %v371_v16  ;;  %v3368_v23 = vsel %vm325_vm8, %v3346_v18, -1e+30  ;;  %v3373_v24 = vsel %vm326_vm9, %v3349_v19, -1e+30  ;;  %vm5895_vm11 = vcmp.ne.f32.partialorder %v3362_v22, 0.0 }
  0x22   : > { %v3379_v25 = vsel %vm5896_vm10, %v3352_v20, -1e+30  ;;  %v3384_v26 = vsel %vm5895_vm11, %v3362_v22, -1e+30  ;;  %v3390_v28 = vld [vmem:[%s3270_s3 + $0xc8] sm:$0xff]  ;;  %v404_v29 = vmax.f32 %v3343_v17, %v3357_v21  ;;  %v3395_v30 = vld [vmem:[%s3270_s3 + $0x20] sm:$0xff]  ;;  %v398_v32 = vmax.f32 %v3368_v23, %v3373_v24 }
  0x23   : > { %v3398_v31 = vld [vmem:[%s3270_s3 + $0x28] sm:$0xff]  ;;  %v374_v33 = vmax.f32 %v3379_v25, %v3384_v26  ;;  %vm5902_vm12 = vcmp.ne.f32.partialorder %v3387_v27, 0.0  ;;  %vm5901_vm13 = vcmp.ne.f32.partialorder %v3390_v28, 0.0  ;;  %vm5900_vm14 = vcmp.ne.f32.partialorder %v3395_v30, 0.0  ;;  %v3409_v34 = vld [vmem:[%s3270_s3 + $0x30] sm:$0xff]  ;;  %v3412_v35 = vld [vmem:[%s3270_s3 + $0x38] sm:$0xff] }
  0x24   : > { %vm5899_vm15 = vcmp.ne.f32.partialorder %v3398_v31, 0.0  ;;  %v3417_v36 = vsel %vm5902_vm12, %v3387_v27, -1e+30  ;;  %v3422_v37 = vsel %vm5901_vm13, %v3390_v28, -1e+30  ;;  %vm5897_vm11 = vcmp.ne.f32.partialorder %v3409_v34, 0.0 }
  0x25   : > { %vm5898_vm10 = vcmp.ne.f32.partialorder %v3412_v35, 0.0  ;;  %v3429_v38 = vsel %vm5900_vm14, %v3395_v30, -1e+30  ;;  %v3434_v39 = vsel %vm5899_vm15, %v3398_v31, -1e+30  ;;  %v3437_v40 = vld [vmem:[%s3270_s3 + $0x50] sm:$0xff]  ;;  %v407_v44 = vmax.f32 %v3417_v36, %v3422_v37 }
  0x26   : > { %v3440_v41 = vld [vmem:[%s3270_s3 + $0x58] sm:$0xff]  ;;  %v3445_v42 = vsel %vm5897_vm11, %v3409_v34, -1e+30  ;;  %v3450_v43 = vsel %vm5898_vm10, %v3412_v35, -1e+30  ;;  %v3455_v45 = vld [vmem:[%s3270_s3 + $0xd0] sm:$0xff]  ;;  %v377_v47 = vmax.f32 %v3429_v38, %v3434_v39 }
  0x27   : > { %6023 = vst [vmem:[#allocation8_spill] sm:$0xff] %v3440_v41  ;;  %v3458_v46 = vld [vmem:[%s3270_s3 + $0xd8] sm:$0xff]  ;;  %v3463_v48 = vld [vmem:[%s3270_s3 + $0x40] sm:$0xff]  ;;  %v3466_v49 = vld [vmem:[%s3270_s3 + $0x48] sm:$0xff]  ;;  %vm5908_vm11 = vcmp.ne.f32.partialorder %v3437_v40, 0.0  ;;  %vm5907_vm10 = vcmp.ne.f32.partialorder %v3440_v41, 0.0  ;;  %v380_v50 = vmax.f32 %v3445_v42, %v3450_v43 }
  0x28   : > { %405 = vmax.xlane.f32.xlu2 %v404_v29  ;;  %6024 = vst [vmem:[#allocation9_spill] sm:$0xff] %v3455_v45  ;;  %vm5906_vm15 = vcmp.ne.f32.partialorder %v3455_v45, 0.0  ;;  %vm5904_vm14 = vcmp.ne.f32.partialorder %v3458_v46, 0.0  ;;  %vm5903_vm13 = vcmp.ne.f32.partialorder %v3463_v48, 0.0  ;;  %vm5905_vm12 = vcmp.ne.f32.partialorder %v3466_v49, 0.0  ;;  %v3497_v55 = vld [vmem:[%s3270_s3 + $0x60] sm:$0xff] }
  0x29   : > { %399 = vmax.xlane.f32.xlu0 %v398_v32  ;;  %375 = vmax.xlane.f32.xlu1 %v374_v33  ;;  %6025 = vst [vmem:[#allocation10_spill] sm:$0xff] %v3458_v46  ;;  %v3479_v51 = vsel %vm5908_vm11, %v3437_v40, -1e+30  ;;  %v3484_v52 = vsel %vm5907_vm10, %v3440_v41, -1e+30  ;;  %v3500_v56 = vld [vmem:[%s3270_s3 + $0x68] sm:$0xff] }
  0x2a   : > { %6026 = vst [vmem:[#allocation11_spill] sm:$0xff] %v3463_v48  ;;  %v3489_v53 = vsel %vm5906_vm15, %v3455_v45, -1e+30  ;;  %v3494_v54 = vsel %vm5904_vm14, %v3458_v46, -1e+30  ;;  %v386_v59 = vmax.f32 %v3479_v51, %v3484_v52  ;;  %v3515_v60 = vld [vmem:[%s3270_s3 + $0xe0] sm:$0xff] }
  0x2b   : > { %6027 = vst [vmem:[#allocation12_spill] sm:$0xff] %v3466_v49  ;;  %v3505_v57 = vsel %vm5903_vm13, %v3463_v48, -1e+30  ;;  %v3510_v58 = vsel %vm5905_vm12, %v3466_v49, -1e+30  ;;  %v3518_v61 = vld [vmem:[%s3270_s3 + $0xe8] sm:$0xff]  ;;  %v410_v62 = vmax.f32 %v3489_v53, %v3494_v54 }
  0x2c   : > { %6028 = vst [vmem:[#allocation13_spill] sm:$0xff] %v3497_v55  ;;  %v3523_v63 = vld [vmem:[%s3270_s3 + $0xf0] sm:$0xff]  ;;  %v3526_v8 = vld [vmem:[%s3270_s3 + $0xf8] sm:$0xff]  ;;  %vm319_vm13 = vcmp.ne.f32.partialorder %v3497_v55, 0.0  ;;  %vm320_vm14 = vcmp.ne.f32.partialorder %v3500_v56, 0.0  ;;  %v383_v12 = vmax.f32 %v3505_v57, %v3510_v58  ;;  %vm335_vm12 = vcmp.ne.f32.partialorder %v3515_v60, 0.0 }
  0x2d   : > { %6029 = vst [vmem:[#allocation14_spill] sm:$0xff] %v3500_v56  ;;  %vm5911_vm15 = vcmp.ne.f32.partialorder %v3518_v61, 0.0  ;;  %vm5910_vm10 = vcmp.ne.f32.partialorder %v3523_v63, 0.0  ;;  %vm338_vm11 = vcmp.ne.f32.partialorder %v3526_v8, 0.0  ;;  %v3539_v16 = vsel %vm319_vm13, %v3497_v55, -1e+30 }
  0x2e   : > { %6030 = vst [vmem:[#allocation15_spill] sm:$0xff] %v3515_v60  ;;  %v3544_v29 = vsel %vm320_vm14, %v3500_v56, -1e+30  ;;  %v3549_v32 = vsel %vm335_vm12, %v3515_v60, -1e+30  ;;  %s5741_s30 = scalar_lea.vmem [#allocation5], %s2683_s29 }
  0x2f   : > { %6031 = vst [vmem:[#allocation16_spill] sm:$0xff] %v3518_v61  ;;  %v3554_v33 = vsel %vm5911_vm15, %v3518_v61, -1e+30  ;;  %s2609_s7 = sshll.u32 %s5741_s30, 4  ;;  %s2611_s8 = sshll.u32 %s2608_s6, 4  ;;  %s2610_s7 = int_to_ptr.vmem [resolvable:$true] %s2609_s7  ;;  %s2612_s8 = int_to_ptr.hbm [resolvable:$true] %s2611_s8 }
  0x30   : > { %408 = vmax.xlane.f32.xlu2 %v407_v44  ;;  %6032 = vst [vmem:[#allocation17_spill] sm:$0xff] %v3523_v63  ;;  %v3559_v44 = vsel %vm5910_vm10, %v3523_v63, -1e+30  ;;  %s2597_s13 = scalar_lea.sflag [#allocation4], %s136_s27  ;;  %s3131_s14 = sshra.s32 %s2612_s8, 4  ;;  %s3132_s14 = int_to_ptr.hbm [resolvable:$true] %s3131_s14 }
  0x31   : > { %378 = vmax.xlane.f32.xlu0 %v377_v47  ;;  %381 = vmax.xlane.f32.xlu1 %v380_v50  ;;  %6033 = vst [vmem:[#allocation18_spill] sm:$0xff] %v3526_v8  ;;  %v3564_v47 = vsel %vm338_vm11, %v3526_v8, -1e+30  ;;  %v389_v50 = vmax.f32 %v3539_v16, %v3544_v29  ;;  %s3133_s16 = scalar_lea.hbm %s3132_s14, 128  ;;  %s3137_s28 = scalar_lea.hbm %s5894_s2, 256 }
  0x32   : > { %v416_v61 = vmax.f32 %v3559_v44, %v3564_v47  ;;  %p3134_p13 = scmp.ne.s32.totalorder %s3132_s14, %s3133_s16  ;;  %p3138_p2 = scmp.lt.s32.totalorder %s3132_s14, %s5894_s2 }
  0x33   : > { %p3139_p3 = scmp.lt.s32.totalorder %s3137_s28, %s3133_s16 }
  0x34   : > { %p3135_p0 = pnand %p3134_p13, %p3246_p5 }
  0x35   : > { %p3140_p4 = por %p3139_p3, %p3138_p2 }
  0x36   : > { %p3136_p1 = pneg %p3135_p0 }
  0x38   : > { %387 = vmax.xlane.f32.xlu2 %v386_v59  ;;  %v3569_v59 = vld [vmem:[%s3270_s3 + $0x70] sm:$0xff]  ;;  %p3141_p7 = pnand %p3140_p4, %p3136_p1 }
  0x39   : > { %411 = vmax.xlane.f32.xlu0 %v410_v62  ;;  %384 = vmax.xlane.f32.xlu1 %v383_v12  ;;  %6034 = vst [vmem:[#allocation19_spill] sm:$0xff] %v3569_v59  ;;  %v3572_v62 = vld [vmem:[%s3270_s3 + $0x78] sm:$0xff]  ;;  %v413_v12 = vmax.f32 %v3549_v32, %v3554_v33  ;;  %vm321_vm10 = vcmp.ne.f32.partialorder %v3569_v59, 0.0 }
  0x3a   : > { %6035 = vst [vmem:[#allocation20_spill] sm:$0xff] %v3572_v62  ;;  %vm322_vm15 = vcmp.ne.f32.partialorder %v3572_v62, 0.0  ;;  %v3583_v8 = vsel %vm321_vm10, %v3569_v59, -1e+30 }
  0x3b   : > { %6036 = vst [vmem:[#allocation21_spill] sm:$0xff] %v3583_v8  ;;  %v3588_v63 = vsel %vm322_vm15, %v3572_v62, -1e+30 }
  0x3c   : > { %6037 = vst [vmem:[#allocation22_spill] sm:$0xff] %v3588_v63  ;;  %v392_v60 = vmax.f32 %v3583_v8, %v3588_v63 }
  0x40   : > { %390 = vmax.xlane.f32.xlu2 %v389_v50 }
  0x41   : > { %414 = vmax.xlane.f32.xlu0 %v413_v12  ;;  %417 = vmax.xlane.f32.xlu1 %v416_v61 }
  0x49   : > { %393 = vmax.xlane.f32.xlu0 %v392_v60 }
  0x93   : > { %v403_v56 = vpop.xlane.xlu2 %402 }
  0x94   : > { %v439_v55 = vsub.f32 %v3296_v6, %v403_v56  ;;  %v397_v50 = vpop.xlane.xlu0 %396  ;;  %v373_v59 = vpop.xlane.xlu1 %372  ;;  %v440_v61 = vsub.f32 %v3301_v7, %v403_v56 }
  0x95   : > { %v435_v12 = vsub.f32 %v3310_v9, %v397_v50  ;;  %v436_v49 = vsub.f32 %v3315_v10, %v397_v50  ;;  %v419_v46 = vsub.f32 %v3326_v13, %v373_v59  ;;  %v420_v62 = vsub.f32 %v3331_v14, %v373_v59 }
  0x96   : > { %v491_v48 = vmul.f32 1.442695, %v439_v55  ;;  %v493_v6 = vmul.f32 1.442695, %v440_v61 }
  0x97   : > { %v483_v45 = vmul.f32 1.442695, %v435_v12  ;;  %v485_v41 = vmul.f32 1.442695, %v436_v49  ;;  %v451_v63 = vmul.f32 1.442695, %v419_v46 }
  0x98   : > { %2767 = vpow2.f32 %v491_v48  ;;  %v453_v60 = vmul.f32 1.442695, %v420_v62 }
  0x99   : > { %2769 = vpow2.f32 %v483_v45 }
  0x9a   : > { %2771 = vpow2.f32 %v485_v41 }
  0x9b   : > { %v406_v8 = vpop.xlane.xlu2 %405  ;;  %2773 = vpow2.f32 %v451_v63 }
  0x9c   : > { %v441_v9 = vsub.f32 %v3343_v17, %v406_v8  ;;  %v442_v10 = vsub.f32 %v3357_v21, %v406_v8  ;;  %v400_v55 = vpop.xlane.xlu0 %399  ;;  %2775 = vpow2.f32 %v453_v60  ;;  %v376_v14 = vpop.xlane.xlu1 %375 }
  0x9d   : > { %v437_v13 = vsub.f32 %v3368_v23, %v400_v55  ;;  %v438_v7 = vsub.f32 %v3373_v24, %v400_v55  ;;  %v421_v48 = vsub.f32 %v3379_v25, %v376_v14  ;;  %v422_v45 = vsub.f32 %v3384_v26, %v376_v14 }
  0x9e   : > { %v495_v49 = vmul.f32 1.442695, %v441_v9  ;;  %v497_v46 = vmul.f32 1.442695, %v442_v10  ;;  %v2768_v41 = vpop.eup %2767  ;;  %2777 = vpow2.f32 %v493_v6 }
  0x9f   : > { %v487_v56 = vmul.f32 1.442695, %v437_v13  ;;  %v489_v63 = vmul.f32 1.442695, %v438_v7  ;;  %v2770_v17 = vpop.eup %2769  ;;  %v455_v21 = vmul.f32 1.442695, %v421_v48 }
  0xa0   : > { %2779 = vpow2.f32 %v495_v49  ;;  %v2772_v8 = vpop.eup %2771  ;;  %v457_v59 = vmul.f32 1.442695, %v422_v45  ;;  %v3606_v23 = vsel %vm323_vm2, %v2770_v17, 0.0  ;;  %v3648_v11 = vsel %vm327_vm0, %v2768_v41, 0.0 }
  0xa1   : > { %2781 = vpow2.f32 %v497_v46  ;;  %v2774_v24 = vpop.eup %2773  ;;  %v3610_v25 = vsel %vm324_vm3, %v2772_v8, 0.0  ;;  %vm6038_vm2 = vcmp.ne.f32.partialorder %v3352_v20, 0.0  ;;  %vm6039_vm0 = vcmp.ne.f32.partialorder %v3362_v22, 0.0 }
  0xa2   : > { %2783 = vpow2.f32 %v487_v56  ;;  %v2776_v26 = vpop.eup %2775  ;;  %v571_v62 = vadd.f32 %v3610_v25, %v3606_v23  ;;  %v3616_v50 = vsel %vm307_vm4, %v2774_v24, 0.0  ;;  %vm6041_vm3 = vcmp.ne.f32.partialorder %v3390_v28, 0.0  ;;  %v171_v28 = vld [vmem:[%s5893_s1 + $0xf0] sm:$0xff] }
  0xa3   : > { %2785 = vpow2.f32 %v489_v63  ;;  %v409_v12 = vpop.xlane.xlu2 %408  ;;  %v3620_v2 = vsel %vm308_vm5, %v2776_v26, 0.0  ;;  %vm6042_vm4 = vcmp.ne.f32.partialorder %v3395_v30, 0.0  ;;  %vm6043_vm5 = vcmp.ne.f32.partialorder %v3398_v31, 0.0 }
  0xa4   : > { %2787 = vpow2.f32 %v455_v21  ;;  %v443_v61 = vsub.f32 %v3417_v36, %v409_v12  ;;  %v444_v3 = vsub.f32 %v3422_v37, %v409_v12  ;;  %v379_v60 = vpop.xlane.xlu0 %378  ;;  %v2778_v6 = vpop.eup %2777  ;;  %572 = vadd.xlane.f32.xlu1 %v571_v62  ;;  %v547_v9 = vadd.f32 %v3620_v2, %v3616_v50 }
  0xa5   : > { %2789 = vpow2.f32 %v457_v59  ;;  %v423_v4 = vsub.f32 %v3429_v38, %v379_v60  ;;  %v424_v10 = vsub.f32 %v3434_v39, %v379_v60  ;;  %v382_v55 = vpop.xlane.xlu1 %381  ;;  %v3652_v15 = vsel %vm328_vm1, %v2778_v6, 0.0 }
  0xa6   : > { %v2780_v13 = vpop.eup %2779  ;;  %v499_v5 = vmul.f32 1.442695, %v443_v61  ;;  %v501_v7 = vmul.f32 1.442695, %v444_v3  ;;  %v425_v14 = vsub.f32 %v3445_v42, %v382_v55  ;;  %v426_v36 = vsub.f32 %v3450_v43, %v382_v55  ;;  %548 = vadd.xlane.f32.xlu0 %v547_v9 }
  0xa7   : > { %v2782_v37 = vpop.eup %2781  ;;  %v459_v49 = vmul.f32 1.442695, %v423_v4  ;;  %v461_v46 = vmul.f32 1.442695, %v424_v10  ;;  %v3632_v45 = vsel %vm329_vm6, %v2780_v13, 0.0  ;;  %vm6040_vm1 = vcmp.ne.f32.partialorder %v3387_v27, 0.0 }
  0xa8   : > { %v2784_v48 = vpop.eup %2783  ;;  %2791 = vpow2.f32 %v499_v5  ;;  %v3636_v38 = vsel %vm330_vm7, %v2782_v37, 0.0  ;;  %v463_v39 = vmul.f32 1.442695, %v425_v14  ;;  %v465_v43 = vmul.f32 1.442695, %v426_v36  ;;  %v156_v27 = vld [vmem:[%s5893_s1 + $0x78] sm:$0xff] }
  0xa9   : > { %v2786_v56 = vpop.eup %2785  ;;  %2793 = vpow2.f32 %v501_v7  ;;  %v3640_v42 = vsel %vm325_vm8, %v2784_v48, 0.0  ;;  %v580_v8 = vadd.f32 %v3636_v38, %v3632_v45  ;;  %v172_v14 = vld [vmem:[%s5893_s1 + $0xf8] sm:$0xff]  ;;  %v153_v36 = vld [vmem:[%s5893_s1 + $0x60] sm:$0xff]  ;;  %v154_v48 = vld [vmem:[%s5893_s1 + $0x68] sm:$0xff]  ;;  %vm6044_vm6 = vcmp.ne.f32.partialorder %v3409_v34, 0.0 }
  0xaa   : > { %v2788_v63 = vpop.eup %2787  ;;  %2795 = vpow2.f32 %v459_v49  ;;  %v3644_v17 = vsel %vm326_vm9, %v2786_v56, 0.0  ;;  %v3724_v31 = vpack.c.bf16 %v154_v48, %v153_v36  ;;  %vm6045_vm7 = vcmp.ne.f32.partialorder %v3412_v35, 0.0  ;;  %v169_v34 = vld [vmem:[%s5893_s1 + $0xe0] sm:$0xff] }
  0xab   : > { %v2790_v21 = vpop.eup %2789  ;;  %2797 = vpow2.f32 %v461_v46  ;;  %v574_v18 = vadd.f32 %v3644_v17, %v3640_v42  ;;  %v3660_v19 = vsel %vm6038_vm2, %v2788_v63, 0.0  ;;  %v388_v59 = vpop.xlane.xlu2 %387  ;;  %v3711_v46 = vpack.c.bf16 %v172_v14, %v171_v28 }
  0xac   : > { %v3664_v0 = vsel %vm6039_vm0, %v2790_v21, 0.0  ;;  %v429_v1 = vsub.f32 %v3479_v51, %v388_v59  ;;  %v430_v41 = vsub.f32 %v3484_v52, %v388_v59  ;;  %v412_v24 = vpop.xlane.xlu0 %411  ;;  %2799 = vpow2.f32 %v463_v39 }
  0xad   : > { %575 = vadd.xlane.f32.xlu2 %v574_v18  ;;  %v550_v26 = vadd.f32 %v3664_v0, %v3660_v19  ;;  %v445_v62 = vsub.f32 %v3489_v53, %v412_v24  ;;  %v446_v20 = vsub.f32 %v3494_v54, %v412_v24  ;;  %2801 = vpow2.f32 %v465_v43  ;;  %v385_v12 = vpop.xlane.xlu1 %384  ;;  %v155_v53 = vld [vmem:[%s5893_s1 + $0x70] sm:$0xff]  ;;  %740 = vmatpush.bf16.msra.mxu1 %v3711_v46 }
  0xae   : > { %v2792_v61 = vpop.eup %2791  ;;  %v471_v22 = vmul.f32 1.442695, %v429_v1  ;;  %v473_v3 = vmul.f32 1.442695, %v430_v41  ;;  %v427_v60 = vsub.f32 %v3505_v57, %v385_v12  ;;  %v428_v51 = vsub.f32 %v3510_v58, %v385_v12  ;;  %581 = vadd.xlane.f32.xlu0 %v580_v8  ;;  %2702 = vmatpush.bf16.msra.mxu3 %v3711_v46  ;;  %v151_v12 = vld [vmem:[%s5893_s1 + $0x50] sm:$0xff] }
  0xaf   : > { %v2794_v52 = vpop.eup %2793  ;;  %551 = vadd.xlane.f32.xlu1 %v550_v26  ;;  %v503_v6 = vmul.f32 1.442695, %v445_v62  ;;  %v505_v9 = vmul.f32 1.442695, %v446_v20  ;;  %v3676_v4 = vsel %vm6040_vm1, %v2792_v61, 0.0  ;;  %v577_v57 = vadd.f32 %v3652_v15, %v3648_v11  ;;  %v152_v61 = vld [vmem:[%s5893_s1 + $0x58] sm:$0xff] }
  0xb0   : > { %v2796_v54 = vpop.eup %2795  ;;  %2803 = vpow2.f32 %v471_v22  ;;  %v3685_v58 = vsel %vm6041_vm3, %v2794_v52, 0.0  ;;  %v467_v10 = vmul.f32 1.442695, %v427_v60  ;;  %v469_v5 = vmul.f32 1.442695, %v428_v51 }
  0xb1   : > { %v2798_v55 = vpop.eup %2797  ;;  %2805 = vpow2.f32 %v473_v3  ;;  %v3692_v13 = vsel %vm6042_vm4, %v2796_v54, 0.0  ;;  %v3694_v7 = vpack.c.bf16 %v156_v27, %v155_v53  ;;  %v583_v30 = vadd.f32 %v3685_v58, %v3676_v4 }
  0xb2   : > { %v2800_v37 = vpop.eup %2799  ;;  %2807 = vpow2.f32 %v503_v6  ;;  %v3709_v49 = vsel %vm6043_vm5, %v2798_v55, 0.0  ;;  %vm6046_vm8 = vcmp.ne.f32.partialorder %v3437_v40, 0.0  ;;  %v6047_v6 = vld [vmem:[#allocation8_spill] sm:$0xff]  ;;  %v3776_v40 = vpack.c.bf16 %v152_v61, %v151_v12 }
  0xb3   : > { %v2802_v39 = vpop.eup %2801  ;;  %2809 = vpow2.f32 %v505_v9  ;;  %v553_v56 = vadd.f32 %v3709_v49, %v3692_v13  ;;  %v391_v43 = vpop.xlane.xlu2 %390  ;;  %v3720_v63 = vsel %vm6044_vm6, %v2800_v37, 0.0  ;;  %691 = vmatpush.bf16.msra.mxu0 %v3694_v7  ;;  %2694 = vmatpush.bf16.msra.mxu2 %v3694_v7  ;;  %vm6048_vm9 = vcmp.ne.f32.partialorder %v6047_v6, 0.0 }
  0xb4   : > { %v431_v21 = vsub.f32 %v3539_v16, %v391_v43  ;;  %v432_v18 = vsub.f32 %v3544_v29, %v391_v43  ;;  %v415_v8 = vpop.xlane.xlu0 %414  ;;  %2811 = vpow2.f32 %v467_v10  ;;  %v3730_v59 = vsel %vm6045_vm7, %v2802_v39, 0.0  ;;  %v170_v16 = vld [vmem:[%s5893_s1 + $0xe8] sm:$0xff]  ;;  %v6054_v43 = vld [vmem:[#allocation22_spill] sm:$0xff] }
  0xb5   : > { %578 = vadd.xlane.f32.xlu2 %v577_v57  ;;  %v447_v29 = vsub.f32 %v3549_v32, %v415_v8  ;;  %v448_v1 = vsub.f32 %v3554_v33, %v415_v8  ;;  %2813 = vpow2.f32 %v469_v5  ;;  %v418_v35 = vpop.xlane.xlu1 %417  ;;  %v556_v3 = vadd.f32 %v3730_v59, %v3720_v63  ;;  %v6049_v57 = vld [vmem:[#allocation9_spill] sm:$0xff]  ;;  %v6051_v5 = vld [vmem:[#allocation10_spill] sm:$0xff]  ;;  %v6055_v8 = vld [vmem:[#allocation11_spill] sm:$0xff] }
  0xb6   : > { %v2804_v41 = vpop.eup %2803  ;;  %v475_v24 = vmul.f32 1.442695, %v431_v21  ;;  %v477_v26 = vmul.f32 1.442695, %v432_v18  ;;  %v449_v62 = vsub.f32 %v3559_v44, %v418_v35  ;;  %v450_v20 = vsub.f32 %v3564_v47, %v418_v35  ;;  %584 = vadd.xlane.f32.xlu0 %v583_v30  ;;  %v167_v44 = vld [vmem:[%s5893_s1 + $0xd0] sm:$0xff]  ;;  %v168_v47 = vld [vmem:[%s5893_s1 + $0xd8] sm:$0xff] }
  0xb7   : > { %v2806_v32 = vpop.eup %2805  ;;  %554 = vadd.xlane.f32.xlu1 %v553_v56  ;;  %v507_v33 = vmul.f32 1.442695, %v447_v29  ;;  %v509_v22 = vmul.f32 1.442695, %v448_v1  ;;  %v3752_v60 = vpack.c.bf16 %v170_v16, %v169_v34  ;;  %v3762_v52 = vsel %vm6046_vm8, %v2804_v41, 0.0  ;;  %692 = vmatpush.bf16.msra.mxu0 %v3724_v31  ;;  %v6053_v39 = vld [vmem:[#allocation21_spill] sm:$0xff] }
  0xb8   : > { %v2808_v51 = vpop.eup %2807  ;;  %2815 = vpow2.f32 %v475_v24  ;;  %v3766_v9 = vsel %vm6048_vm9, %v2806_v32, 0.0  ;;  %v511_v53 = vmul.f32 1.442695, %v449_v62  ;;  %2695 = vmatpush.bf16.msra.mxu2 %v3724_v31  ;;  %vm6050_vm2 = vcmp.ne.f32.partialorder %v6049_v57, 0.0  ;;  %v6057_v16 = vld [vmem:[#allocation12_spill] sm:$0xff] }
  0xb9   : > { %v2810_v54 = vpop.eup %2809  ;;  %2817 = vpow2.f32 %v477_v26  ;;  %v3772_v10 = vsel %vm6050_vm2, %v2808_v51, 0.0  ;;  %v513_v27 = vmul.f32 1.442695, %v450_v20  ;;  %741 = vmatpush.bf16.msra.mxu1 %v3752_v60  ;;  %2703 = vmatpush.bf16.msra.mxu3 %v3752_v60  ;;  %vm6052_vm0 = vcmp.ne.f32.partialorder %v6051_v5, 0.0  ;;  %v163_v26 = vld [vmem:[%s5893_s1 + $0xb0] sm:$0xff] }
  0xba   : > { %v2812_v55 = vpop.eup %2811  ;;  %2819 = vpow2.f32 %v507_v33  ;;  %v3780_v28 = vsel %vm6052_vm0, %v2810_v54, 0.0  ;;  %v3782_v14 = vpack.c.bf16 %v168_v47, %v167_v44  ;;  %v562_v37 = vadd.f32 %v3766_v9, %v3762_v52  ;;  %v6064_v44 = vld [vmem:[#allocation16_spill] sm:$0xff]  ;;  %v6066_v54 = vld [vmem:[#allocation17_spill] sm:$0xff] }
  0xbb   : > { %v2814_v36 = vpop.eup %2813  ;;  %2821 = vpow2.f32 %v509_v22  ;;  %v586_v30 = vadd.f32 %v3780_v28, %v3772_v10  ;;  %693 = vmatpush.bf16.msra.mxu0 %v3776_v40  ;;  %vm6056_vm1 = vcmp.ne.f32.partialorder %v6055_v8, 0.0  ;;  %vm6058_vm3 = vcmp.ne.f32.partialorder %v6057_v16, 0.0  ;;  %v165_v8 = vld [vmem:[%s5893_s1 + $0xc0] sm:$0xff] }
  0xbc   : > { %v394_v48 = vpop.xlane.xlu0 %393  ;;  %2823 = vpow2.f32 %v511_v53  ;;  %2696 = vmatpush.bf16.msra.mxu2 %v3776_v40  ;;  %v3795_v34 = vsel %vm6056_vm1, %v2812_v55, 0.0  ;;  %v3799_v29 = vsel %vm6058_vm3, %v2814_v36, 0.0  ;;  %vm6065_vm4 = vcmp.ne.f32.partialorder %v6064_v44, 0.0  ;;  %v161_v44 = vld [vmem:[%s5893_s1 + $0xa0] sm:$0xff] }
  0xbd   : > { %557 = vadd.xlane.f32.xlu2 %v556_v3  ;;  %v433_v56 = vsub.f32 %v6053_v39, %v394_v48  ;;  %v434_v21 = vsub.f32 %v6054_v43, %v394_v48  ;;  %2825 = vpow2.f32 %v513_v27  ;;  %742 = vmatpush.bf16.msra.mxu1 %v3782_v14  ;;  %v559_v22 = vadd.f32 %v3799_v29, %v3795_v34  ;;  %v144_v27 = vld [vmem:[%s5893_s1 + $0x18] sm:$0xff] }
  0xbe   : > { %v2816_v18 = vpop.eup %2815  ;;  %2704 = vmatpush.bf16.msra.mxu3 %v3782_v14  ;;  %563 = vadd.xlane.f32.xlu0 %v562_v37  ;;  %v160_v37 = vld [vmem:[%s5893_s1 + $0x98] sm:$0xff] }
  0xbf   : > { %v2818_v1 = vpop.eup %2817  ;;  %587 = vadd.xlane.f32.xlu1 %v586_v30  ;;  %v479_v35 = vmul.f32 1.442695, %v433_v56  ;;  %v481_v41 = vmul.f32 1.442695, %v434_v21  ;;  %v3804_v62 = vsel %vm319_vm13, %v2816_v18, 0.0  ;;  %v149_v21 = vld [vmem:[%s5893_s1 + $0x40] sm:$0xff] }
  0xc0   : > { %v2820_v24 = vpop.eup %2819  ;;  %6060 = vst [vmem:[#allocation8_spill] sm:$0xff] %v3804_v62  ;;  %v3808_v12 = vsel %vm320_vm14, %v2818_v1, 0.0  ;;  %v150_v18 = vld [vmem:[%s5893_s1 + $0x48] sm:$0xff] }
  0xc1   : > { %6062 = vst [vmem:[#allocation9_spill] sm:$0xff] %v3808_v12  ;;  %v2822_v61 = vpop.eup %2821  ;;  %2827 = vpow2.f32 %v479_v35  ;;  %v3812_v33 = vsel %vm335_vm12, %v2820_v24, 0.0  ;;  %v565_v6 = vadd.f32 %v3808_v12, %v3804_v62  ;;  %vm6067_vm12 = vcmp.ne.f32.partialorder %v6066_v54, 0.0  ;;  %v166_v1 = vld [vmem:[%s5893_s1 + $0xc8] sm:$0xff]  ;;  %v148_v24 = vld [vmem:[%s5893_s1 + $0x38] sm:$0xff]  ;;  %v143_v54 = vld [vmem:[%s5893_s1 + $0x10] sm:$0xff] }
  0xc2   : > { %v2824_v3 = vpop.eup %2823  ;;  %2829 = vpow2.f32 %v481_v41  ;;  %v3818_v47 = vsel %vm6065_vm4, %v2822_v61, 0.0  ;;  %v3853_v16 = vpack.c.bf16 %v150_v18, %v149_v21  ;;  %v3858_v35 = vpack.c.bf16 %v166_v1, %v165_v8  ;;  %v147_v41 = vld [vmem:[%s5893_s1 + $0x30] sm:$0xff]  ;;  %v164_v61 = vld [vmem:[%s5893_s1 + $0xb8] sm:$0xff]  ;;  %v157_v21 = vld [vmem:[%s5893_s1 + $0x80] sm:$0xff] }
  0xc3   : > { %v2826_v51 = vpop.eup %2825  ;;  %v589_v53 = vadd.f32 %v3818_v47, %v3812_v33  ;;  %v3826_v57 = vsel %vm6067_vm12, %v2824_v3, 0.0  ;;  %v3873_v20 = vpack.c.bf16 %v148_v24, %v147_v41  ;;  %v3878_v32 = vpack.c.bf16 %v164_v61, %v163_v26  ;;  %v146_v3 = vld [vmem:[%s5893_s1 + $0x28] sm:$0xff]  ;;  %v3944_v41 = vld [vmem:[#allocation2 + $0xf0] sm:$0xff]  ;;  %v3950_v26 = vld [vmem:[#allocation2 + $0xe0] sm:$0xff] }
  0xc4   : > { %v3830_v55 = vsel %vm338_vm11, %v2826_v51, 0.0  ;;  %6073 = vst [vmem:[#allocation22_spill] sm:$0xff] %v3853_v16  ;;  %694 = vmatpush.bf16.msra.mxu0 %v3853_v16  ;;  %2697 = vmatpush.bf16.msra.mxu2 %v3853_v16  ;;  %v158_v8 = vld [vmem:[%s5893_s1 + $0x88] sm:$0xff]  ;;  %v3946_v24 = vld [vmem:[#allocation2 + $0x1f0] sm:$0xff]  ;;  %v3952_v61 = vld [vmem:[#allocation2 + $0x1e0] sm:$0xff] }
  0xc5   : > { %560 = vadd.xlane.f32.xlu2 %v559_v22  ;;  %v592_v56 = vadd.f32 %v3830_v55, %v3826_v57  ;;  %6074 = vst [vmem:[#allocation11_spill] sm:$0xff] %v3858_v35  ;;  %743 = vmatpush.bf16.msra.mxu1 %v3858_v35  ;;  %v145_v22 = vld [vmem:[%s5893_s1 + $0x20] sm:$0xff]  ;;  %v3938_v1 = vpack.c.bf16 %v158_v8, %v157_v21  ;;  %v3978_v8 = vld [vmem:[#allocation2 + $0xd8] sm:$0xff] }
  0xc6   : > { %566 = vadd.xlane.f32.xlu0 %v565_v6  ;;  %2705 = vmatpush.bf16.msra.mxu3 %v3858_v35  ;;  %6075 = vst [vmem:[#allocation12_spill] sm:$0xff] %v3873_v20  ;;  %v3893_v51 = vpack.c.bf16 %v146_v3, %v145_v22  ;;  %v162_v6 = vld [vmem:[%s5893_s1 + $0xa8] sm:$0xff]  ;;  %v3954_v22 = vld [vmem:[#allocation2 + $0xf8] sm:$0xff]  ;;  %v3976_v21 = vld [vmem:[#allocation2 + $0x1c0] sm:$0xff] }
  0xc7   : > { %v2828_v5 = vpop.eup %2827  ;;  %590 = vadd.xlane.f32.xlu1 %v589_v53  ;;  %6076 = vst [vmem:[#allocation13_spill] sm:$0xff] %v3878_v32  ;;  %v3898_v53 = vpack.c.bf16 %v162_v6, %v161_v44  ;;  %v3958_v3 = vld [vmem:[#allocation2 + $0x1f8] sm:$0xff]  ;;  %v3960_v44 = vld [vmem:[#allocation2 + $0xd0] sm:$0xff] }
  0xc8   : > { %v2830_v36 = vpop.eup %2829  ;;  %v3834_v30 = vsel %vm321_vm10, %v2828_v5, 0.0  ;;  %695 = vmatpush.bf16.msra.mxu0 %v3873_v20  ;;  %2698 = vmatpush.bf16.msra.mxu2 %v3873_v20  ;;  %6077 = vst [vmem:[#allocation14_spill] sm:$0xff] %v3893_v51  ;;  %v159_v5 = vld [vmem:[%s5893_s1 + $0x90] sm:$0xff]  ;;  %v4025_v62 = vld [vmem:[#allocation2 + $0x98] sm:$0xff] }
  0xc9   : > { %6070 = vst [vmem:[#allocation10_spill] sm:$0xff] %v3834_v30  ;;  %v3838_v39 = vsel %vm322_vm15, %v2830_v36, 0.0  ;;  %744 = vmatpush.bf16.msra.mxu1 %v3878_v32  ;;  %v3913_v36 = vpack.c.bf16 %v144_v27, %v143_v54  ;;  %v3918_v48 = vpack.c.bf16 %v160_v37, %v159_v5  ;;  %v3962_v6 = vld [vmem:[#allocation2 + $0x1d0] sm:$0xff]  ;;  %v3968_v37 = vld [vmem:[#allocation2 + $0xe8] sm:$0xff]  ;;  %v4027_v35 = vld [vmem:[#allocation2 + $0x198] sm:$0xff] }
  0xca   : > { %6072 = vst [vmem:[#allocation21_spill] sm:$0xff] %v3838_v39  ;;  %v568_v43 = vadd.f32 %v3838_v39, %v3834_v30  ;;  %2706 = vmatpush.bf16.msra.mxu3 %v3878_v32  ;;  %v4020_v32 = vld [vmem:[#allocation2 + $0x180] sm:$0xff] }
  0xcb   : > { %6078 = vst [vmem:[#allocation15_spill] sm:$0xff] %v3898_v53 }
  0xcc   : > { %696 = vmatpush.bf16.msra.mxu0 %v3893_v51  ;;  %2699 = vmatpush.bf16.msra.mxu2 %v3893_v51  ;;  %6079 = vst [vmem:[#allocation16_spill] sm:$0xff] %v3913_v36  ;;  %v4018_v51 = vld [vmem:[#allocation2 + $0x80] sm:$0xff] }
  0xcd   : > { %593 = vadd.xlane.f32.xlu2 %v592_v56  ;;  %745 = vmatpush.bf16.msra.mxu1 %v3898_v53  ;;  %6080 = vst [vmem:[#allocation17_spill] sm:$0xff] %v3918_v48  ;;  %v141_v56 = vld [vmem:[%s5893_s1] sm:$0xff] }
  0xce   : > { %2707 = vmatpush.bf16.msra.mxu3 %v3898_v53  ;;  %6082 = vst [vmem:[#allocation19_spill] sm:$0xff] %v3938_v1  ;;  %v4010_v53 = vld [vmem:[#allocation2 + $0x190] sm:$0xff] }
  0xcf   : > { %569 = vadd.xlane.f32.xlu1 %v568_v43  ;;  %v142_v43 = vld [vmem:[%s5893_s1 + $0x8] sm:$0xff]  ;;  %6083 = vst [vmem:[#allocation20_spill] sm:$0xff] %v3954_v22 }
  0xd0   : > { %697 = vmatpush.bf16.msra.mxu0 %v3913_v36  ;;  %2700 = vmatpush.bf16.msra.mxu2 %v3913_v36  ;;  %v3933_v18 = vpack.c.bf16 %v142_v43, %v141_v56  ;;  %6084 = vst [vmem:[#allocation23_spill] sm:$0xff] %v3958_v3  ;;  %v3970_v56 = vld [vmem:[#allocation2 + $0x1e8] sm:$0xff]  ;;  %v3972_v43 = vld [vmem:[#allocation2 + $0xc0] sm:$0xff]  ;;  %v4002_v36 = vld [vmem:[#allocation2 + $0xb8] sm:$0xff] }
  0xd1   : > { %746 = vmatpush.bf16.msra.mxu1 %v3918_v48  ;;  %6085 = vst [vmem:[#allocation24_spill] sm:$0xff] %v3968_v37 }
  0xd2   : > { %2708 = vmatpush.bf16.msra.mxu3 %v3918_v48  ;;  %6081 = vst [vmem:[#allocation18_spill] sm:$0xff] %v3933_v18  ;;  %v3994_v48 = vld [vmem:[#allocation2 + $0x1c8] sm:$0xff] }
  0xd3   : > { %6086 = vst [vmem:[#allocation25_spill] sm:$0xff] %v3970_v56 }
  0xd4   : > { %698 = vmatpush.bf16.msra.mxu0 %v3933_v18  ;;  %2701 = vmatpush.bf16.msra.mxu2 %v3933_v18  ;;  %6087 = vst [vmem:[#allocation26_spill] sm:$0xff] %v3978_v8 }
  0xd5   : > { %747 = vmatpush.bf16.msra.mxu1 %v3938_v1  ;;  %6090 = vst [vmem:[#allocation29_spill] sm:$0xff] %v3994_v48 }
  0xd6   : > { %2709 = vmatpush.bf16.msra.mxu3 %v3938_v1  ;;  %6092 = vst [vmem:[#allocation31_spill] sm:$0xff] %v4002_v36 }
  0xd7   : > { %6095 = vst [vmem:[#allocation34_spill] sm:$0xff] %v4010_v53 }
  0xd8   : > { %805 = vmatpush.msrb.mxu2 %v3944_v41  ;;  %935 = vmatpush.msrb.mxu0 %v3954_v22  ;;  %6098 = vst [vmem:[#allocation37_spill] sm:$0xff] %v4025_v62 }
  0xd9   : > { %1000 = vmatpush.msrb.mxu1 %v3958_v3  ;;  %v3980_v3 = vld [vmem:[#allocation2 + $0x1d8] sm:$0xff]  ;;  %6099 = vst [vmem:[#allocation38_spill] sm:$0xff] %v4027_v35 }
  0xda   : > { %870 = vmatpush.msrb.mxu3 %v3946_v24  ;;  %806 = vmatpush.msrb.mxu2 %v3950_v26  ;;  %6088 = vst [vmem:[#allocation27_spill] sm:$0xff] %v3980_v3 }
  0xdb   : > { %936 = vmatpush.msrb.mxu0 %v3968_v37  ;;  %1001 = vmatpush.msrb.mxu1 %v3970_v56  ;;  %v3986_v37 = vld [vmem:[#allocation2 + $0xb0] sm:$0xff] }
  0xdc   : > { %871 = vmatpush.msrb.mxu3 %v3952_v61  ;;  %807 = vmatpush.msrb.mxu2 %v3960_v44  ;;  %v3988_v56 = vld [vmem:[#allocation2 + $0x1b0] sm:$0xff] }
  0xdd   : > { %937 = vmatpush.msrb.mxu0 %v3978_v8  ;;  %1002 = vmatpush.msrb.mxu1 %v3980_v3  ;;  %v3996_v8 = vld [vmem:[#allocation2 + $0xa0] sm:$0xff] }
  0xde   : > { %872 = vmatpush.msrb.mxu3 %v3962_v6  ;;  %808 = vmatpush.msrb.mxu2 %v3972_v43 }
  0xdf   : > { %1003 = vmatpush.msrb.mxu1 %v3994_v48  ;;  %v4016_v48 = vld [vmem:[#allocation2 + $0x1a8] sm:$0xff] }
  0xe0   : > { %873 = vmatpush.msrb.mxu3 %v3976_v21  ;;  %809 = vmatpush.msrb.mxu2 %v3986_v37  ;;  %6097 = vst [vmem:[#allocation36_spill] sm:$0xff] %v4016_v48 }
  0xe2   : > { %874 = vmatpush.msrb.mxu3 %v3988_v56  ;;  %810 = vmatpush.msrb.mxu2 %v3996_v8 }
 0x117   : > { %v573_v54 = vpop.xlane.xlu1 %572 }
 0x118   : > { %vm603_vm10 = vcmp.gt.f32.partialorder %v573_v54, 0.0 }
 0x119   : > { %v549_v27 = vpop.xlane.xlu0 %548  ;;  %v619_v5 = vsel %vm603_vm10, %v573_v54, 1.0 }
 0x11a   : > { %vm595_vm11 = vcmp.gt.f32.partialorder %v549_v27, 0.0  ;;  %2831 = vrcp.f32 %v619_v5 }
 0x11b   : > { %v611_v54 = vsel %vm595_vm11, %v549_v27, 1.0  ;;  %v3992_v27 = vld [vmem:[#allocation2 + $0xc8] sm:$0xff] }
 0x11c   : > { %6089 = vst [vmem:[#allocation28_spill] sm:$0xff] %v3992_v27  ;;  %938 = vmatpush.msrb.mxu0 %v3992_v27 }
 0x11e   : > { %939 = vmatpush.msrb.mxu0 %v4002_v36 }
 0x120   : > { %v576_v22 = vpop.xlane.xlu2 %575  ;;  %v2832_v3 = vpop.eup %2831 }
 0x121   : > { %vm604_vm13 = vcmp.gt.f32.partialorder %v576_v22, 0.0  ;;  %v659_v12 = vmul.f32 %v2832_v3, %v3606_v23  ;;  %v660_v39 = vmul.f32 %v2832_v3, %v3610_v25 }
 0x122   : > { %v620_v1 = vsel %vm604_vm13, %v576_v22, 1.0  ;;  %v552_v18 = vpop.xlane.xlu1 %551  ;;  %v4000_v22 = vld [vmem:[#allocation2 + $0x1a0] sm:$0xff] }
 0x123   : > { %2833 = vrcp.f32 %v620_v1  ;;  %vm596_vm14 = vcmp.gt.f32.partialorder %v552_v18, 0.0  ;;  %6091 = vst [vmem:[#allocation30_spill] sm:$0xff] %v4000_v22  ;;  %v4004_v1 = vld [vmem:[#allocation2 + $0x1b8] sm:$0xff]  ;;  %875 = vmatpush.msrb.mxu3 %v4000_v22 }
 0x124   : > { %2835 = vrcp.f32 %v611_v54  ;;  %v612_v5 = vsel %vm596_vm14, %v552_v18, 1.0  ;;  %6093 = vst [vmem:[#allocation32_spill] sm:$0xff] %v4004_v1  ;;  %v582_v54 = vpop.xlane.xlu0 %581  ;;  %v4008_v18 = vld [vmem:[#allocation2 + $0x90] sm:$0xff]  ;;  %1004 = vmatpush.msrb.mxu1 %v4004_v1 }
 0x125   : > { %2837 = vrcp.f32 %v612_v5  ;;  %6094 = vst [vmem:[#allocation33_spill] sm:$0xff] %v4008_v18  ;;  %v4012_v5 = vld [vmem:[#allocation2 + $0xa8] sm:$0xff]  ;;  %811 = vmatpush.msrb.mxu2 %v4008_v18  ;;  %876 = vmatpush.msrb.mxu3 %v4010_v53  ;;  %vm606_vm5 = vcmp.gt.f32.partialorder %v582_v54, 0.0 }
 0x126   : > { %6096 = vst [vmem:[#allocation35_spill] sm:$0xff] %v4012_v5  ;;  %940 = vmatpush.msrb.mxu0 %v4012_v5  ;;  %1005 = vmatpush.msrb.mxu1 %v4016_v48  ;;  %v622_v3 = vsel %vm606_vm5, %v582_v54, 1.0  ;;  %v4067_v54 = vld [vmem:[#allocation2 + $0x150] sm:$0xff] }
 0x127   : > { %812 = vmatpush.msrb.mxu2 %v4018_v51  ;;  %877 = vmatpush.msrb.mxu3 %v4020_v32 }
 0x128   : > { %v579_v27 = vpop.xlane.xlu2 %578  ;;  %941 = vmatpush.msrb.mxu0 %v4025_v62  ;;  %1006 = vmatpush.msrb.mxu1 %v4027_v35 }
 0x129   : > { %v2834_v20 = vpop.eup %2833  ;;  %vm605_vm15 = vcmp.gt.f32.partialorder %v579_v27, 0.0 }
 0x12a   : > { %v2836_v36 = vpop.eup %2835  ;;  %v555_v1 = vpop.xlane.xlu1 %554  ;;  %v661_v16 = vmul.f32 %v2834_v20, %v3640_v42  ;;  %v662_v30 = vmul.f32 %v2834_v20, %v3644_v17  ;;  %v621_v53 = vsel %vm605_vm15, %v579_v27, 1.0 }
 0x12b   : > { %v2838_v23 = vpop.eup %2837  ;;  %vm597_vm6 = vcmp.gt.f32.partialorder %v555_v1, 0.0  ;;  %v643_v25 = vmul.f32 %v2836_v36, %v3616_v50  ;;  %v644_v17 = vmul.f32 %v2836_v36, %v3620_v2  ;;  %2839 = vrcp.f32 %v621_v53  ;;  %v4043_v50 = vld [vmem:[#allocation2 + $0x70] sm:$0xff]  ;;  %v4047_v2 = vld [vmem:[#allocation2 + $0x88] sm:$0xff]  ;;  %v4053_v53 = vld [vmem:[#allocation2 + $0x60] sm:$0xff] }
 0x12c   : > { %v683_v18 = vpack.c.bf16 %v661_v16, %v659_v12  ;;  %v684_v22 = vpack.c.bf16 %v662_v30, %v660_v39  ;;  %v645_v42 = vmul.f32 %v2838_v23, %v3660_v19  ;;  %v646_v20 = vmul.f32 %v2838_v23, %v3664_v0  ;;  %v585_v39 = vpop.xlane.xlu0 %584  ;;  %v4045_v19 = vld [vmem:[#allocation2 + $0x170] sm:$0xff]  ;;  %6100 = vst [vmem:[#allocation39_spill] sm:$0xff] %v4047_v2  ;;  %v4051_v16 = vld [vmem:[#allocation2 + $0x188] sm:$0xff]  ;;  %v4055_v36 = vld [vmem:[#allocation2 + $0x160] sm:$0xff] }
 0x12d   : > { %v613_v27 = vsel %vm597_vm6, %v555_v1, 1.0  ;;  %2841 = vrcp.f32 %v622_v3  ;;  %813 = vmatpush.msrb.mxu2 %v4043_v50  ;;  %878 = vmatpush.msrb.mxu3 %v4045_v19  ;;  %6101 = vst [vmem:[#allocation40_spill] sm:$0xff] %v4051_v16  ;;  %v4063_v1 = vld [vmem:[#allocation2 + $0x50] sm:$0xff]  ;;  %v4071_v23 = vld [vmem:[#allocation2 + $0x168] sm:$0xff]  ;;  %v4081_v3 = vld [vmem:[#allocation2 + $0x58] sm:$0xff]  ;;  %vm607_vm9 = vcmp.gt.f32.partialorder %v585_v39, 0.0 }
 0x12e   : > { %719 = vmatmul.bf16.vlgmr.msra.gmra.mxu2 %v683_v18  ;;  %768 = vmatmul.bf16.vlgmr.msra.gmra.mxu3 %v684_v22  ;;  %v675_v48 = vpack.c.bf16 %v645_v42, %v643_v25  ;;  %v676_v12 = vpack.c.bf16 %v646_v20, %v644_v17  ;;  %2843 = vrcp.f32 %v613_v27  ;;  %v4061_v22 = vld [vmem:[#allocation2 + $0x178] sm:$0xff]  ;;  %v4069_v18 = vld [vmem:[#allocation2 + $0x68] sm:$0xff]  ;;  %6105 = vst [vmem:[#allocation44_spill] sm:$0xff] %v4071_v23  ;;  %v4075_v17 = vld [vmem:[#allocation2 + $0x40] sm:$0xff] }
 0x12f   : > { %942 = vmatpush.msrb.mxu0 %v4047_v2  ;;  %1007 = vmatpush.msrb.mxu1 %v4051_v16  ;;  %6103 = vst [vmem:[#allocation42_spill] sm:$0xff] %v4061_v22  ;;  %v4077_v20 = vld [vmem:[#allocation2 + $0x140] sm:$0xff]  ;;  %v4083_v27 = vld [vmem:[#allocation2 + $0x158] sm:$0xff] }
 0x130   : > { %v558_v30 = vpop.xlane.xlu2 %557  ;;  %699 = vmatmul.bf16.vlgmr.msra.gmra.mxu0 %v675_v48  ;;  %748 = vmatmul.bf16.vlgmr.msra.gmra.mxu1 %v676_v12  ;;  %v4059_v48 = vld [vmem:[#allocation2 + $0x78] sm:$0xff]  ;;  %6104 = vst [vmem:[#allocation43_spill] sm:$0xff] %v4069_v18 }
 0x131   : > { %vm598_vm7 = vcmp.gt.f32.partialorder %v558_v30, 0.0  ;;  %6102 = vst [vmem:[#allocation41_spill] sm:$0xff] %v4059_v48  ;;  %814 = vmatpush.msrb.mxu2 %v4053_v53  ;;  %879 = vmatpush.msrb.mxu3 %v4055_v36  ;;  %v2840_v25 = vpop.eup %2839 }
 0x132   : > { %v614_v0 = vsel %vm598_vm7, %v558_v30, 1.0  ;;  %v588_v42 = vpop.xlane.xlu1 %587  ;;  %943 = vmatpush.msrb.mxu0 %v4059_v48  ;;  %1008 = vmatpush.msrb.mxu1 %v4061_v22  ;;  %6106 = vst [vmem:[#allocation45_spill] sm:$0xff] %v4075_v17  ;;  %v664_v22 = vmul.f32 %v2840_v25, %v3652_v15 }
 0x133   : > { %2845 = vrcp.f32 %v614_v0  ;;  %6107 = vst [vmem:[#allocation46_spill] sm:$0xff] %v4077_v20  ;;  %815 = vmatpush.msrb.mxu2 %v4063_v1  ;;  %880 = vmatpush.msrb.mxu3 %v4067_v54  ;;  %v2842_v12 = vpop.eup %2841  ;;  %v663_v0 = vmul.f32 %v2840_v25, %v3648_v11  ;;  %vm608_vm8 = vcmp.gt.f32.partialorder %v588_v42, 0.0 }
 0x134   : > { %6108 = vst [vmem:[#allocation47_spill] sm:$0xff] %v4081_v3  ;;  %944 = vmatpush.msrb.mxu0 %v4069_v18  ;;  %1009 = vmatpush.msrb.mxu1 %v4071_v23  ;;  %v2844_v30 = vpop.eup %2843  ;;  %v665_v23 = vmul.f32 %v2842_v12, %v3632_v45  ;;  %v666_v11 = vmul.f32 %v2842_v12, %v3636_v38  ;;  %v564_v15 = vpop.xlane.xlu0 %563  ;;  %v624_v62 = vsel %vm608_vm8, %v588_v42, 1.0  ;;  %v4133_v42 = vld [vmem:[#allocation2] sm:$0xff] }
 0x135   : > { %6109 = vst [vmem:[#allocation48_spill] sm:$0xff] %v4083_v27  ;;  %816 = vmatpush.msrb.mxu2 %v4075_v17  ;;  %881 = vmatpush.msrb.mxu3 %v4077_v20  ;;  %v647_v25 = vmul.f32 %v2844_v30, %v3692_v13  ;;  %v648_v35 = vmul.f32 %v2844_v30, %v3709_v49  ;;  %v623_v17 = vsel %vm607_vm9, %v585_v39, 1.0  ;;  %vm600_vm0 = vcmp.gt.f32.partialorder %v564_v15, 0.0  ;;  %v4101_v13 = vld [vmem:[#allocation2 + $0x30] sm:$0xff]  ;;  %v4117_v39 = vld [vmem:[#allocation2 + $0x38] sm:$0xff] }
 0x136   : > { %945 = vmatpush.msrb.mxu0 %v4081_v3  ;;  %1010 = vmatpush.msrb.mxu1 %v4083_v27  ;;  %v685_v5 = vpack.c.bf16 %v665_v23, %v663_v0  ;;  %v686_v3 = vpack.c.bf16 %v666_v11, %v664_v22  ;;  %2847 = vrcp.f32 %v624_v62  ;;  %v616_v38 = vsel %vm600_vm0, %v564_v15, 1.0  ;;  %v4103_v49 = vld [vmem:[#allocation2 + $0x130] sm:$0xff]  ;;  %v4111_v62 = vld [vmem:[#allocation2 + $0x20] sm:$0xff]  ;;  %v4127_v22 = vld [vmem:[#allocation2 + $0x28] sm:$0xff] }
 0x137   : > { %2849 = vrcp.f32 %v623_v17  ;;  %817 = vmatpush.msrb.mxu2 %v4101_v13  ;;  %882 = vmatpush.msrb.mxu3 %v4103_v49  ;;  %6111 = vst [vmem:[#allocation50_spill] sm:$0xff] %v4127_v22  ;;  %v4135_v17 = vld [vmem:[#allocation2 + $0x100] sm:$0xff] }
 0x138   : > { %v561_v16 = vpop.xlane.xlu2 %560 }
 0x139   : > { %v2846_v48 = vpop.eup %2845  ;;  %vm599_vm2 = vcmp.gt.f32.partialorder %v561_v16, 0.0  ;;  %818 = vmatpush.msrb.mxu2 %v4111_v62 }
 0x13a   : > { %v649_v18 = vmul.f32 %v2846_v48, %v3720_v63  ;;  %v650_v2 = vmul.f32 %v2846_v48, %v3730_v59  ;;  %v615_v45 = vsel %vm599_vm2, %v561_v16, 1.0  ;;  %v4099_v63 = vpop.xlane.xlu1 %590  ;;  %v4105_v59 = vld [vmem:[#allocation2 + $0x48] sm:$0xff]  ;;  %v4121_v16 = vld [vmem:[#allocation2 + $0x10] sm:$0xff] }
 0x13b   : > { %2851 = vrcp.f32 %v615_v45  ;;  %946 = vmatpush.msrb.mxu0 %v4105_v59  ;;  %v4125_v48 = vld [vmem:[#allocation2 + $0x110] sm:$0xff]  ;;  %819 = vmatpush.msrb.mxu2 %v4121_v16  ;;  %vm609_vm3 = vcmp.gt.f32.partialorder %v4099_v63, 0.0 }
 0x13c   : > { %v677_v20 = vpack.c.bf16 %v649_v18, %v647_v25  ;;  %v678_v27 = vpack.c.bf16 %v650_v2, %v648_v35  ;;  %v4109_v35 = vld [vmem:[#allocation2 + $0x148] sm:$0xff]  ;;  %v4119_v2 = vld [vmem:[#allocation2 + $0x138] sm:$0xff]  ;;  %2853 = vrcp.f32 %v616_v38  ;;  %v2848_v23 = vpop.eup %2847 }
 0x13d   : > { %1011 = vmatpush.msrb.mxu1 %v4109_v35  ;;  %6110 = vst [vmem:[#allocation49_spill] sm:$0xff] %v4119_v2  ;;  %v4129_v18 = vld [vmem:[#allocation2 + $0x128] sm:$0xff]  ;;  %947 = vmatpush.msrb.mxu0 %v4117_v39  ;;  %v2850_v12 = vpop.eup %2849  ;;  %v669_v0 = vmul.f32 %v2848_v23, %v3772_v10  ;;  %v670_v11 = vmul.f32 %v2848_v23, %v3780_v28  ;;  %v567_v10 = vpop.xlane.xlu0 %566 }
 0x13e   : > { %724 = vmatmul.bf16.gmra.mxu2 %v685_v5  ;;  %773 = vmatmul.bf16.gmra.mxu3 %v686_v3  ;;  %v4113_v5 = vld [vmem:[#allocation2 + $0x120] sm:$0xff]  ;;  %6112 = vst [vmem:[#allocation51_spill] sm:$0xff] %v4129_v18  ;;  %v4139_v3 = vld [vmem:[#allocation2 + $0x18] sm:$0xff]  ;;  %v667_v45 = vmul.f32 %v2850_v12, %v3676_v4  ;;  %v668_v38 = vmul.f32 %v2850_v12, %v3685_v58  ;;  %vm601_vm12 = vcmp.gt.f32.partialorder %v567_v10, 0.0  ;;  %v625_v58 = vsel %vm609_vm3, %v4099_v63, 1.0  ;;  %v4161_v12 = vld [vmem:[#allocation2 + $0x8] sm:$0xff] }
 0x13f   : > { %883 = vmatpush.msrb.mxu3 %v4113_v5  ;;  %1012 = vmatpush.msrb.mxu1 %v4119_v2  ;;  %6113 = vst [vmem:[#allocation52_spill] sm:$0xff] %v4139_v3  ;;  %v4163_v2 = vld [vmem:[#allocation2 + $0x108] sm:$0xff]  ;;  %v6116_v63 = vld [vmem:[#allocation10_spill] sm:$0xff] }
 0x140   : > { %704 = vmatmul.bf16.gmra.mxu0 %v677_v20  ;;  %753 = vmatmul.bf16.gmra.mxu1 %v678_v27  ;;  %v594_v20 = vpop.xlane.xlu2 %593  ;;  %v4141_v27 = vld [vmem:[#allocation2 + $0x118] sm:$0xff] }
 0x141   : > { %884 = vmatpush.msrb.mxu3 %v4125_v48  ;;  %6114 = vst [vmem:[#allocation53_spill] sm:$0xff] %v4141_v27  ;;  %948 = vmatpush.msrb.mxu0 %v4127_v22  ;;  %v2852_v30 = vpop.eup %2851  ;;  %vm610_vm1 = vcmp.gt.f32.partialorder %v594_v20, 0.0 }
 0x142   : > { %1013 = vmatpush.msrb.mxu1 %v4129_v18  ;;  %820 = vmatpush.msrb.mxu2 %v4133_v42  ;;  %v570_v15 = vpop.xlane.xlu1 %569  ;;  %v2854_v25 = vpop.eup %2853  ;;  %v651_v28 = vmul.f32 %v2852_v30, %v3795_v34  ;;  %v652_v23 = vmul.f32 %v2852_v30, %v3799_v29  ;;  %v626_v18 = vsel %vm610_vm1, %v594_v20, 1.0  ;;  %v6121_v30 = vld [vmem:[#allocation34_spill] sm:$0xff] }
 0x143   : > { %885 = vmatpush.msrb.mxu3 %v4135_v17  ;;  %949 = vmatpush.msrb.mxu0 %v4139_v3  ;;  %vm602_vm4 = vcmp.gt.f32.partialorder %v570_v15, 0.0  ;;  %v687_v3 = vpack.c.bf16 %v669_v0, %v667_v45  ;;  %v653_v22 = vmul.f32 %v2854_v25, %v3762_v52  ;;  %v654_v4 = vmul.f32 %v2854_v25, %v3766_v9  ;;  %v6123_v0 = vld [vmem:[#allocation9_spill] sm:$0xff]  ;;  %v6124_v25 = vld [vmem:[#allocation12_spill] sm:$0xff] }
 0x144   : > { %1014 = vmatpush.msrb.mxu1 %v4141_v27  ;;  %1449 = vmatpush.bf16.msra.mxu2 %v3694_v7  ;;  %v688_v27 = vpack.c.bf16 %v670_v11, %v668_v38  ;;  %2855 = vrcp.f32 %v626_v18  ;;  %v618_v34 = vsel %vm602_vm4, %v570_v15, 1.0  ;;  %v617_v52 = vsel %vm601_vm12, %v567_v10, 1.0  ;;  %v6117_v18 = vld [vmem:[#allocation21_spill] sm:$0xff]  ;;  %v6126_v38 = vld [vmem:[#allocation14_spill] sm:$0xff] }
 0x145   : > { %1498 = vmatpush.bf16.msra.mxu3 %v3711_v46  ;;  %v679_v29 = vpack.c.bf16 %v653_v22, %v651_v28  ;;  %v680_v20 = vpack.c.bf16 %v654_v4, %v652_v23  ;;  %950 = vmatpush.msrb.mxu0 %v4161_v12  ;;  %2857 = vrcp.f32 %v625_v58  ;;  %v6125_v45 = vld [vmem:[#allocation13_spill] sm:$0xff]  ;;  %v6129_v10 = vld [vmem:[#allocation46_spill] sm:$0xff]  ;;  %v3058_v23 = vld [vmem:[%s3270_s3 + $0x18] sm:$0xff] }
 0x146   : > { %1015 = vmatpush.msrb.mxu1 %v4163_v2  ;;  %2859 = vrcp.f32 %v618_v34  ;;  %v3057_v28 = vld [vmem:[%s3270_s3 + $0x10] sm:$0xff]  ;;  %v6144_v4 = vld [vmem:[#allocation35_spill] sm:$0xff]  ;;  %v6145_v58 = vld [vmem:[#allocation36_spill] sm:$0xff] }
 0x147   : > { %1563 = vmatpush.msra.mxu0 %v3944_v41  ;;  %2861 = vrcp.f32 %v617_v52  ;;  %v3059_v34 = vld [vmem:[%s3270_s3 + $0x20] sm:$0xff] }
 0x148   : > { %1628 = vmatpush.msra.mxu1 %v3946_v24  ;;  %1450 = vmatpush.bf16.msra.mxu2 %v3724_v31  ;;  %v6149_v52 = vld [vmem:[#allocation40_spill] sm:$0xff] }
 0x149   : > { %1564 = vmatpush.msra.mxu0 %v3950_v26  ;;  %1499 = vmatpush.bf16.msra.mxu3 %v3752_v60 }
 0x14a   : > { %1629 = vmatpush.msra.mxu1 %v3952_v61  ;;  %v2856_v9 = vpop.eup %2855 }
 0x14b   : > { %1565 = vmatpush.msra.mxu0 %v3960_v44  ;;  %v2858_v41 = vpop.eup %2857  ;;  %v673_v26 = vmul.f32 %v2856_v9, %v3826_v57  ;;  %v674_v61 = vmul.f32 %v2856_v9, %v3830_v55  ;;  %v6118_v57 = vld [vmem:[#allocation22_spill] sm:$0xff]  ;;  %v6119_v55 = vld [vmem:[#allocation11_spill] sm:$0xff] }
 0x14c   : > { %1630 = vmatpush.msra.mxu1 %v3962_v6  ;;  %1451 = vmatpush.bf16.msra.mxu2 %v3776_v40  ;;  %v2860_v24 = vpop.eup %2859  ;;  %v671_v6 = vmul.f32 %v2858_v41, %v3812_v33  ;;  %v6122_v33 = vld [vmem:[#allocation8_spill] sm:$0xff]  ;;  %v3061_v9 = vld [vmem:[%s3270_s3 + $0x30] sm:$0xff] }
 0x14d   : > { %1566 = vmatpush.msra.mxu0 %v3972_v43  ;;  %1500 = vmatpush.bf16.msra.mxu3 %v3782_v14  ;;  %v2862_v44 = vpop.eup %2861  ;;  %v672_v43 = vmul.f32 %v2858_v41, %v3818_v47  ;;  %v657_v22 = vmul.f32 %v2860_v24, %v6116_v63  ;;  %v3062_v41 = vld [vmem:[%s3270_s3 + $0x38] sm:$0xff]  ;;  %v6157_v63 = vld [vmem:[#allocation50_spill] sm:$0xff] }
 0x14e   : > { %729 = vmatmul.bf16.gmra.mxu2 %v687_v3  ;;  %778 = vmatmul.bf16.gmra.mxu3 %v688_v27  ;;  %v658_v3 = vmul.f32 %v2860_v24, %v6117_v18  ;;  %v655_v47 = vmul.f32 %v2862_v44, %v6122_v33  ;;  %v6152_v24 = vld [vmem:[#allocation43_spill] sm:$0xff]  ;;  %v3065_v18 = vld [vmem:[%s3270_s3 + $0x50] sm:$0xff] }
 0x14f   : > { %1631 = vmatpush.msra.mxu1 %v3976_v21  ;;  %1567 = vmatpush.msra.mxu0 %v3986_v37  ;;  %v6115_v21 = vld [vmem:[#allocation30_spill] sm:$0xff]  ;;  %v689_v37 = vpack.c.bf16 %v673_v26, %v671_v6  ;;  %v690_v27 = vpack.c.bf16 %v674_v61, %v672_v43  ;;  %v6153_v26 = vld [vmem:[#allocation44_spill] sm:$0xff]  ;;  %v6154_v61 = vld [vmem:[#allocation47_spill] sm:$0xff] }
 0x150   : > { %709 = vmatmul.bf16.gmra.mxu0 %v679_v29  ;;  %758 = vmatmul.bf16.gmra.mxu1 %v680_v20  ;;  %v681_v11 = vpack.c.bf16 %v657_v22, %v655_v47  ;;  %v6147_v29 = vld [vmem:[#allocation38_spill] sm:$0xff]  ;;  %v6148_v20 = vld [vmem:[#allocation39_spill] sm:$0xff]  ;;  %v3063_v6 = vld [vmem:[%s3270_s3 + $0x40] sm:$0xff] }
 0x151   : > { %1632 = vmatpush.msra.mxu1 %v3988_v56  ;;  %1568 = vmatpush.msra.mxu0 %v3996_v8  ;;  %v6120_v56 = vld [vmem:[#allocation33_spill] sm:$0xff]  ;;  %v656_v8 = vmul.f32 %v2862_v44, %v6123_v0  ;;  %v6155_v44 = vld [vmem:[#allocation48_spill] sm:$0xff] }
 0x152   : > { %1452 = vmatpush.bf16.msra.mxu2 %v6118_v57  ;;  %1501 = vmatpush.bf16.msra.mxu3 %v6119_v55  ;;  %v3064_v43 = vld [vmem:[%s3270_s3 + $0x48] sm:$0xff] }
 0x153   : > { %1633 = vmatpush.msra.mxu1 %v6115_v21  ;;  %1569 = vmatpush.msra.mxu0 %v6120_v56  ;;  %v682_v15 = vpack.c.bf16 %v658_v3, %v656_v8  ;;  %v6156_v21 = vld [vmem:[#allocation49_spill] sm:$0xff]  ;;  %v3067_v3 = vld [vmem:[%s3270_s3 + $0x60] sm:$0xff] }
 0x154   : > { %v6160_v22 = vld [vmem:[#allocation53_spill] sm:$0xff] }
 0x155   : > { %1634 = vmatpush.msra.mxu1 %v6121_v30  ;;  %1570 = vmatpush.msra.mxu0 %v4018_v51  ;;  %v6127_v51 = vld [vmem:[#allocation15_spill] sm:$0xff]  ;;  %v3072_v56 = vld [vmem:[%s3270_s3 + $0x88] sm:$0xff] }
 0x156   : > { %1453 = vmatpush.bf16.msra.mxu2 %v6124_v25  ;;  %1502 = vmatpush.bf16.msra.mxu3 %v6125_v45 }
 0x157   : > { %1635 = vmatpush.msra.mxu1 %v4020_v32  ;;  %1571 = vmatpush.msra.mxu0 %v4043_v50  ;;  %v6128_v32 = vld [vmem:[#allocation45_spill] sm:$0xff]  ;;  %v6130_v50 = vld [vmem:[#allocation16_spill] sm:$0xff] }
 0x159   : > { %1636 = vmatpush.msra.mxu1 %v4045_v19  ;;  %1572 = vmatpush.msra.mxu0 %v4053_v53  ;;  %v6131_v19 = vld [vmem:[#allocation17_spill] sm:$0xff]  ;;  %v6132_v53 = vld [vmem:[#allocation18_spill] sm:$0xff] }
 0x15a   : > { %1454 = vmatpush.bf16.msra.mxu2 %v6126_v38  ;;  %1503 = vmatpush.bf16.msra.mxu3 %v6127_v51 }
 0x15b   : > { %1637 = vmatpush.msra.mxu1 %v4055_v36  ;;  %1573 = vmatpush.msra.mxu0 %v4063_v1  ;;  %v6133_v36 = vld [vmem:[#allocation19_spill] sm:$0xff]  ;;  %v3055_v1 = vld [vmem:[%s3270_s3] sm:$0xff] }
 0x15d   : > { %1638 = vmatpush.msra.mxu1 %v4067_v54  ;;  %1574 = vmatpush.msra.mxu0 %v6128_v32  ;;  %v3056_v54 = vld [vmem:[%s3270_s3 + $0x8] sm:$0xff]  ;;  %v3075_v32 = vld [vmem:[%s3270_s3 + $0xa0] sm:$0xff] }
 0x15e   : > { %734 = vmatmul.bf16.gmra.mxu2 %v689_v37  ;;  %783 = vmatmul.bf16.gmra.mxu3 %v690_v27  ;;  %v3070_v37 = vld [vmem:[%s3270_s3 + $0x78] sm:$0xff]  ;;  %v3071_v27 = vld [vmem:[%s3270_s3 + $0x80] sm:$0xff] }
 0x15f   : > { %1639 = vmatpush.msra.mxu1 %v6129_v10  ;;  %1455 = vmatpush.bf16.msra.mxu2 %v6130_v50  ;;  %v3076_v10 = vld [vmem:[%s3270_s3 + $0xa8] sm:$0xff] }
 0x160   : > { %714 = vmatmul.bf16.gmra.mxu0 %v681_v11  ;;  %763 = vmatmul.bf16.gmra.mxu1 %v682_v15  ;;  %v3073_v11 = vld [vmem:[%s3270_s3 + $0x90] sm:$0xff]  ;;  %v3074_v15 = vld [vmem:[%s3270_s3 + $0x98] sm:$0xff] }
 0x161   : > { %1504 = vmatpush.bf16.msra.mxu3 %v6131_v19  ;;  %1575 = vmatpush.msra.mxu0 %v4101_v13  ;;  %v6134_v13 = vld [vmem:[#allocation20_spill] sm:$0xff] }
 0x162   : > { %1640 = vmatpush.msra.mxu1 %v4103_v49  ;;  %v6135_v49 = vld [vmem:[#allocation23_spill] sm:$0xff] }
 0x163   : > { %1576 = vmatpush.msra.mxu0 %v4111_v62  ;;  %1456 = vmatpush.bf16.msra.mxu2 %v6132_v53  ;;  %v6136_v62 = vld [vmem:[#allocation24_spill] sm:$0xff] }
 0x164   : > { %1641 = vmatpush.msra.mxu1 %v4113_v5  ;;  %v6137_v5 = vld [vmem:[#allocation25_spill] sm:$0xff] }
 0x165   : > { %1505 = vmatpush.bf16.msra.mxu3 %v6133_v36  ;;  %1577 = vmatpush.msra.mxu0 %v4121_v16  ;;  %v6138_v16 = vld [vmem:[#allocation26_spill] sm:$0xff] }
 0x166   : > { %1642 = vmatpush.msra.mxu1 %v4125_v48  ;;  %v6139_v48 = vld [vmem:[#allocation27_spill] sm:$0xff] }
 0x167   : > { %1578 = vmatpush.msra.mxu0 %v4133_v42  ;;  %v6140_v42 = vld [vmem:[#allocation28_spill] sm:$0xff] }
 0x168   : > { %1643 = vmatpush.msra.mxu1 %v4135_v17  ;;  %v6141_v17 = vld [vmem:[#allocation29_spill] sm:$0xff] }
 0x16e   : > { %821 = vmatmul.f32.vlgmr.msrb.gmra.mxu2 %v3055_v1  ;;  %886 = vmatmul.f32.vlgmr.msrb.gmra.mxu3 %v3056_v54 }
 0x16f   : > { %1693 = vmatpush.msrb.mxu2 %v6134_v13  ;;  %1758 = vmatpush.msrb.mxu3 %v6135_v49  ;;  %v3078_v13 = vld [vmem:[%s3270_s3 + $0xb8] sm:$0xff] }
 0x170   : > { %951 = vmatmul.f32.vlgmr.msrb.gmra.mxu0 %v3055_v1  ;;  %1016 = vmatmul.f32.vlgmr.msrb.gmra.mxu1 %v3056_v54  ;;  %v3077_v54 = vld [vmem:[%s3270_s3 + $0xb0] sm:$0xff] }
 0x171   : > { %1694 = vmatpush.msrb.mxu2 %v6136_v62  ;;  %1759 = vmatpush.msrb.mxu3 %v6137_v5 }
 0x172   : > { %2207 = vmatpush.bf16.msrb.mxu0 %v3694_v7  ;;  %2256 = vmatpush.bf16.msrb.mxu1 %v3711_v46  ;;  %v6142_v7 = vld [vmem:[#allocation31_spill] sm:$0xff]  ;;  %v6143_v46 = vld [vmem:[#allocation32_spill] sm:$0xff] }
 0x173   : > { %1695 = vmatpush.msrb.mxu2 %v6138_v16  ;;  %1760 = vmatpush.msrb.mxu3 %v6139_v48  ;;  %v3079_v48 = vld [vmem:[%s3270_s3 + $0xc0] sm:$0xff] }
 0x175   : > { %1696 = vmatpush.msrb.mxu2 %v6140_v42  ;;  %1761 = vmatpush.msrb.mxu3 %v6141_v17 }
 0x176   : > { %824 = vmatmul.f32.gmra.mxu2 %v3057_v28  ;;  %889 = vmatmul.f32.gmra.mxu3 %v3058_v23 }
 0x177   : > { %2208 = vmatpush.bf16.msrb.mxu0 %v3724_v31  ;;  %2257 = vmatpush.bf16.msrb.mxu1 %v3752_v60  ;;  %v3060_v31 = vld [vmem:[%s3270_s3 + $0x28] sm:$0xff] }
 0x178   : > { %954 = vmatmul.f32.gmra.mxu0 %v3057_v28  ;;  %1019 = vmatmul.f32.gmra.mxu1 %v3058_v23  ;;  %v6146_v60 = vld [vmem:[#allocation37_spill] sm:$0xff] }
 0x179   : > { %1697 = vmatpush.msrb.mxu2 %v6142_v7  ;;  %1762 = vmatpush.msrb.mxu3 %v6143_v46  ;;  %v3080_v28 = vld [vmem:[%s3270_s3 + $0xc8] sm:$0xff] }
 0x17b   : > { %1698 = vmatpush.msrb.mxu2 %v6144_v4  ;;  %1763 = vmatpush.msrb.mxu3 %v6145_v58  ;;  %v3081_v4 = vld [vmem:[%s3270_s3 + $0xd0] sm:$0xff]  ;;  %v3082_v58 = vld [vmem:[%s3270_s3 + $0xd8] sm:$0xff] }
 0x17c   : > { %2209 = vmatpush.bf16.msrb.mxu0 %v3776_v40  ;;  %2258 = vmatpush.bf16.msrb.mxu1 %v3782_v14  ;;  %v6150_v40 = vld [vmem:[#allocation41_spill] sm:$0xff]  ;;  %v6151_v14 = vld [vmem:[#allocation42_spill] sm:$0xff] }
 0x17d   : > { %1699 = vmatpush.msrb.mxu2 %v6146_v60  ;;  %1764 = vmatpush.msrb.mxu3 %v6147_v29 }
 0x17e   : > { %827 = vmatmul.f32.gmra.mxu2 %v3059_v34  ;;  %892 = vmatmul.f32.gmra.mxu3 %v3060_v31 }
 0x17f   : > { %1700 = vmatpush.msrb.mxu2 %v6148_v20  ;;  %1765 = vmatpush.msrb.mxu3 %v6149_v52  ;;  %v3083_v20 = vld [vmem:[%s3270_s3 + $0xe0] sm:$0xff]  ;;  %v3084_v52 = vld [vmem:[%s3270_s3 + $0xe8] sm:$0xff] }
 0x180   : > { %957 = vmatmul.f32.gmra.mxu0 %v3059_v34  ;;  %1022 = vmatmul.f32.gmra.mxu1 %v3060_v31 }
 0x181   : > { %2210 = vmatpush.bf16.msrb.mxu0 %v6118_v57  ;;  %2259 = vmatpush.bf16.msrb.mxu1 %v6119_v55  ;;  %v3068_v57 = vld [vmem:[%s3270_s3 + $0x68] sm:$0xff]  ;;  %v3069_v55 = vld [vmem:[%s3270_s3 + $0x70] sm:$0xff] }
 0x182   : > { %1701 = vmatpush.msrb.mxu2 %v6150_v40  ;;  %1766 = vmatpush.msrb.mxu3 %v6151_v14 }
 0x184   : > { %1702 = vmatpush.msrb.mxu2 %v6152_v24  ;;  %1767 = vmatpush.msrb.mxu3 %v6153_v26  ;;  %v3085_v26 = vld [vmem:[%s3270_s3 + $0xf0] sm:$0xff] }
 0x185   : > { %2211 = vmatpush.bf16.msrb.mxu0 %v6124_v25  ;;  %2260 = vmatpush.bf16.msrb.mxu1 %v6125_v45 }
 0x186   : > { %830 = vmatmul.f32.gmra.mxu2 %v3061_v9  ;;  %895 = vmatmul.f32.gmra.mxu3 %v3062_v41 }
 0x187   : > { %1703 = vmatpush.msrb.mxu2 %v6154_v61  ;;  %1768 = vmatpush.msrb.mxu3 %v6155_v44  ;;  %v3086_v61 = vld [vmem:[%s3270_s3 + $0xf8] sm:$0xff] }
 0x188   : > { %960 = vmatmul.f32.gmra.mxu0 %v3061_v9  ;;  %1025 = vmatmul.f32.gmra.mxu1 %v3062_v41 }
 0x189   : > { %1704 = vmatpush.msrb.mxu2 %v4105_v59  ;;  %1769 = vmatpush.msrb.mxu3 %v4109_v35  ;;  %v6158_v59 = vld [vmem:[#allocation51_spill] sm:$0xff]  ;;  %v6159_v35 = vld [vmem:[#allocation52_spill] sm:$0xff] }
 0x18a   : > { %2212 = vmatpush.bf16.msrb.mxu0 %v6126_v38  ;;  %2261 = vmatpush.bf16.msrb.mxu1 %v6127_v51 }
 0x18b   : > { %1705 = vmatpush.msrb.mxu2 %v4117_v39  ;;  %1770 = vmatpush.msrb.mxu3 %v6156_v21  ;;  %v3066_v39 = vld [vmem:[%s3270_s3 + $0x58] sm:$0xff]  ;;  %s3188_s3 = smov 32  }
 0x18d   : > { %1706 = vmatpush.msrb.mxu2 %v6157_v63  ;;  %1771 = vmatpush.msrb.mxu3 %v6158_v59 }
 0x18e   : > { %833 = vmatmul.f32.gmra.mxu2 %v3063_v6  ;;  %898 = vmatmul.f32.gmra.mxu3 %v3064_v43 }
 0x18f   : > { %2213 = vmatpush.bf16.msrb.mxu0 %v6130_v50  ;;  %2262 = vmatpush.bf16.msrb.mxu1 %v6131_v19 }
 0x190   : > { %963 = vmatmul.f32.gmra.mxu0 %v3063_v6  ;;  %1028 = vmatmul.f32.gmra.mxu1 %v3064_v43 }
 0x191   : > { %1707 = vmatpush.msrb.mxu2 %v6159_v35  ;;  %1772 = vmatpush.msrb.mxu3 %v6160_v22 }
 0x193   : > { %1708 = vmatpush.msrb.mxu2 %v4161_v12  ;;  %1773 = vmatpush.msrb.mxu3 %v4163_v2 }
 0x194   : > { %2214 = vmatpush.bf16.msrb.mxu0 %v6132_v53  ;;  %2263 = vmatpush.bf16.msrb.mxu1 %v6133_v36 }
 0x196   : > { %836 = vmatmul.f32.gmra.mxu2 %v3065_v18  ;;  %901 = vmatmul.f32.gmra.mxu3 %v3066_v39 }
 0x198   : > { %966 = vmatmul.f32.gmra.mxu0 %v3065_v18  ;;  %1031 = vmatmul.f32.gmra.mxu1 %v3066_v39 }
 0x19e   : > { %839 = vmatmul.f32.gmra.mxu2 %v3067_v3  ;;  %904 = vmatmul.f32.gmra.mxu3 %v3068_v57 }
 0x1a0   : > { %969 = vmatmul.f32.gmra.mxu0 %v3067_v3  ;;  %1034 = vmatmul.f32.gmra.mxu1 %v3068_v57 }
 0x1a6   : > { %842 = vmatmul.f32.gmra.mxu2 %v3069_v55  ;;  %907 = vmatmul.f32.gmra.mxu3 %v3070_v37 }
 0x1a8   : > { %972 = vmatmul.f32.gmra.mxu0 %v3069_v55  ;;  %1037 = vmatmul.f32.gmra.mxu1 %v3070_v37 }
 0x1ad   : > { %v4285_v2 = vpop.f32.mrf.mxu0  ;;  %v4287_v12 = vpop.f32.mrf.mxu1 }
 0x1ae   : > { %6161 = vst [vmem:[#allocation30_spill] sm:$0xff] %v4285_v2  ;;  %845 = vmatmul.f32.gmra.mxu2 %v3071_v27  ;;  %910 = vmatmul.f32.gmra.mxu3 %v3072_v56 }
 0x1af   : > { %6162 = vst [vmem:[#allocation10_spill] sm:$0xff] %v4287_v12 }
 0x1b0   : > { %975 = vmatmul.f32.gmra.mxu0 %v3071_v27  ;;  %1040 = vmatmul.f32.gmra.mxu1 %v3072_v56 }
 0x1b1   : > { %v720_v30 = vpop.f32.mrf.mxu2  ;;  %v769_v33 = vpop.f32.mrf.mxu3 }
 0x1b2   : > { %v4291_v47 = vadd.f32 %v769_v33, %v720_v30 }
 0x1b4   : > { %6163 = vst [vmem:[#allocation21_spill] sm:$0xff] %v4291_v47 }
 0x1b5   : > { %v4293_v0 = vpop.f32.mrf.mxu0  ;;  %v4295_v8 = vpop.f32.mrf.mxu1 }
 0x1b6   : > { %6164 = vst [vmem:[#allocation22_spill] sm:$0xff] %v4293_v0  ;;  %848 = vmatmul.f32.gmra.mxu2 %v3073_v11  ;;  %913 = vmatmul.f32.gmra.mxu3 %v3074_v15 }
 0x1b7   : > { %6165 = vst [vmem:[#allocation11_spill] sm:$0xff] %v4295_v8 }
 0x1b8   : > { %978 = vmatmul.f32.gmra.mxu0 %v3073_v11  ;;  %1043 = vmatmul.f32.gmra.mxu1 %v3074_v15 }
 0x1b9   : > { %v4299_v25 = vpop.f32.mrf.mxu2  ;;  %v4301_v45 = vpop.f32.mrf.mxu3 }
 0x1ba   : > { %6166 = vst [vmem:[#allocation33_spill] sm:$0xff] %v4299_v25 }
 0x1bb   : > { %6167 = vst [vmem:[#allocation34_spill] sm:$0xff] %v4301_v45 }
 0x1bd   : > { %v4303_v38 = vpop.f32.mrf.mxu0  ;;  %v4305_v51 = vpop.f32.mrf.mxu1 }
 0x1be   : > { %6168 = vst [vmem:[#allocation8_spill] sm:$0xff] %v4303_v38  ;;  %851 = vmatmul.f32.gmra.mxu2 %v3075_v32  ;;  %916 = vmatmul.f32.gmra.mxu3 %v3076_v10 }
 0x1bf   : > { %6169 = vst [vmem:[#allocation9_spill] sm:$0xff] %v4305_v51 }
 0x1c0   : > { %981 = vmatmul.f32.gmra.mxu0 %v3075_v32  ;;  %1046 = vmatmul.f32.gmra.mxu1 %v3076_v10 }
 0x1c1   : > { %v725_v50 = vpop.f32.mrf.mxu2  ;;  %v774_v19 = vpop.f32.mrf.mxu3 }
 0x1c2   : > { %v4309_v53 = vadd.f32 %v774_v19, %v725_v50 }
 0x1c4   : > { %6170 = vst [vmem:[#allocation12_spill] sm:$0xff] %v4309_v53 }
 0x1c5   : > { %v4311_v36 = vpop.f32.mrf.mxu0  ;;  %v4313_v1 = vpop.f32.mrf.mxu1 }
 0x1c6   : > { %6171 = vst [vmem:[#allocation13_spill] sm:$0xff] %v4311_v36  ;;  %854 = vmatmul.f32.gmra.mxu2 %v3077_v54  ;;  %919 = vmatmul.f32.gmra.mxu3 %v3078_v13 }
 0x1c7   : > { %6172 = vst [vmem:[#allocation14_spill] sm:$0xff] %v4313_v1 }
 0x1c8   : > { %984 = vmatmul.f32.gmra.mxu0 %v3077_v54  ;;  %1049 = vmatmul.f32.gmra.mxu1 %v3078_v13 }
 0x1c9   : > { %v4317_v49 = vpop.f32.mrf.mxu2  ;;  %v4319_v62 = vpop.f32.mrf.mxu3 }
 0x1ca   : > { %6173 = vst [vmem:[#allocation15_spill] sm:$0xff] %v4317_v49 }
 0x1cb   : > { %6174 = vst [vmem:[#allocation45_spill] sm:$0xff] %v4319_v62 }
 0x1cd   : > { %v4321_v5 = vpop.f32.mrf.mxu0  ;;  %v4323_v16 = vpop.f32.mrf.mxu1 }
 0x1ce   : > { %6175 = vst [vmem:[#allocation46_spill] sm:$0xff] %v4321_v5  ;;  %857 = vmatmul.f32.gmra.mxu2 %v3079_v48  ;;  %922 = vmatmul.f32.gmra.mxu3 %v3080_v28 }
 0x1cf   : > { %6176 = vst [vmem:[#allocation16_spill] sm:$0xff] %v4323_v16 }
 0x1d0   : > { %987 = vmatmul.f32.gmra.mxu0 %v3079_v48  ;;  %1052 = vmatmul.f32.gmra.mxu1 %v3080_v28 }
 0x1d1   : > { %v730_v23 = vpop.f32.mrf.mxu2  ;;  %v779_v42 = vpop.f32.mrf.mxu3 }
 0x1d2   : > { %v4327_v17 = vadd.f32 %v779_v42, %v730_v23 }
 0x1d4   : > { %6177 = vst [vmem:[#allocation17_spill] sm:$0xff] %v4327_v17 }
 0x1d5   : > { %v4329_v7 = vpop.f32.mrf.mxu0  ;;  %v4331_v46 = vpop.f32.mrf.mxu1 }
 0x1d6   : > { %6178 = vst [vmem:[#allocation18_spill] sm:$0xff] %v4329_v7  ;;  %860 = vmatmul.f32.gmra.mxu2 %v3081_v4  ;;  %925 = vmatmul.f32.gmra.mxu3 %v3082_v58 }
 0x1d7   : > { %6179 = vst [vmem:[#allocation19_spill] sm:$0xff] %v4331_v46 }
 0x1d8   : > { %990 = vmatmul.f32.gmra.mxu0 %v3081_v4  ;;  %1055 = vmatmul.f32.gmra.mxu1 %v3082_v58 }
 0x1d9   : > { %v4335_v34 = vpop.f32.mrf.mxu2  ;;  %v4337_v31 = vpop.f32.mrf.mxu3 }
 0x1da   : > { %6180 = vst [vmem:[#allocation20_spill] sm:$0xff] %v4335_v34 }
 0x1db   : > { %6181 = vst [vmem:[#allocation23_spill] sm:$0xff] %v4337_v31 }
 0x1dd   : > { %v4339_v60 = vpop.f32.mrf.mxu0  ;;  %v4341_v29 = vpop.f32.mrf.mxu1 }
 0x1de   : > { %6182 = vst [vmem:[#allocation24_spill] sm:$0xff] %v4339_v60  ;;  %863 = vmatmul.f32.gmra.mxu2 %v3083_v20  ;;  %928 = vmatmul.f32.gmra.mxu3 %v3084_v52 }
 0x1df   : > { %6183 = vst [vmem:[#allocation25_spill] sm:$0xff] %v4341_v29 }
 0x1e0   : > { %993 = vmatmul.f32.gmra.mxu0 %v3083_v20  ;;  %1058 = vmatmul.f32.gmra.mxu1 %v3084_v52 }
 0x1e1   : > { %v735_v40 = vpop.f32.mrf.mxu2  ;;  %v784_v14 = vpop.f32.mrf.mxu3 }
 0x1e2   : > { %v4345_v9 = vadd.f32 %v784_v14, %v735_v40 }
 0x1e4   : > { %6184 = vst [vmem:[#allocation26_spill] sm:$0xff] %v4345_v9 }
 0x1e5   : > { %v4347_v41 = vpop.f32.mrf.mxu0  ;;  %v4349_v24 = vpop.f32.mrf.mxu1 }
 0x1e6   : > { %6185 = vst [vmem:[#allocation27_spill] sm:$0xff] %v4347_v41  ;;  %866 = vmatmul.f32.gmra.mxu2 %v3085_v26  ;;  %931 = vmatmul.f32.gmra.mxu3 %v3086_v61 }
 0x1e7   : > { %6186 = vst [vmem:[#allocation28_spill] sm:$0xff] %v4349_v24 }
 0x1e8   : > { %996 = vmatmul.f32.gmra.mxu0 %v3085_v26  ;;  %1061 = vmatmul.f32.gmra.mxu1 %v3086_v61 }
 0x1e9   : > { %v4353_v44 = vpop.f32.mrf.mxu2  ;;  %v4355_v6 = vpop.f32.mrf.mxu3 }
 0x1ea   : > { %6187 = vst [vmem:[#allocation29_spill] sm:$0xff] %v4353_v44 }
 0x1eb   : > { %6188 = vst [vmem:[#allocation31_spill] sm:$0xff] %v4355_v6 }
 0x1ed   : > { %v952_v43 = vpop.f32.mrf.mxu0  ;;  %v1017_v21 = vpop.f32.mrf.mxu1 }
 0x1ee   : > { %v4357_v63 = vadd.f32 %v1017_v21, %v952_v43 }
 0x1f0   : > { %1644 = vmatmul.f32.vlgmr.msra.gmra.mxu1 %v4357_v63  ;;  %vm1066_vm10 = vcmp.ne.f32.partialorder %v4357_v63, 0.0 }
 0x1f1   : > { %v822_v59 = vpop.f32.mrf.mxu2  ;;  %v887_v35 = vpop.f32.mrf.mxu3  ;;  %v4366_v18 = vsel %vm1066_vm10, %v4357_v63, -1e+30 }
 0x1f2   : > { %v4361_v22 = vadd.f32 %v887_v35, %v822_v59 }
 0x1f4   : > { %1579 = vmatmul.f32.vlgmr.msra.gmra.mxu0 %v4361_v22  ;;  %vm1065_vm11 = vcmp.ne.f32.partialorder %v4361_v22, 0.0 }
 0x1f5   : > { %v4373_v39 = vsel %vm1065_vm11, %v4361_v22, -1e+30  ;;  %v1020_v3 = vpop.f32.mrf.mxu1  ;;  %v955_v55 = vpop.f32.mrf.mxu0 }
 0x1f6   : > { %v1129_v57 = vmax.f32 %v4373_v39, %v4366_v18  ;;  %v4377_v37 = vadd.f32 %v1020_v3, %v955_v55 }
 0x1f8   : > { %1130 = vmax.xlane.f32.xlu2 %v1129_v57  ;;  %1647 = vmatmul.f32.gmra.mxu1 %v4377_v37  ;;  %vm1068_vm13 = vcmp.ne.f32.partialorder %v4377_v37, 0.0 }
 0x1f9   : > { %v825_v27 = vpop.f32.mrf.mxu2  ;;  %v890_v56 = vpop.f32.mrf.mxu3  ;;  %v4386_v33 = vsel %vm1068_vm13, %v4377_v37, -1e+30 }
 0x1fa   : > { %v4381_v30 = vadd.f32 %v890_v56, %v825_v27 }
 0x1fc   : > { %1582 = vmatmul.f32.gmra.mxu0 %v4381_v30  ;;  %vm1067_vm14 = vcmp.ne.f32.partialorder %v4381_v30, 0.0 }
 0x1fd   : > { %v4393_v11 = vsel %vm1067_vm14, %v4381_v30, -1e+30  ;;  %v1023_v15 = vpop.f32.mrf.mxu1  ;;  %v958_v10 = vpop.f32.mrf.mxu0 }
 0x1fe   : > { %v1132_v32 = vmax.f32 %v4393_v11, %v4386_v33  ;;  %v4397_v50 = vadd.f32 %v1023_v15, %v958_v10 }
 0x200   : > { %6189 = vst [vmem:[#allocation32_spill] sm:$0xff] %v4397_v50  ;;  %1133 = vmax.xlane.f32.xlu0 %v1132_v32  ;;  %1650 = vmatmul.f32.gmra.mxu1 %v4397_v50  ;;  %vm1070_vm15 = vcmp.ne.f32.partialorder %v4397_v50, 0.0 }
 0x201   : > { %v828_v19 = vpop.f32.mrf.mxu2  ;;  %v893_v54 = vpop.f32.mrf.mxu3  ;;  %v4406_v48 = vsel %vm1070_vm15, %v4397_v50, -1e+30 }
 0x202   : > { %v4401_v13 = vadd.f32 %v893_v54, %v828_v19 }
 0x204   : > { %6190 = vst [vmem:[#allocation35_spill] sm:$0xff] %v4401_v13  ;;  %1585 = vmatmul.f32.gmra.mxu0 %v4401_v13  ;;  %vm1069_vm5 = vcmp.ne.f32.partialorder %v4401_v13, 0.0 }
 0x205   : > { %v4413_v28 = vsel %vm1069_vm5, %v4401_v13, -1e+30  ;;  %v1026_v23 = vpop.f32.mrf.mxu1  ;;  %v961_v4 = vpop.f32.mrf.mxu0 }
 0x206   : > { %v1135_v42 = vmax.f32 %v4413_v28, %v4406_v48  ;;  %v4417_v58 = vadd.f32 %v1026_v23, %v961_v4 }
 0x208   : > { %6191 = vst [vmem:[#allocation36_spill] sm:$0xff] %v4417_v58  ;;  %1136 = vmax.xlane.f32.xlu1 %v1135_v42  ;;  %1653 = vmatmul.f32.gmra.mxu1 %v4417_v58  ;;  %vm1072_vm6 = vcmp.ne.f32.partialorder %v4417_v58, 0.0 }
 0x209   : > { %v831_v20 = vpop.f32.mrf.mxu2  ;;  %v896_v52 = vpop.f32.mrf.mxu3  ;;  %v4426_v14 = vsel %vm1072_vm6, %v4417_v58, -1e+30 }
 0x20a   : > { %v4421_v40 = vadd.f32 %v896_v52, %v831_v20 }
 0x20c   : > { %6192 = vst [vmem:[#allocation37_spill] sm:$0xff] %v4421_v40  ;;  %1588 = vmatmul.f32.gmra.mxu0 %v4421_v40  ;;  %vm1071_vm7 = vcmp.ne.f32.partialorder %v4421_v40, 0.0 }
 0x20d   : > { %v4433_v26 = vsel %vm1071_vm7, %v4421_v40, -1e+30  ;;  %v1029_v61 = vpop.f32.mrf.mxu1  ;;  %v964_v21 = vpop.f32.mrf.mxu0 }
 0x20e   : > { %v1138_v43 = vmax.f32 %v4433_v26, %v4426_v14  ;;  %v4437_v59 = vadd.f32 %v1029_v61, %v964_v21 }
 0x210   : > { %6193 = vst [vmem:[#allocation38_spill] sm:$0xff] %v4437_v59  ;;  %1139 = vmax.xlane.f32.xlu2 %v1138_v43  ;;  %1656 = vmatmul.f32.gmra.mxu1 %v4437_v59  ;;  %vm1074_vm8 = vcmp.ne.f32.partialorder %v4437_v59, 0.0 }
 0x211   : > { %v834_v35 = vpop.f32.mrf.mxu2  ;;  %v899_v3 = vpop.f32.mrf.mxu3  ;;  %v4446_v55 = vsel %vm1074_vm8, %v4437_v59, -1e+30 }
 0x212   : > { %v4441_v57 = vadd.f32 %v899_v3, %v834_v35 }
 0x214   : > { %6194 = vst [vmem:[#allocation39_spill] sm:$0xff] %v4441_v57  ;;  %1591 = vmatmul.f32.gmra.mxu0 %v4441_v57  ;;  %vm1073_vm9 = vcmp.ne.f32.partialorder %v4441_v57, 0.0 }
 0x215   : > { %v4453_v27 = vsel %vm1073_vm9, %v4441_v57, -1e+30  ;;  %v1032_v56 = vpop.f32.mrf.mxu1  ;;  %v967_v32 = vpop.f32.mrf.mxu0 }
 0x216   : > { %v1141_v15 = vmax.f32 %v4453_v27, %v4446_v55  ;;  %v4457_v10 = vadd.f32 %v1032_v56, %v967_v32 }
 0x218   : > { %6195 = vst [vmem:[#allocation40_spill] sm:$0xff] %v4457_v10  ;;  %1142 = vmax.xlane.f32.xlu0 %v1141_v15  ;;  %1659 = vmatmul.f32.gmra.mxu1 %v4457_v10  ;;  %vm1076_vm2 = vcmp.ne.f32.partialorder %v4457_v10, 0.0 }
 0x219   : > { %v837_v19 = vpop.f32.mrf.mxu2  ;;  %v902_v54 = vpop.f32.mrf.mxu3  ;;  %v4466_v42 = vsel %vm1076_vm2, %v4457_v10, -1e+30 }
 0x21a   : > { %v4461_v23 = vadd.f32 %v902_v54, %v837_v19 }
 0x21c   : > { %6196 = vst [vmem:[#allocation41_spill] sm:$0xff] %v4461_v23  ;;  %1594 = vmatmul.f32.gmra.mxu0 %v4461_v23  ;;  %vm1075_vm0 = vcmp.ne.f32.partialorder %v4461_v23, 0.0 }
 0x21d   : > { %v4473_v4 = vsel %vm1075_vm0, %v4461_v23, -1e+30  ;;  %v1035_v20 = vpop.f32.mrf.mxu1  ;;  %v970_v61 = vpop.f32.mrf.mxu0 }
 0x21e   : > { %v1144_v52 = vmax.f32 %v4473_v4, %v4466_v42  ;;  %v4477_v43 = vadd.f32 %v1035_v20, %v970_v61 }
 0x220   : > { %6197 = vst [vmem:[#allocation42_spill] sm:$0xff] %v4477_v43  ;;  %1145 = vmax.xlane.f32.xlu1 %v1144_v52  ;;  %1662 = vmatmul.f32.gmra.mxu1 %v4477_v43  ;;  %vm1078_vm1 = vcmp.ne.f32.partialorder %v4477_v43, 0.0 }
 0x221   : > { %v840_v21 = vpop.f32.mrf.mxu2  ;;  %v905_v35 = vpop.f32.mrf.mxu3  ;;  %v4486_v56 = vsel %vm1078_vm1, %v4477_v43, -1e+30 }
 0x222   : > { %v4481_v3 = vadd.f32 %v905_v35, %v840_v21 }
 0x224   : > { %6198 = vst [vmem:[#allocation43_spill] sm:$0xff] %v4481_v3  ;;  %1597 = vmatmul.f32.gmra.mxu0 %v4481_v3  ;;  %vm1077_vm3 = vcmp.ne.f32.partialorder %v4481_v3, 0.0 }
 0x225   : > { %v4493_v15 = vsel %vm1077_vm3, %v4481_v3, -1e+30  ;;  %v973_v19 = vpop.f32.mrf.mxu0  ;;  %v1038_v54 = vpop.f32.mrf.mxu1 }
 0x226   : > { %v1147_v32 = vmax.f32 %v4493_v15, %v4486_v56  ;;  %v4497_v20 = vadd.f32 %v1038_v54, %v973_v19 }
 0x228   : > { %6199 = vst [vmem:[#allocation44_spill] sm:$0xff] %v4497_v20  ;;  %1148 = vmax.xlane.f32.xlu2 %v1147_v32  ;;  %vm5982_vm4 = vcmp.ne.f32.partialorder %v4497_v20, 0.0  ;;  %1665 = vmatmul.f32.gmra.mxu1 %v4497_v20 }
 0x229   : > { %v843_v52 = vpop.f32.mrf.mxu2  ;;  %v908_v61 = vpop.f32.mrf.mxu3  ;;  %v4506_v35 = vsel %vm5982_vm4, %v4497_v20, -1e+30 }
 0x22a   : > { %v4501_v21 = vadd.f32 %v908_v61, %v843_v52 }
 0x22c   : > { %6200 = vst [vmem:[#allocation47_spill] sm:$0xff] %v4501_v21  ;;  %vm5985_vm12 = vcmp.ne.f32.partialorder %v4501_v21, 0.0  ;;  %1600 = vmatmul.f32.gmra.mxu0 %v4501_v21 }
 0x22d   : > { %v4513_v32 = vsel %vm5985_vm12, %v4501_v21, -1e+30  ;;  %v976_v54 = vpop.f32.mrf.mxu0  ;;  %v1041_v52 = vpop.f32.mrf.mxu1 }
 0x22e   : > { %v1150_v19 = vmax.f32 %v4513_v32, %v4506_v35  ;;  %v4517_v61 = vadd.f32 %v1041_v52, %v976_v54 }
 0x230   : > { %6201 = vst [vmem:[#allocation48_spill] sm:$0xff] %v4517_v61  ;;  %1151 = vmax.xlane.f32.xlu0 %v1150_v19  ;;  %vm5988_vm4 = vcmp.ne.f32.partialorder %v4517_v61, 0.0  ;;  %1668 = vmatmul.f32.gmra.mxu1 %v4517_v61 }
 0x231   : > { %v846_v31 = vpop.f32.mrf.mxu2  ;;  %v911_v34 = vpop.f32.mrf.mxu3  ;;  %v4526_v53 = vsel %vm5988_vm4, %v4517_v61, -1e+30 }
 0x232   : > { %v4521_v9 = vadd.f32 %v911_v34, %v846_v31 }
 0x234   : > { %6202 = vst [vmem:[#allocation49_spill] sm:$0xff] %v4521_v9  ;;  %vm5989_vm12 = vcmp.ne.f32.partialorder %v4521_v9, 0.0  ;;  %1603 = vmatmul.f32.gmra.mxu0 %v4521_v9 }
 0x235   : > { %v4533_v19 = vsel %vm5989_vm12, %v4521_v9, -1e+30  ;;  %v979_v52 = vpop.f32.mrf.mxu0  ;;  %v1044_v34 = vpop.f32.mrf.mxu1 }
 0x236   : > { %v1153_v54 = vmax.f32 %v4533_v19, %v4526_v53  ;;  %v4537_v31 = vadd.f32 %v1044_v34, %v979_v52 }
 0x238   : > { %1154 = vmax.xlane.f32.xlu0 %v1153_v54  ;;  %1671 = vmatmul.f32.gmra.mxu1 %v4537_v31  ;;  %vm1084_vm12 = vcmp.ne.f32.partialorder %v4537_v31, 0.0 }
 0x23d   : > { %v982_v6 = vpop.f32.mrf.mxu0  ;;  %v1047_v44 = vpop.f32.mrf.mxu1 }
 0x23e   : > { %v4540_v62 = vadd.f32 %v1047_v44, %v982_v6  ;;  %v849_v44 = vpop.f32.mrf.mxu2  ;;  %v914_v6 = vpop.f32.mrf.mxu3 }
 0x23f   : > { %v4552_v5 = vadd.f32 %v914_v6, %v849_v44 }
 0x240   : > { %1674 = vmatmul.f32.gmra.mxu1 %v4540_v62 }
 0x241   : > { %1606 = vmatmul.f32.gmra.mxu0 %v4552_v5  ;;  %vm1083_vm4 = vcmp.ne.f32.partialorder %v4552_v5, 0.0 }
 0x245   : > { %v985_v49 = vpop.f32.mrf.mxu0  ;;  %v1050_v24 = vpop.f32.mrf.mxu1 }
 0x246   : > { %v4543_v41 = vadd.f32 %v1050_v24, %v985_v49 }
 0x248   : > { %1677 = vmatmul.f32.gmra.mxu1 %v4543_v41 }
 0x24d   : > { %v988_v17 = vpop.f32.mrf.mxu0  ;;  %v1053_v47 = vpop.f32.mrf.mxu1 }
 0x24e   : > { %v4546_v16 = vadd.f32 %v1053_v47, %v988_v17  ;;  %v852_v47 = vpop.f32.mrf.mxu2  ;;  %v917_v17 = vpop.f32.mrf.mxu3 }
 0x24f   : > { %v4558_v25 = vadd.f32 %v917_v17, %v852_v47 }
 0x250   : > { %1680 = vmatmul.f32.gmra.mxu1 %v4546_v16 }
 0x251   : > { %1609 = vmatmul.f32.gmra.mxu0 %v4558_v25 }
 0x255   : > { %v991_v54 = vpop.f32.mrf.mxu0  ;;  %v1056_v52 = vpop.f32.mrf.mxu1 }
 0x256   : > { %v4549_v34 = vadd.f32 %v1056_v52, %v991_v54  ;;  %v920_v7 = vpop.f32.mrf.mxu3 }
 0x258   : > { %1683 = vmatmul.f32.gmra.mxu1 %v4549_v34 }
 0x25d   : > { %v994_v49 = vpop.f32.mrf.mxu0  ;;  %v1059_v24 = vpop.f32.mrf.mxu1 }
 0x25e   : > { %v4555_v45 = vadd.f32 %v1059_v24, %v994_v49  ;;  %v855_v24 = vpop.f32.mrf.mxu2  ;;  %v923_v60 = vpop.f32.mrf.mxu3 }
 0x25f   : > { %v4566_v51 = vadd.f32 %v920_v7, %v855_v24 }
 0x260   : > { %1686 = vmatmul.f32.gmra.mxu1 %v4555_v45 }
 0x261   : > { %1612 = vmatmul.f32.gmra.mxu0 %v4566_v51 }
 0x265   : > { %v997_v54 = vpop.f32.mrf.mxu0  ;;  %v1062_v52 = vpop.f32.mrf.mxu1 }
 0x266   : > { %v4560_v46 = vadd.f32 %v1062_v52, %v997_v54  ;;  %v858_v29 = vpop.f32.mrf.mxu2 }
 0x268   : > { %1689 = vmatmul.f32.gmra.mxu1 %v4560_v46 }
 0x26b   : > { %v1131_v44 = vpop.xlane.xlu2 %1130 }
 0x26c   : > { %v1177_v6 = vsub.f32 %v4373_v39, %v1131_v44  ;;  %v1178_v49 = vsub.f32 %v4366_v18, %v1131_v44  ;;  %v4571_v39 = vadd.f32 %v923_v60, %v858_v29 }
 0x26e   : > { %v1209_v38 = vmul.f32 1.442695, %v1177_v6  ;;  %v1211_v47 = vmul.f32 1.442695, %v1178_v49  ;;  %1615 = vmatmul.f32.gmra.mxu0 %v4571_v39  ;;  %v4591_v49 = vsel %vm1083_vm4, %v4552_v5, -1e+30  ;;  %v861_v24 = vpop.f32.mrf.mxu2 }
 0x270   : > { %2863 = vpow2.f32 %v1209_v38 }
 0x271   : > { %2865 = vpow2.f32 %v1211_v47  ;;  %v926_v47 = vpop.f32.mrf.mxu3 }
 0x273   : > { %v1134_v17 = vpop.xlane.xlu0 %1133 }
 0x274   : > { %v1179_v54 = vsub.f32 %v4393_v11, %v1134_v17  ;;  %v1180_v52 = vsub.f32 %v4386_v33, %v1134_v17  ;;  %v4598_v17 = vadd.f32 %v926_v47, %v861_v24 }
 0x276   : > { %v2864_v18 = vpop.eup %2863  ;;  %v1213_v44 = vmul.f32 1.442695, %v1179_v54  ;;  %v1215_v8 = vmul.f32 1.442695, %v1180_v52  ;;  %1618 = vmatmul.f32.gmra.mxu0 %v4598_v17 }
 0x277   : > { %v2866_v7 = vpop.eup %2865  ;;  %v4575_v6 = vsel %vm1065_vm11, %v2864_v18, 0.0  ;;  %vm1086_vm11 = vcmp.ne.f32.partialorder %v4540_v62, 0.0 }
 0x278   : > { %2867 = vpow2.f32 %v1213_v44  ;;  %v4580_v38 = vsel %vm1066_vm10, %v2866_v7, 0.0  ;;  %vm1085_vm10 = vcmp.ne.f32.partialorder %v4558_v25, 0.0  ;;  %v4625_v47 = vsel %vm1086_vm11, %v4540_v62, -1e+30 }
 0x279   : > { %2869 = vpow2.f32 %v1215_v8  ;;  %v1305_v60 = vadd.f32 %v4580_v38, %v4575_v6  ;;  %v4596_v8 = vsel %vm1084_vm12, %v4537_v31, -1e+30  ;;  %v4620_v24 = vsel %vm1085_vm10, %v4558_v25, -1e+30 }
 0x27a   : > { %v1156_v44 = vmax.f32 %v4591_v49, %v4596_v8 }
 0x27b   : > { %1306 = vadd.xlane.f32.xlu1 %v1305_v60  ;;  %v1137_v29 = vpop.xlane.xlu1 %1136 }
 0x27c   : > { %v1181_v33 = vsub.f32 %v4413_v28, %v1137_v29  ;;  %v1182_v11 = vsub.f32 %v4406_v48, %v1137_v29 }
 0x27e   : > { %v2868_v54 = vpop.eup %2867  ;;  %v1217_v52 = vmul.f32 1.442695, %v1181_v33  ;;  %v1219_v18 = vmul.f32 1.442695, %v1182_v11 }
 0x27f   : > { %v2870_v28 = vpop.eup %2869  ;;  %v4602_v48 = vsel %vm1067_vm14, %v2868_v54, 0.0  ;;  %v864_v54 = vpop.f32.mrf.mxu2  ;;  %vm1088_vm14 = vcmp.ne.f32.partialorder %v4543_v41, 0.0 }
 0x280   : > { %2871 = vpow2.f32 %v1217_v52  ;;  %v4609_v7 = vsel %vm1068_vm13, %v2870_v28, 0.0  ;;  %v929_v52 = vpop.f32.mrf.mxu3  ;;  %vm1087_vm13 = vcmp.ne.f32.partialorder %v4566_v51, 0.0 }
 0x281   : > { %2873 = vpow2.f32 %v1219_v18  ;;  %v1308_v60 = vadd.f32 %v4609_v7, %v4602_v48  ;;  %v4627_v18 = vadd.f32 %v929_v52, %v864_v54 }
 0x283   : > { %1309 = vadd.xlane.f32.xlu2 %v1308_v60  ;;  %1157 = vmax.xlane.f32.xlu1 %v1156_v44  ;;  %v1140_v29 = vpop.xlane.xlu2 %1139 }
 0x284   : > { %v1183_v33 = vsub.f32 %v4433_v26, %v1140_v29  ;;  %v1184_v11 = vsub.f32 %v4426_v14, %v1140_v29  ;;  %v1159_v29 = vmax.f32 %v4620_v24, %v4625_v47  ;;  %1621 = vmatmul.f32.gmra.mxu0 %v4627_v18 }
 0x286   : > { %v2872_v28 = vpop.eup %2871  ;;  %v1221_v44 = vmul.f32 1.442695, %v1183_v33  ;;  %v1223_v60 = vmul.f32 1.442695, %v1184_v11 }
 0x287   : > { %v2874_v26 = vpop.eup %2873  ;;  %v4631_v14 = vsel %vm1069_vm5, %v2872_v28, 0.0  ;;  %v4649_v28 = vsel %vm1087_vm13, %v4566_v51, -1e+30  ;;  %vm1090_vm5 = vcmp.ne.f32.partialorder %v4546_v16, 0.0 }
 0x288   : > { %2875 = vpow2.f32 %v1221_v44  ;;  %v4638_v0 = vsel %vm1070_vm15, %v2874_v26, 0.0  ;;  %v4654_v44 = vsel %vm1088_vm14, %v4543_v41, -1e+30  ;;  %v932_v26 = vpop.f32.mrf.mxu3  ;;  %vm1089_vm15 = vcmp.ne.f32.partialorder %v4571_v39, 0.0 }
 0x289   : > { %2877 = vpow2.f32 %v1223_v60  ;;  %v1311_v33 = vadd.f32 %v4638_v0, %v4631_v14  ;;  %v867_v60 = vpop.f32.mrf.mxu2 }
 0x28a   : > { %v4656_v1 = vadd.f32 %v932_v26, %v867_v60 }
 0x28b   : > { %1312 = vadd.xlane.f32.xlu2 %v1311_v33  ;;  %1160 = vmax.xlane.f32.xlu1 %v1159_v29  ;;  %v1143_v11 = vpop.xlane.xlu0 %1142 }
 0x28c   : > { %v1185_v54 = vsub.f32 %v4453_v27, %v1143_v11  ;;  %v1186_v52 = vsub.f32 %v4446_v55, %v1143_v11  ;;  %v1162_v11 = vmax.f32 %v4649_v28, %v4654_v44  ;;  %1624 = vmatmul.f32.gmra.mxu0 %v4656_v1 }
 0x28e   : > { %v2876_v29 = vpop.eup %2875  ;;  %v1225_v33 = vmul.f32 1.442695, %v1185_v54  ;;  %v1227_v36 = vmul.f32 1.442695, %v1186_v52 }
 0x28f   : > { %v2878_v27 = vpop.eup %2877  ;;  %v4660_v55 = vsel %vm1071_vm7, %v2876_v29, 0.0  ;;  %v4678_v29 = vsel %vm1089_vm15, %v4571_v39, -1e+30  ;;  %vm1092_vm7 = vcmp.ne.f32.partialorder %v4549_v34, 0.0 }
 0x290   : > { %2879 = vpow2.f32 %v1225_v33  ;;  %v4667_v12 = vsel %vm1072_vm6, %v2878_v27, 0.0  ;;  %vm1091_vm6 = vcmp.ne.f32.partialorder %v4598_v17, 0.0 }
 0x291   : > { %2881 = vpow2.f32 %v1227_v36  ;;  %v1314_v54 = vadd.f32 %v4667_v12, %v4660_v55  ;;  %v4683_v36 = vsel %vm1090_vm5, %v4546_v16, -1e+30 }
 0x293   : > { %1315 = vadd.xlane.f32.xlu0 %v1314_v54  ;;  %1163 = vmax.xlane.f32.xlu2 %v1162_v11  ;;  %v1146_v52 = vpop.xlane.xlu1 %1145 }
 0x294   : > { %v1187_v60 = vsub.f32 %v4473_v4, %v1146_v52  ;;  %v1188_v26 = vsub.f32 %v4466_v42, %v1146_v52  ;;  %v1165_v42 = vmax.f32 %v4678_v29, %v4683_v36 }
 0x296   : > { %v2880_v33 = vpop.eup %2879  ;;  %v1229_v27 = vmul.f32 1.442695, %v1187_v60  ;;  %v1231_v2 = vmul.f32 1.442695, %v1188_v26 }
 0x297   : > { %v2882_v54 = vpop.eup %2881  ;;  %v4687_v11 = vsel %vm1073_vm9, %v2880_v33, 0.0  ;;  %vm1094_vm9 = vcmp.ne.f32.partialorder %v4555_v45, 0.0 }
 0x298   : > { %2883 = vpow2.f32 %v1229_v27  ;;  %v4693_v4 = vsel %vm1074_vm8, %v2882_v54, 0.0  ;;  %v4704_v27 = vsel %vm1091_vm6, %v4598_v17, -1e+30  ;;  %vm1093_vm8 = vcmp.ne.f32.partialorder %v4627_v18, 0.0 }
 0x299   : > { %2885 = vpow2.f32 %v1231_v2  ;;  %v1317_v52 = vadd.f32 %v4693_v4, %v4687_v11  ;;  %v4709_v2 = vsel %vm1092_vm7, %v4549_v34, -1e+30 }
 0x29b   : > { %1318 = vadd.xlane.f32.xlu0 %v1317_v52  ;;  %1166 = vmax.xlane.f32.xlu2 %v1165_v42  ;;  %v1149_v60 = vpop.xlane.xlu2 %1148 }
 0x29c   : > { %v1189_v26 = vsub.f32 %v4493_v15, %v1149_v60  ;;  %v1190_v33 = vsub.f32 %v4486_v56, %v1149_v60  ;;  %v1168_v56 = vmax.f32 %v4704_v27, %v4709_v2 }
 0x29e   : > { %v2884_v54 = vpop.eup %2883  ;;  %v1233_v59 = vmul.f32 1.442695, %v1189_v26  ;;  %v1235_v57 = vmul.f32 1.442695, %v1190_v33 }
 0x29f   : > { %v2886_v52 = vpop.eup %2885  ;;  %v4713_v42 = vsel %vm1075_vm0, %v2884_v54, 0.0  ;;  %vm5996_vm0 = vcmp.ne.f32.partialorder %v4560_v46, 0.0 }
 0x2a0   : > { %2887 = vpow2.f32 %v1233_v59  ;;  %v4719_v15 = vsel %vm1076_vm2, %v2886_v52, 0.0  ;;  %v4730_v59 = vsel %vm1093_vm8, %v4627_v18, -1e+30  ;;  %vm5999_vm2 = vcmp.ne.f32.partialorder %v4656_v1, 0.0 }
 0x2a1   : > { %2889 = vpow2.f32 %v1235_v57  ;;  %v1320_v60 = vadd.f32 %v4719_v15, %v4713_v42  ;;  %v4735_v57 = vsel %vm1094_vm9, %v4555_v45, -1e+30 }
 0x2a3   : > { %1321 = vadd.xlane.f32.xlu1 %v1320_v60  ;;  %1169 = vmax.xlane.f32.xlu0 %v1168_v56  ;;  %v1152_v26 = vpop.xlane.xlu0 %1151 }
 0x2a4   : > { %v1191_v33 = vsub.f32 %v4513_v32, %v1152_v26  ;;  %v1192_v54 = vsub.f32 %v4506_v35, %v1152_v26  ;;  %v1171_v35 = vmax.f32 %v4730_v59, %v4735_v57 }
 0x2a6   : > { %v2888_v52 = vpop.eup %2887  ;;  %v1237_v10 = vmul.f32 1.442695, %v1191_v33  ;;  %v1239_v23 = vmul.f32 1.442695, %v1192_v54 }
 0x2a7   : > { %v2890_v60 = vpop.eup %2889  ;;  %v4739_v56 = vsel %vm1077_vm3, %v2888_v52, 0.0  ;;  %vm6204_vm3 = vcmp.ne.f32.partialorder %v4497_v20, 0.0 }
 0x2a8   : > { %2891 = vpow2.f32 %v1237_v10  ;;  %v4745_v32 = vsel %vm1078_vm1, %v2890_v60, 0.0  ;;  %v4756_v10 = vsel %vm5999_vm2, %v4656_v1, -1e+30  ;;  %vm6203_vm1 = vcmp.ne.f32.partialorder %v4501_v21, 0.0 }
 0x2a9   : > { %2893 = vpow2.f32 %v1239_v23  ;;  %v1323_v26 = vadd.f32 %v4745_v32, %v4739_v56  ;;  %v4761_v23 = vsel %vm5996_vm0, %v4560_v46, -1e+30  ;;  %vm6205_vm0 = vcmp.ne.f32.partialorder %v4521_v9, 0.0 }
 0x2ab   : > { %1324 = vadd.xlane.f32.xlu1 %v1323_v26  ;;  %1172 = vmax.xlane.f32.xlu0 %v1171_v35  ;;  %v1155_v33 = vpop.xlane.xlu0 %1154 }
 0x2ac   : > { %v1193_v54 = vsub.f32 %v4533_v19, %v1155_v33  ;;  %v1194_v52 = vsub.f32 %v4526_v53, %v1155_v33  ;;  %v1174_v53 = vmax.f32 %v4756_v10, %v4761_v23 }
 0x2ae   : > { %v2892_v60 = vpop.eup %2891  ;;  %v1241_v43 = vmul.f32 1.442695, %v1193_v54  ;;  %v1243_v3 = vmul.f32 1.442695, %v1194_v52 }
 0x2af   : > { %v2894_v26 = vpop.eup %2893  ;;  %v4765_v35 = vsel %vm6203_vm1, %v2892_v60, 0.0  ;;  %vm6206_vm1 = vcmp.ne.f32.partialorder %v4517_v61, 0.0 }
 0x2b0   : > { %2895 = vpow2.f32 %v1241_v43  ;;  %v4771_v19 = vsel %vm6204_vm3, %v2894_v26, 0.0 }
 0x2b1   : > { %2897 = vpow2.f32 %v1243_v3  ;;  %v1326_v33 = vadd.f32 %v4771_v19, %v4765_v35 }
 0x2b3   : > { %1327 = vadd.xlane.f32.xlu2 %v1326_v33  ;;  %1175 = vmax.xlane.f32.xlu1 %v1174_v53 }
 0x2b6   : > { %v2896_v54 = vpop.eup %2895 }
 0x2b7   : > { %v2898_v52 = vpop.eup %2897  ;;  %v4777_v60 = vsel %vm6205_vm0, %v2896_v54, 0.0 }
 0x2b8   : > { %v4781_v21 = vsel %vm6206_vm1, %v2898_v52, 0.0 }
 0x2b9   : > { %v1329_v43 = vadd.f32 %v4781_v21, %v4777_v60 }
 0x2bb   : > { %1330 = vadd.xlane.f32.xlu2 %v1329_v43 }
 0x2ee   : > { %v1307_v3 = vpop.xlane.xlu1 %1306 }
 0x2ef   : > { %vm1353_vm3 = vcmp.gt.f32.partialorder %v1307_v3, 0.0 }
 0x2f0   : > { %v1369_v26 = vsel %vm1353_vm3, %v1307_v3, 1.0 }
 0x2f1   : > { %2899 = vrcp.f32 %v1369_v26 }
 0x2f6   : > { %v1310_v20 = vpop.xlane.xlu2 %1309  ;;  %v1158_v33 = vpop.xlane.xlu1 %1157 }
 0x2f7   : > { %vm1354_vm2 = vcmp.gt.f32.partialorder %v1310_v20, 0.0  ;;  %v1195_v53 = vsub.f32 %v4591_v49, %v1158_v33  ;;  %v1196_v54 = vsub.f32 %v4596_v8, %v1158_v33  ;;  %v2900_v58 = vpop.eup %2899 }
 0x2f8   : > { %v1370_v9 = vsel %vm1354_vm2, %v1310_v20, 1.0  ;;  %v1401_v26 = vmul.f32 %v2900_v58, %v4575_v6  ;;  %v1402_v49 = vmul.f32 %v2900_v58, %v4580_v38 }
 0x2f9   : > { %2901 = vrcp.f32 %v1370_v9  ;;  %v1245_v61 = vmul.f32 1.442695, %v1195_v53  ;;  %v1247_v52 = vmul.f32 1.442695, %v1196_v54 }
 0x2fb   : > { %2903 = vpow2.f32 %v1245_v61 }
 0x2fc   : > { %2905 = vpow2.f32 %v1247_v52 }
 0x2fe   : > { %v1313_v40 = vpop.xlane.xlu2 %1312  ;;  %v1161_v43 = vpop.xlane.xlu1 %1160 }
 0x2ff   : > { %v2902_v50 = vpop.eup %2901  ;;  %v1197_v3 = vsub.f32 %v4620_v24, %v1161_v43  ;;  %v1198_v13 = vsub.f32 %v4625_v47, %v1161_v43  ;;  %vm1355_vm2 = vcmp.gt.f32.partialorder %v1313_v40, 0.0 }
 0x300   : > { %v1403_v8 = vmul.f32 %v2902_v50, %v4602_v48  ;;  %v1404_v9 = vmul.f32 %v2902_v50, %v4609_v7  ;;  %v1371_v58 = vsel %vm1355_vm2, %v1313_v40, 1.0 }
 0x301   : > { %v2904_v20 = vpop.eup %2903  ;;  %v1249_v61 = vmul.f32 1.442695, %v1197_v3  ;;  %v1251_v33 = vmul.f32 1.442695, %v1198_v13 }
 0x302   : > { %v2906_v53 = vpop.eup %2905  ;;  %v1433_v54 = vpack.c.bf16 %v1403_v8, %v1401_v26  ;;  %v1434_v52 = vpack.c.bf16 %v1404_v9, %v1402_v49  ;;  %v4795_v24 = vsel %vm1083_vm4, %v2904_v20, 0.0 }
 0x303   : > { %2907 = vpow2.f32 %v1249_v61  ;;  %v4799_v6 = vsel %vm1084_vm12, %v2906_v53, 0.0 }
 0x304   : > { %2909 = vpow2.f32 %v1251_v33  ;;  %1457 = vmatmul.bf16.vlgmr.msra.gmra.mxu2 %v1433_v54  ;;  %1506 = vmatmul.bf16.vlgmr.msra.gmra.mxu3 %v1434_v52  ;;  %v1332_v50 = vadd.f32 %v4799_v6, %v4795_v24 }
 0x305   : > { %2911 = vrcp.f32 %v1371_v58 }
 0x306   : > { %1333 = vadd.xlane.f32.xlu0 %v1332_v50  ;;  %v1316_v13 = vpop.xlane.xlu0 %1315  ;;  %v1164_v38 = vpop.xlane.xlu2 %1163 }
 0x307   : > { %vm1356_vm0 = vcmp.gt.f32.partialorder %v1316_v13, 0.0  ;;  %v1199_v48 = vsub.f32 %v4649_v28, %v1164_v38  ;;  %v1200_v7 = vsub.f32 %v4654_v44, %v1164_v38 }
 0x308   : > { %v1372_v47 = vsel %vm1356_vm0, %v1316_v13, 1.0 }
 0x309   : > { %v2908_v43 = vpop.eup %2907  ;;  %2913 = vrcp.f32 %v1372_v47  ;;  %v1253_v3 = vmul.f32 1.442695, %v1199_v48  ;;  %v1255_v40 = vmul.f32 1.442695, %v1200_v7 }
 0x30a   : > { %v2910_v26 = vpop.eup %2909  ;;  %v4807_v49 = vsel %vm1085_vm10, %v2908_v43, 0.0 }
 0x30b   : > { %2915 = vpow2.f32 %v1253_v3  ;;  %v4811_v8 = vsel %vm1086_vm11, %v2910_v26, 0.0  ;;  %v2912_v44 = vpop.eup %2911 }
 0x30c   : > { %2917 = vpow2.f32 %v1255_v40  ;;  %v1335_v28 = vadd.f32 %v4811_v8, %v4807_v49  ;;  %v1405_v54 = vmul.f32 %v2912_v44, %v4631_v14  ;;  %v1406_v58 = vmul.f32 %v2912_v44, %v4638_v0 }
 0x30e   : > { %1336 = vadd.xlane.f32.xlu1 %v1335_v28  ;;  %v1319_v9 = vpop.xlane.xlu0 %1318  ;;  %v1167_v20 = vpop.xlane.xlu2 %1166 }
 0x30f   : > { %v2914_v61 = vpop.eup %2913  ;;  %v1201_v33 = vsub.f32 %v4678_v29, %v1167_v20  ;;  %v1202_v53 = vsub.f32 %v4683_v36, %v1167_v20  ;;  %vm1357_vm4 = vcmp.gt.f32.partialorder %v1319_v9, 0.0 }
 0x310   : > { %v1407_v52 = vmul.f32 %v2914_v61, %v4660_v55  ;;  %v1408_v50 = vmul.f32 %v2914_v61, %v4667_v12  ;;  %v1373_v55 = vsel %vm1357_vm4, %v1319_v9, 1.0 }
 0x311   : > { %v2916_v13 = vpop.eup %2915  ;;  %v1257_v38 = vmul.f32 1.442695, %v1201_v33  ;;  %v1259_v48 = vmul.f32 1.442695, %v1202_v53 }
 0x312   : > { %v2918_v7 = vpop.eup %2917  ;;  %v1435_v47 = vpack.c.bf16 %v1407_v52, %v1405_v54  ;;  %v1436_v43 = vpack.c.bf16 %v1408_v50, %v1406_v58  ;;  %v4823_v29 = vsel %vm1087_vm13, %v2916_v13, 0.0  ;;  %vm6207_vm13 = vcmp.ne.f32.partialorder %v4656_v1, 0.0 }
 0x313   : > { %2919 = vpow2.f32 %v1257_v38  ;;  %v4827_v14 = vsel %vm1088_vm14, %v2918_v7, 0.0  ;;  %vm6208_vm14 = vcmp.ne.f32.partialorder %v4560_v46, 0.0 }
 0x314   : > { %2921 = vpow2.f32 %v1259_v48  ;;  %1462 = vmatmul.bf16.gmra.mxu2 %v1435_v47  ;;  %1511 = vmatmul.bf16.gmra.mxu3 %v1436_v43  ;;  %v1338_v12 = vadd.f32 %v4827_v14, %v4823_v29 }
 0x315   : > { %2923 = vrcp.f32 %v1373_v55 }
 0x316   : > { %1339 = vadd.xlane.f32.xlu2 %v1338_v12  ;;  %v1322_v0 = vpop.xlane.xlu1 %1321  ;;  %v1170_v36 = vpop.xlane.xlu0 %1169 }
 0x317   : > { %vm1358_vm12 = vcmp.gt.f32.partialorder %v1322_v0, 0.0  ;;  %v1203_v3 = vsub.f32 %v4704_v27, %v1170_v36  ;;  %v1204_v40 = vsub.f32 %v4709_v2, %v1170_v36 }
 0x318   : > { %v1374_v26 = vsel %vm1358_vm12, %v1322_v0, 1.0 }
 0x319   : > { %v2920_v28 = vpop.eup %2919  ;;  %2925 = vrcp.f32 %v1374_v26  ;;  %v1261_v44 = vmul.f32 1.442695, %v1203_v3  ;;  %v1263_v9 = vmul.f32 1.442695, %v1204_v40 }
 0x31a   : > { %v2922_v20 = vpop.eup %2921  ;;  %v4835_v61 = vsel %vm1089_vm15, %v2920_v28, 0.0 }
 0x31b   : > { %2927 = vpow2.f32 %v1261_v44  ;;  %v4839_v33 = vsel %vm1090_vm5, %v2922_v20, 0.0  ;;  %v2924_v2 = vpop.eup %2923 }
 0x31c   : > { %2929 = vpow2.f32 %v1263_v9  ;;  %v1341_v27 = vadd.f32 %v4839_v33, %v4835_v61  ;;  %v1409_v13 = vmul.f32 %v2924_v2, %v4687_v11  ;;  %v1410_v48 = vmul.f32 %v2924_v2, %v4693_v4 }
 0x31e   : > { %1342 = vadd.xlane.f32.xlu0 %v1341_v27  ;;  %v1325_v53 = vpop.xlane.xlu1 %1324  ;;  %v1173_v54 = vpop.xlane.xlu0 %1172 }
 0x31f   : > { %v2926_v52 = vpop.eup %2925  ;;  %v1205_v58 = vsub.f32 %v4730_v59, %v1173_v54  ;;  %v1206_v50 = vsub.f32 %v4735_v57, %v1173_v54  ;;  %vm1359_vm10 = vcmp.gt.f32.partialorder %v1325_v53, 0.0 }
 0x320   : > { %v1411_v38 = vmul.f32 %v2926_v52, %v4713_v42  ;;  %v1412_v7 = vmul.f32 %v2926_v52, %v4719_v15  ;;  %v1375_v42 = vsel %vm1359_vm10, %v1325_v53, 1.0 }
 0x321   : > { %v2928_v47 = vpop.eup %2927  ;;  %v1265_v43 = vmul.f32 1.442695, %v1205_v58  ;;  %v1267_v55 = vmul.f32 1.442695, %v1206_v50 }
 0x322   : > { %v2930_v12 = vpop.eup %2929  ;;  %v1437_v0 = vpack.c.bf16 %v1411_v38, %v1409_v13  ;;  %v1438_v36 = vpack.c.bf16 %v1412_v7, %v1410_v48  ;;  %v4851_v59 = vsel %vm1091_vm6, %v2928_v47, 0.0 }
 0x323   : > { %2931 = vpow2.f32 %v1265_v43  ;;  %v4855_v11 = vsel %vm1092_vm7, %v2930_v12, 0.0 }
 0x324   : > { %2933 = vpow2.f32 %v1267_v55  ;;  %1467 = vmatmul.bf16.gmra.mxu2 %v1437_v0  ;;  %1516 = vmatmul.bf16.gmra.mxu3 %v1438_v36  ;;  %v1344_v4 = vadd.f32 %v4855_v11, %v4851_v59 }
 0x325   : > { %2935 = vrcp.f32 %v1375_v42 }
 0x326   : > { %1345 = vadd.xlane.f32.xlu1 %v1344_v4  ;;  %v1328_v15 = vpop.xlane.xlu2 %1327  ;;  %v1176_v57 = vpop.xlane.xlu1 %1175 }
 0x327   : > { %vm1360_vm11 = vcmp.gt.f32.partialorder %v1328_v15, 0.0  ;;  %v1207_v3 = vsub.f32 %v4756_v10, %v1176_v57  ;;  %v1208_v40 = vsub.f32 %v4761_v23, %v1176_v57 }
 0x328   : > { %v1376_v26 = vsel %vm1360_vm11, %v1328_v15, 1.0 }
 0x329   : > { %v2932_v28 = vpop.eup %2931  ;;  %2937 = vrcp.f32 %v1376_v26  ;;  %v1269_v44 = vmul.f32 1.442695, %v1207_v3  ;;  %v1271_v9 = vmul.f32 1.442695, %v1208_v40 }
 0x32a   : > { %v2934_v20 = vpop.eup %2933  ;;  %v4863_v27 = vsel %vm1093_vm8, %v2932_v28, 0.0 }
 0x32b   : > { %2939 = vpow2.f32 %v1269_v44  ;;  %v4867_v2 = vsel %vm1094_vm9, %v2934_v20, 0.0  ;;  %v2936_v23 = vpop.eup %2935 }
 0x32c   : > { %2941 = vpow2.f32 %v1271_v9  ;;  %v1347_v10 = vadd.f32 %v4867_v2, %v4863_v27  ;;  %v1413_v54 = vmul.f32 %v2936_v23, %v4739_v56  ;;  %v1414_v58 = vmul.f32 %v2936_v23, %v4745_v32 }
 0x32e   : > { %1348 = vadd.xlane.f32.xlu2 %v1347_v10  ;;  %v1331_v32 = vpop.xlane.xlu2 %1330 }
 0x32f   : > { %v2938_v53 = vpop.eup %2937  ;;  %vm1361_vm15 = vcmp.gt.f32.partialorder %v1331_v32, 0.0 }
 0x330   : > { %v1415_v52 = vmul.f32 %v2938_v53, %v4765_v35  ;;  %v1416_v50 = vmul.f32 %v2938_v53, %v4771_v19  ;;  %v1377_v35 = vsel %vm1361_vm15, %v1331_v32, 1.0 }
 0x331   : > { %v2940_v13 = vpop.eup %2939  ;;  %2943 = vrcp.f32 %v1377_v35 }
 0x332   : > { %v2942_v38 = vpop.eup %2941  ;;  %v1439_v48 = vpack.c.bf16 %v1415_v52, %v1413_v54  ;;  %v1440_v7 = vpack.c.bf16 %v1416_v50, %v1414_v58  ;;  %v4877_v47 = vsel %vm6207_vm13, %v2940_v13, 0.0 }
 0x333   : > { %v4881_v43 = vsel %vm6208_vm14, %v2942_v38, 0.0 }
 0x334   : > { %1472 = vmatmul.bf16.gmra.mxu2 %v1439_v48  ;;  %1521 = vmatmul.bf16.gmra.mxu3 %v1440_v7  ;;  %v1350_v56 = vadd.f32 %v4881_v43, %v4877_v47 }
 0x336   : > { %1351 = vadd.xlane.f32.xlu0 %v1350_v56 }
 0x337   : > { %v2944_v12 = vpop.eup %2943 }
 0x338   : > { %v1417_v42 = vmul.f32 %v2944_v12, %v4777_v60  ;;  %v1418_v15 = vmul.f32 %v2944_v12, %v4781_v21 }
 0x379   : > { %v1334_v19 = vpop.xlane.xlu0 %1333 }
 0x37a   : > { %vm1362_vm5 = vcmp.gt.f32.partialorder %v1334_v19, 0.0 }
 0x37b   : > { %v1378_v55 = vsel %vm1362_vm5, %v1334_v19, 1.0 }
 0x37c   : > { %2945 = vrcp.f32 %v1378_v55 }
 0x381   : > { %v1337_v0 = vpop.xlane.xlu1 %1336 }
 0x382   : > { %v2946_v36 = vpop.eup %2945  ;;  %vm1363_vm6 = vcmp.gt.f32.partialorder %v1337_v0, 0.0 }
 0x383   : > { %v1419_v4 = vmul.f32 %v2946_v36, %v4795_v24  ;;  %v1420_v57 = vmul.f32 %v2946_v36, %v4799_v6  ;;  %v1379_v26 = vsel %vm1363_vm6, %v1337_v0, 1.0 }
 0x384   : > { %2947 = vrcp.f32 %v1379_v26  ;;  %v6220_v26 = vld [vmem:[#allocation38_spill] sm:$0xff] }
 0x385   : > { %v1441_v3 = vpack.c.bf16 %v1419_v4, %v1417_v42  ;;  %v1442_v40 = vpack.c.bf16 %v1420_v57, %v1418_v15 }
 0x387   : > { %1477 = vmatmul.bf16.gmra.mxu2 %v1441_v3  ;;  %1526 = vmatmul.bf16.gmra.mxu3 %v1442_v40  ;;  %v4901_v36 = vpop.f32.mrf.mxu2  ;;  %v4903_v42 = vpop.f32.mrf.mxu3  ;;  %v6215_v40 = vld [vmem:[#allocation37_spill] sm:$0xff] }
 0x388   : > { %6209 = vst [vmem:[#allocation50_spill] sm:$0xff] %v4901_v36 }
 0x389   : > { %v1340_v28 = vpop.xlane.xlu2 %1339  ;;  %6210 = vst [vmem:[#allocation51_spill] sm:$0xff] %v4903_v42 }
 0x38a   : > { %vm1364_vm7 = vcmp.gt.f32.partialorder %v1340_v28, 0.0  ;;  %v2948_v9 = vpop.eup %2947 }
 0x38b   : > { %v1380_v44 = vsel %vm1364_vm7, %v1340_v28, 1.0  ;;  %v1421_v24 = vmul.f32 %v2948_v9, %v4807_v49  ;;  %v1422_v6 = vmul.f32 %v2948_v9, %v4811_v8  ;;  %v6221_v9 = vld [vmem:[#allocation41_spill] sm:$0xff] }
 0x38c   : > { %2949 = vrcp.f32 %v1380_v44 }
 0x38f   : > { %v4905_v4 = vpop.f32.mrf.mxu2  ;;  %v4907_v15 = vpop.f32.mrf.mxu3 }
 0x391   : > { %v1343_v20 = vpop.xlane.xlu0 %1342 }
 0x392   : > { %v2950_v60 = vpop.eup %2949  ;;  %vm1365_vm8 = vcmp.gt.f32.partialorder %v1343_v20, 0.0 }
 0x393   : > { %v1423_v21 = vmul.f32 %v2950_v60, %v4823_v29  ;;  %v1424_v10 = vmul.f32 %v2950_v60, %v4827_v14  ;;  %v1381_v54 = vsel %vm1365_vm8, %v1343_v20, 1.0  ;;  %v6222_v20 = vld [vmem:[#allocation40_spill] sm:$0xff]  ;;  %v6223_v60 = vld [vmem:[#allocation43_spill] sm:$0xff] }
 0x394   : > { %2951 = vrcp.f32 %v1381_v54 }
 0x395   : > { %v1443_v23 = vpack.c.bf16 %v1423_v21, %v1421_v24  ;;  %v1444_v53 = vpack.c.bf16 %v1424_v10, %v1422_v6  ;;  %v6224_v24 = vld [vmem:[#allocation42_spill] sm:$0xff]  ;;  %v6227_v10 = vld [vmem:[#allocation47_spill] sm:$0xff] }
 0x397   : > { %1482 = vmatmul.bf16.gmra.mxu2 %v1443_v23  ;;  %1531 = vmatmul.bf16.gmra.mxu3 %v1444_v53  ;;  %v6228_v23 = vld [vmem:[#allocation44_spill] sm:$0xff] }
 0x399   : > { %v1346_v52 = vpop.xlane.xlu1 %1345 }
 0x39a   : > { %vm1366_vm9 = vcmp.gt.f32.partialorder %v1346_v52, 0.0  ;;  %v2952_v50 = vpop.eup %2951 }
 0x39b   : > { %v1382_v58 = vsel %vm1366_vm9, %v1346_v52, 1.0  ;;  %v1425_v29 = vmul.f32 %v2952_v50, %v4835_v61  ;;  %v1426_v14 = vmul.f32 %v2952_v50, %v4839_v33  ;;  %v6231_v52 = vld [vmem:[#allocation49_spill] sm:$0xff] }
 0x39c   : > { %2953 = vrcp.f32 %v1382_v58  ;;  %v6232_v58 = vld [vmem:[#allocation48_spill] sm:$0xff] }
 0x3a1   : > { %v1349_v13 = vpop.xlane.xlu2 %1348 }
 0x3a2   : > { %v2954_v49 = vpop.eup %2953  ;;  %vm1367_vm1 = vcmp.gt.f32.partialorder %v1349_v13, 0.0 }
 0x3a3   : > { %v1427_v8 = vmul.f32 %v2954_v49, %v4851_v59  ;;  %v1428_v38 = vmul.f32 %v2954_v49, %v4855_v11  ;;  %v1383_v56 = vsel %vm1367_vm1, %v1349_v13, 1.0 }
 0x3a4   : > { %2955 = vrcp.f32 %v1383_v56 }
 0x3a5   : > { %v1445_v48 = vpack.c.bf16 %v1427_v8, %v1425_v29  ;;  %v1446_v7 = vpack.c.bf16 %v1428_v38, %v1426_v14 }
 0x3a7   : > { %1487 = vmatmul.bf16.gmra.mxu2 %v1445_v48  ;;  %1536 = vmatmul.bf16.gmra.mxu3 %v1446_v7 }
 0x3a9   : > { %v1352_v32 = vpop.xlane.xlu0 %1351 }
 0x3aa   : > { %vm1368_vm3 = vcmp.gt.f32.partialorder %v1352_v32, 0.0  ;;  %v2956_v19 = vpop.eup %2955 }
 0x3ab   : > { %v1384_v35 = vsel %vm1368_vm3, %v1352_v32, 1.0  ;;  %v1429_v61 = vmul.f32 %v2956_v19, %v4863_v27  ;;  %v1430_v33 = vmul.f32 %v2956_v19, %v4867_v2  ;;  %v4913_v27 = vpop.f32.mrf.mxu2  ;;  %v4915_v2 = vpop.f32.mrf.mxu3 }
 0x3ac   : > { %2957 = vrcp.f32 %v1384_v35 }
 0x3b2   : > { %v2958_v55 = vpop.eup %2957 }
 0x3b3   : > { %v1431_v59 = vmul.f32 %v2958_v55, %v4877_v47  ;;  %v1432_v11 = vmul.f32 %v2958_v55, %v4881_v43  ;;  %v6211_v47 = vld [vmem:[#allocation35_spill] sm:$0xff]  ;;  %v6212_v43 = vld [vmem:[#allocation32_spill] sm:$0xff]  ;;  %v4919_v57 = vpop.f32.mrf.mxu2  ;;  %v4921_v3 = vpop.f32.mrf.mxu3 }
 0x3b4   : > { %6213 = vst [vmem:[#allocation52_spill] sm:$0xff] %v4919_v57  ;;  %v1645_v55 = vpop.f32.mrf.mxu1 }
 0x3b5   : > { %v1447_v12 = vpack.c.bf16 %v1431_v59, %v1429_v61  ;;  %v1448_v0 = vpack.c.bf16 %v1432_v11, %v1430_v33  ;;  %6214 = vst [vmem:[#allocation53_spill] sm:$0xff] %v4921_v3 }
 0x3b7   : > { %1492 = vmatmul.bf16.gmra.mxu2 %v1447_v12  ;;  %1541 = vmatmul.bf16.gmra.mxu3 %v1448_v0 }
 0x3bc   : > { %v1648_v33 = vpop.f32.mrf.mxu1 }
 0x3c7   : > { %1709 = vmatmul.f32.vlgmr.msrb.gmra.mxu2 %v4361_v22  ;;  %1774 = vmatmul.f32.vlgmr.msrb.gmra.mxu3 %v4357_v63  ;;  %v6216_v22 = vld [vmem:[#allocation36_spill] sm:$0xff]  ;;  %v4925_v63 = vpop.f32.mrf.mxu2 }
 0x3c8   : > { %6217 = vst [vmem:[#allocation35_spill] sm:$0xff] %v4925_v63 }
 0x3cf   : > { %1712 = vmatmul.f32.gmra.mxu2 %v4381_v30  ;;  %1777 = vmatmul.f32.gmra.mxu3 %v4377_v37  ;;  %v4927_v30 = vpop.f32.mrf.mxu3  ;;  %v6219_v37 = vld [vmem:[#allocation39_spill] sm:$0xff]  ;;  %v4931_v28 = vpop.f32.mrf.mxu2 }
 0x3d0   : > { %6218 = vst [vmem:[#allocation32_spill] sm:$0xff] %v4927_v30 }
 0x3d7   : > { %1715 = vmatmul.f32.gmra.mxu2 %v6211_v47  ;;  %1780 = vmatmul.f32.gmra.mxu3 %v6212_v43  ;;  %v4933_v44 = vpop.f32.mrf.mxu3  ;;  %v4939_v21 = vpop.f32.mrf.mxu2 }
 0x3d8   : > { %6225 = vst [vmem:[#allocation37_spill] sm:$0xff] %v4939_v21 }
 0x3df   : > { %1718 = vmatmul.f32.gmra.mxu2 %v6215_v40  ;;  %1783 = vmatmul.f32.gmra.mxu3 %v6216_v22  ;;  %v4941_v6 = vpop.f32.mrf.mxu3  ;;  %v4945_v53 = vpop.f32.mrf.mxu2 }
 0x3e0   : > { %6226 = vst [vmem:[#allocation36_spill] sm:$0xff] %v4941_v6 }
 0x3e1   : > { %6229 = vst [vmem:[#allocation39_spill] sm:$0xff] %v4945_v53 }
 0x3e7   : > { %1721 = vmatmul.f32.gmra.mxu2 %v6219_v37  ;;  %1786 = vmatmul.f32.gmra.mxu3 %v6220_v26  ;;  %v4947_v54 = vpop.f32.mrf.mxu3 }
 0x3e8   : > { %6230 = vst [vmem:[#allocation38_spill] sm:$0xff] %v4947_v54 }
 0x3ef   : > { %1724 = vmatmul.f32.gmra.mxu2 %v6221_v9  ;;  %1789 = vmatmul.f32.gmra.mxu3 %v6222_v20 }
 0x3f7   : > { %1727 = vmatmul.f32.gmra.mxu2 %v6223_v60  ;;  %1792 = vmatmul.f32.gmra.mxu3 %v6224_v24 }
 0x3ff   : > { %1730 = vmatmul.f32.gmra.mxu2 %v6227_v10  ;;  %1795 = vmatmul.f32.gmra.mxu3 %v6228_v23 }
 0x407   : > { %1733 = vmatmul.f32.gmra.mxu2 %v6231_v52  ;;  %1798 = vmatmul.f32.gmra.mxu3 %v6232_v58 }
 0x40a   : > { %v1478_v50 = vpop.f32.mrf.mxu2  ;;  %v1527_v13 = vpop.f32.mrf.mxu3 }
 0x40b   : > { %v4951_v49 = vadd.f32 %v1527_v13, %v1478_v50 }
 0x40d   : > { %6233 = vst [vmem:[#allocation41_spill] sm:$0xff] %v4951_v49 }
 0x40f   : > { %1736 = vmatmul.f32.gmra.mxu2 %v4552_v5  ;;  %1801 = vmatmul.f32.gmra.mxu3 %v4537_v31 }
 0x412   : > { %v1480_v29 = vpop.f32.mrf.mxu2  ;;  %v1529_v8 = vpop.f32.mrf.mxu3 }
 0x413   : > { %v4955_v14 = vadd.f32 %v1529_v8, %v1480_v29 }
 0x415   : > { %6234 = vst [vmem:[#allocation40_spill] sm:$0xff] %v4955_v14 }
 0x417   : > { %1739 = vmatmul.f32.gmra.mxu2 %v4558_v25  ;;  %1804 = vmatmul.f32.gmra.mxu3 %v4540_v62 }
 0x41a   : > { %v1483_v38 = vpop.f32.mrf.mxu2  ;;  %v1532_v48 = vpop.f32.mrf.mxu3 }
 0x41b   : > { %v4959_v7 = vadd.f32 %v1532_v48, %v1483_v38 }
 0x41d   : > { %6235 = vst [vmem:[#allocation43_spill] sm:$0xff] %v4959_v7 }
 0x41f   : > { %1742 = vmatmul.f32.gmra.mxu2 %v4566_v51  ;;  %1807 = vmatmul.f32.gmra.mxu3 %v4543_v41  ;;  %v1580_v41 = vpop.f32.mrf.mxu0 }
 0x420   : > { %v4981_v12 = vadd.f32 %v1645_v55, %v1580_v41 }
 0x422   : > { %v1485_v56 = vpop.f32.mrf.mxu2  ;;  %v1534_v5 = vpop.f32.mrf.mxu3  ;;  %vm1823_vm2 = vcmp.ne.f32.partialorder %v4981_v12, 0.0 }
 0x423   : > { %v4963_v32 = vadd.f32 %v1534_v5, %v1485_v56 }
 0x425   : > { %6236 = vst [vmem:[#allocation42_spill] sm:$0xff] %v4963_v32 }
 0x427   : > { %1745 = vmatmul.f32.gmra.mxu2 %v4571_v39  ;;  %1810 = vmatmul.f32.gmra.mxu3 %v4546_v16  ;;  %v1583_v59 = vpop.f32.mrf.mxu0 }
 0x428   : > { %v4997_v40 = vadd.f32 %v1648_v33, %v1583_v59 }
 0x42a   : > { %v1488_v31 = vpop.f32.mrf.mxu2  ;;  %v1537_v25 = vpop.f32.mrf.mxu3  ;;  %vm1825_vm4 = vcmp.ne.f32.partialorder %v4997_v40, 0.0 }
 0x42b   : > { %v4967_v35 = vadd.f32 %v1537_v25, %v1488_v31  ;;  %v5008_v24 = vsel %vm1825_vm4, %v4997_v40, -1e+30 }
 0x42d   : > { %6237 = vst [vmem:[#allocation47_spill] sm:$0xff] %v4967_v35 }
 0x42f   : > { %1748 = vmatmul.f32.gmra.mxu2 %v4598_v17  ;;  %1813 = vmatmul.f32.gmra.mxu3 %v4549_v34  ;;  %v1586_v0 = vpop.f32.mrf.mxu0 }
 0x432   : > { %v1490_v62 = vpop.f32.mrf.mxu2  ;;  %v1539_v51 = vpop.f32.mrf.mxu3 }
 0x433   : > { %v4971_v19 = vadd.f32 %v1539_v51, %v1490_v62 }
 0x435   : > { %6238 = vst [vmem:[#allocation44_spill] sm:$0xff] %v4971_v19 }
 0x437   : > { %1751 = vmatmul.f32.gmra.mxu2 %v4627_v18  ;;  %1816 = vmatmul.f32.gmra.mxu3 %v4555_v45  ;;  %v1651_v18 = vpop.f32.mrf.mxu1  ;;  %v1589_v9 = vpop.f32.mrf.mxu0 }
 0x438   : > { %v5015_v23 = vadd.f32 %v1651_v18, %v1586_v0 }
 0x43a   : > { %v1493_v39 = vpop.f32.mrf.mxu2  ;;  %v1542_v16 = vpop.f32.mrf.mxu3  ;;  %vm1827_vm10 = vcmp.ne.f32.partialorder %v5015_v23, 0.0 }
 0x43b   : > { %v4975_v61 = vadd.f32 %v1542_v16, %v1493_v39  ;;  %v5026_v38 = vsel %vm1827_vm10, %v5015_v23, -1e+30 }
 0x43d   : > { %6239 = vst [vmem:[#allocation49_spill] sm:$0xff] %v4975_v61 }
 0x43f   : > { %1754 = vmatmul.f32.gmra.mxu2 %v4656_v1  ;;  %1819 = vmatmul.f32.gmra.mxu3 %v4560_v46  ;;  %v4990_v1 = vsel %vm1823_vm2, %v4981_v12, -1e+30  ;;  %v1654_v20 = vpop.f32.mrf.mxu1  ;;  %v1592_v29 = vpop.f32.mrf.mxu0 }
 0x440   : > { %v5033_v56 = vadd.f32 %v1654_v20, %v1589_v9 }
 0x442   : > { %v1495_v34 = vpop.f32.mrf.mxu2  ;;  %v1544_v17 = vpop.f32.mrf.mxu3  ;;  %vm1829_vm13 = vcmp.ne.f32.partialorder %v5033_v56, 0.0 }
 0x443   : > { %v4979_v11 = vadd.f32 %v1544_v17, %v1495_v34  ;;  %v5044_v51 = vsel %vm1829_vm13, %v5033_v56, -1e+30 }
 0x445   : > { %6240 = vst [vmem:[#allocation48_spill] sm:$0xff] %v4979_v11 }
 0x447   : > { %v1657_v8 = vpop.f32.mrf.mxu1  ;;  %v1595_v39 = vpop.f32.mrf.mxu0 }
 0x448   : > { %v5051_v55 = vadd.f32 %v1657_v8, %v1592_v29 }
 0x44a   : > { %v1710_v47 = vpop.f32.mrf.mxu2  ;;  %v1775_v45 = vpop.f32.mrf.mxu3  ;;  %vm1831_vm15 = vcmp.ne.f32.partialorder %v5051_v55, 0.0 }
 0x44b   : > { %v4984_v43 = vadd.f32 %v1775_v45, %v1710_v47  ;;  %v5062_v0 = vsel %vm1831_vm15, %v5051_v55, -1e+30 }
 0x44d   : > { %vm1824_vm0 = vcmp.ne.f32.partialorder %v4984_v43, 0.0 }
 0x44e   : > { %v4995_v46 = vsel %vm1824_vm0, %v4984_v43, -1e+30 }
 0x44f   : > { %v1887_v22 = vmax.f32 %v4990_v1, %v4995_v46  ;;  %v1660_v16 = vpop.f32.mrf.mxu1 }
 0x450   : > { %v5069_v47 = vadd.f32 %v1660_v16, %v1595_v39 }
 0x451   : > { %1888 = vmax.xlane.f32.xlu1 %v1887_v22  ;;  %v1598_v22 = vpop.f32.mrf.mxu0 }
 0x452   : > { %v1713_v37 = vpop.f32.mrf.mxu2  ;;  %v1778_v26 = vpop.f32.mrf.mxu3  ;;  %vm1833_vm6 = vcmp.ne.f32.partialorder %v5069_v47, 0.0 }
 0x453   : > { %v5001_v60 = vadd.f32 %v1778_v26, %v1713_v37 }
 0x455   : > { %vm1826_vm12 = vcmp.ne.f32.partialorder %v5001_v60, 0.0 }
 0x456   : > { %v5013_v10 = vsel %vm1826_vm12, %v5001_v60, -1e+30 }
 0x457   : > { %v1890_v52 = vmax.f32 %v5008_v24, %v5013_v10  ;;  %v1663_v37 = vpop.f32.mrf.mxu1 }
 0x459   : > { %1891 = vmax.xlane.f32.xlu2 %v1890_v52  ;;  %v5080_v52 = vsel %vm1833_vm6, %v5069_v47, -1e+30  ;;  %v1601_v8 = vpop.f32.mrf.mxu0 }
 0x45a   : > { %v1716_v58 = vpop.f32.mrf.mxu2  ;;  %v1781_v50 = vpop.f32.mrf.mxu3 }
 0x45b   : > { %v5020_v13 = vadd.f32 %v1781_v50, %v1716_v58  ;;  %v5087_v50 = vadd.f32 %v1663_v37, %v1598_v22 }
 0x45d   : > { %vm1828_vm11 = vcmp.ne.f32.partialorder %v5020_v13, 0.0  ;;  %vm1835_vm8 = vcmp.ne.f32.partialorder %v5087_v50, 0.0 }
 0x45e   : > { %v5031_v48 = vsel %vm1828_vm11, %v5020_v13, -1e+30  ;;  %v5098_v16 = vsel %vm1835_vm8, %v5087_v50, -1e+30 }
 0x45f   : > { %v1893_v5 = vmax.f32 %v5026_v38, %v5031_v48 }
 0x461   : > { %1894 = vmax.xlane.f32.xlu0 %v1893_v5  ;;  %v1666_v5 = vpop.f32.mrf.mxu1 }
 0x462   : > { %v1719_v31 = vpop.f32.mrf.mxu2  ;;  %v1784_v25 = vpop.f32.mrf.mxu3 }
 0x463   : > { %v5037_v62 = vadd.f32 %v1784_v25, %v1719_v31 }
 0x465   : > { %vm1830_vm14 = vcmp.ne.f32.partialorder %v5037_v62, 0.0 }
 0x466   : > { %v5049_v41 = vsel %vm1830_vm14, %v5037_v62, -1e+30 }
 0x467   : > { %v1896_v59 = vmax.f32 %v5044_v51, %v5049_v41 }
 0x469   : > { %1897 = vmax.xlane.f32.xlu1 %v1896_v59 }
 0x46a   : > { %v1722_v33 = vpop.f32.mrf.mxu2  ;;  %v1787_v34 = vpop.f32.mrf.mxu3 }
 0x46b   : > { %v5056_v17 = vadd.f32 %v1787_v34, %v1722_v33  ;;  %v5105_v33 = vadd.f32 %v1666_v5, %v1601_v8 }
 0x46d   : > { %vm1832_vm5 = vcmp.ne.f32.partialorder %v5056_v17, 0.0  ;;  %vm6007_vm1 = vcmp.ne.f32.partialorder %v5105_v33, 0.0 }
 0x46e   : > { %v5067_v18 = vsel %vm1832_vm5, %v5056_v17, -1e+30 }
 0x46f   : > { %v1899_v45 = vmax.f32 %v5062_v0, %v5067_v18 }
 0x471   : > { %1900 = vmax.xlane.f32.xlu2 %v1899_v45 }
 0x472   : > { %v1725_v26 = vpop.f32.mrf.mxu2  ;;  %v1790_v9 = vpop.f32.mrf.mxu3 }
 0x473   : > { %v5073_v20 = vadd.f32 %v1790_v9, %v1725_v26  ;;  %v1604_v26 = vpop.f32.mrf.mxu0  ;;  %v1669_v9 = vpop.f32.mrf.mxu1 }
 0x474   : > { %v5123_v5 = vadd.f32 %v1669_v9, %v1604_v26 }
 0x475   : > { %vm1834_vm7 = vcmp.ne.f32.partialorder %v5073_v20, 0.0 }
 0x476   : > { %v5085_v58 = vsel %vm1834_vm7, %v5073_v20, -1e+30 }
 0x477   : > { %v1902_v29 = vmax.f32 %v5080_v52, %v5085_v58 }
 0x479   : > { %1903 = vmax.xlane.f32.xlu0 %v1902_v29  ;;  %v5116_v29 = vsel %vm6007_vm1, %v5105_v33, -1e+30 }
 0x47a   : > { %v1728_v31 = vpop.f32.mrf.mxu2  ;;  %v1793_v25 = vpop.f32.mrf.mxu3 }
 0x47b   : > { %v5092_v39 = vadd.f32 %v1793_v25, %v1728_v31 }
 0x47d   : > { %vm6006_vm9 = vcmp.ne.f32.partialorder %v5092_v39, 0.0 }
 0x47e   : > { %v5103_v59 = vsel %vm6006_vm9, %v5092_v39, -1e+30  ;;  %vm1839_vm9 = vcmp.ne.f32.partialorder %v5123_v5, 0.0 }
 0x47f   : > { %v1905_v34 = vmax.f32 %v5098_v16, %v5103_v59 }
 0x481   : > { %1906 = vmax.xlane.f32.xlu1 %v1905_v34 }
 0x482   : > { %v1731_v45 = vpop.f32.mrf.mxu2  ;;  %v1796_v22 = vpop.f32.mrf.mxu3 }
 0x483   : > { %v5109_v37 = vadd.f32 %v1796_v22, %v1731_v45  ;;  %v5134_v22 = vsel %vm1839_vm9, %v5123_v5, -1e+30 }
 0x485   : > { %vm1838_vm3 = vcmp.ne.f32.partialorder %v5109_v37, 0.0 }
 0x486   : > { %v5121_v8 = vsel %vm1838_vm3, %v5109_v37, -1e+30 }
 0x487   : > { %v1908_v31 = vmax.f32 %v5116_v29, %v5121_v8 }
 0x489   : > { %1909 = vmax.xlane.f32.xlu2 %v1908_v31 }
 0x48a   : > { %v1734_v25 = vpop.f32.mrf.mxu2  ;;  %v1799_v34 = vpop.f32.mrf.mxu3 }
 0x48b   : > { %v5128_v45 = vadd.f32 %v1799_v34, %v1734_v25  ;;  %v1607_v25 = vpop.f32.mrf.mxu0  ;;  %v1672_v34 = vpop.f32.mrf.mxu1 }
 0x48d   : > { %vm6016_vm1 = vcmp.ne.f32.partialorder %v5128_v45, 0.0 }
 0x48e   : > { %v5139_v26 = vsel %vm6016_vm1, %v5128_v45, -1e+30 }
 0x48f   : > { %v1911_v9 = vmax.f32 %v5134_v22, %v5139_v26 }
 0x491   : > { %1912 = vmax.xlane.f32.xlu2 %v1911_v9 }
 0x492   : > { %v1737_v31 = vpop.f32.mrf.mxu2  ;;  %v1802_v11 = vpop.f32.mrf.mxu3 }
 0x493   : > { %v1610_v54 = vpop.f32.mrf.mxu0  ;;  %v1675_v53 = vpop.f32.mrf.mxu1 }
 0x49a   : > { %v1740_v6 = vpop.f32.mrf.mxu2  ;;  %v1805_v21 = vpop.f32.mrf.mxu3 }
 0x49b   : > { %v1678_v12 = vpop.f32.mrf.mxu1 }
 0x4c4   : > { %v1889_v35 = vpop.xlane.xlu1 %1888 }
 0x4c5   : > { %v1935_v19 = vsub.f32 %v4990_v1, %v1889_v35  ;;  %v1936_v14 = vsub.f32 %v4995_v46, %v1889_v35  ;;  %v5147_v1 = vadd.f32 %v1802_v11, %v1737_v31  ;;  %v5157_v35 = vadd.f32 %v1672_v34, %v1607_v25  ;;  %v1613_v11 = vpop.f32.mrf.mxu0 }
 0x4c6   : > { %v5185_v25 = vadd.f32 %v1675_v53, %v1610_v54 }
 0x4c7   : > { %v1967_v61 = vmul.f32 1.442695, %v1935_v19  ;;  %v1969_v7 = vmul.f32 1.442695, %v1936_v14  ;;  %vm1842_vm1 = vcmp.ne.f32.partialorder %v5147_v1, 0.0  ;;  %v1743_v19 = vpop.f32.mrf.mxu2 }
 0x4c8   : > { %v5168_v46 = vsel %vm1842_vm1, %v5147_v1, -1e+30 }
 0x4c9   : > { %2959 = vpow2.f32 %v1967_v61  ;;  %v1808_v61 = vpop.f32.mrf.mxu3 }
 0x4ca   : > { %2961 = vpow2.f32 %v1969_v7 }
 0x4cc   : > { %v1892_v32 = vpop.xlane.xlu2 %1891 }
 0x4cd   : > { %v1937_v9 = vsub.f32 %v5008_v24, %v1892_v32  ;;  %v1938_v3 = vsub.f32 %v5013_v10, %v1892_v32  ;;  %v5170_v10 = vadd.f32 %v1805_v21, %v1740_v6 }
 0x4cf   : > { %v2960_v57 = vpop.eup %2959  ;;  %v1971_v49 = vmul.f32 1.442695, %v1937_v9  ;;  %v1973_v30 = vmul.f32 1.442695, %v1938_v3  ;;  %v1746_v54 = vpop.f32.mrf.mxu2 }
 0x4d0   : > { %v2962_v63 = vpop.eup %2961  ;;  %v5151_v14 = vsel %vm1823_vm2, %v2960_v57, 0.0  ;;  %vm1841_vm2 = vcmp.ne.f32.partialorder %v5157_v35, 0.0 }
 0x4d1   : > { %2963 = vpow2.f32 %v1971_v49  ;;  %v5155_v7 = vsel %vm1824_vm0, %v2962_v63, 0.0  ;;  %v5183_v31 = vsel %vm1841_vm2, %v5157_v35, -1e+30  ;;  %vm1844_vm0 = vcmp.ne.f32.partialorder %v5170_v10, 0.0  ;;  %v1811_v9 = vpop.f32.mrf.mxu3 }
 0x4d2   : > { %2965 = vpow2.f32 %v1973_v30  ;;  %v2063_v32 = vadd.f32 %v5155_v7, %v5151_v14  ;;  %v1914_v6 = vmax.f32 %v5183_v31, %v5168_v46 }
 0x4d4   : > { %2064 = vadd.xlane.f32.xlu0 %v2063_v32  ;;  %v1895_v3 = vpop.xlane.xlu0 %1894 }
 0x4d5   : > { %v1939_v57 = vsub.f32 %v5026_v38, %v1895_v3  ;;  %v1940_v49 = vsub.f32 %v5031_v48, %v1895_v3 }
 0x4d7   : > { %v2964_v63 = vpop.eup %2963  ;;  %v1975_v43 = vmul.f32 1.442695, %v1939_v57  ;;  %v1977_v30 = vmul.f32 1.442695, %v1940_v49  ;;  %v5198_v57 = vsel %vm1844_vm0, %v5170_v10, -1e+30 }
 0x4d8   : > { %v2966_v24 = vpop.eup %2965  ;;  %v5174_v38 = vsel %vm1825_vm4, %v2964_v63, 0.0  ;;  %vm1843_vm4 = vcmp.ne.f32.partialorder %v5185_v25, 0.0  ;;  %v5200_v63 = vadd.f32 %v1808_v61, %v1743_v19 }
 0x4d9   : > { %2967 = vpow2.f32 %v1975_v43  ;;  %v5178_v48 = vsel %vm1826_vm12, %v2966_v24, 0.0  ;;  %v1681_v43 = vpop.f32.mrf.mxu1  ;;  %v5213_v24 = vsel %vm1843_vm4, %v5185_v25, -1e+30 }
 0x4da   : > { %2969 = vpow2.f32 %v1977_v30  ;;  %v2066_v21 = vadd.f32 %v5178_v48, %v5174_v38  ;;  %v1917_v19 = vmax.f32 %v5213_v24, %v5198_v57  ;;  %vm1846_vm12 = vcmp.ne.f32.partialorder %v5200_v63, 0.0 }
 0x4dc   : > { %2067 = vadd.xlane.f32.xlu1 %v2066_v21  ;;  %1915 = vmax.xlane.f32.xlu0 %v1914_v6  ;;  %v1898_v40 = vpop.xlane.xlu1 %1897  ;;  %v5215_v21 = vadd.f32 %v1678_v12, %v1613_v11 }
 0x4dd   : > { %v1941_v60 = vsub.f32 %v5044_v51, %v1898_v40  ;;  %v1942_v34 = vsub.f32 %v5049_v41, %v1898_v40  ;;  %v1616_v41 = vpop.f32.mrf.mxu0 }
 0x4df   : > { %v2968_v53 = vpop.eup %2967  ;;  %v1979_v32 = vmul.f32 1.442695, %v1941_v60  ;;  %v1981_v3 = vmul.f32 1.442695, %v1942_v34  ;;  %v5228_v60 = vsel %vm1846_vm12, %v5200_v63, -1e+30 }
 0x4e0   : > { %v2970_v49 = vpop.eup %2969  ;;  %v5204_v51 = vsel %vm1827_vm10, %v2968_v53, 0.0  ;;  %vm1845_vm10 = vcmp.ne.f32.partialorder %v5215_v21, 0.0  ;;  %v5230_v53 = vadd.f32 %v1811_v9, %v1746_v54 }
 0x4e1   : > { %2971 = vpow2.f32 %v1979_v32  ;;  %v5208_v30 = vsel %vm1828_vm11, %v2970_v49, 0.0  ;;  %v5243_v49 = vsel %vm1845_vm10, %v5215_v21, -1e+30 }
 0x4e2   : > { %2973 = vpow2.f32 %v1981_v3  ;;  %v2069_v23 = vadd.f32 %v5208_v30, %v5204_v51  ;;  %v1814_v3 = vpop.f32.mrf.mxu3  ;;  %v1920_v54 = vmax.f32 %v5243_v49, %v5228_v60  ;;  %vm1848_vm11 = vcmp.ne.f32.partialorder %v5230_v53, 0.0 }
 0x4e4   : > { %2070 = vadd.xlane.f32.xlu1 %v2069_v23  ;;  %1918 = vmax.xlane.f32.xlu0 %v1917_v19  ;;  %v1901_v13 = vpop.xlane.xlu2 %1900  ;;  %v5245_v23 = vadd.f32 %v1681_v43, %v1616_v41  ;;  %v1684_v19 = vpop.f32.mrf.mxu1 }
 0x4e5   : > { %v1943_v61 = vsub.f32 %v5062_v0, %v1901_v13  ;;  %v1944_v6 = vsub.f32 %v5067_v18, %v1901_v13  ;;  %v1749_v0 = vpop.f32.mrf.mxu2  ;;  %v1619_v9 = vpop.f32.mrf.mxu0 }
 0x4e7   : > { %v2972_v11 = vpop.eup %2971  ;;  %v1983_v12 = vmul.f32 1.442695, %v1943_v61  ;;  %v1985_v40 = vmul.f32 1.442695, %v1944_v6 }
 0x4e8   : > { %v2974_v34 = vpop.eup %2973  ;;  %v5234_v32 = vsel %vm1829_vm13, %v2972_v11, 0.0  ;;  %vm1847_vm13 = vcmp.ne.f32.partialorder %v5245_v23, 0.0  ;;  %v5258_v11 = vsel %vm1848_vm11, %v5230_v53, -1e+30 }
 0x4e9   : > { %2975 = vpow2.f32 %v1983_v12  ;;  %v5238_v18 = vsel %vm1830_vm14, %v2974_v34, 0.0 }
 0x4ea   : > { %2977 = vpow2.f32 %v1985_v40  ;;  %v2072_v56 = vadd.f32 %v5238_v18, %v5234_v32  ;;  %v5260_v40 = vadd.f32 %v1814_v3, %v1749_v0 }
 0x4ec   : > { %2073 = vadd.xlane.f32.xlu2 %v2072_v56  ;;  %1921 = vmax.xlane.f32.xlu1 %v1920_v54  ;;  %v1904_v62 = vpop.xlane.xlu0 %1903  ;;  %v5275_v56 = vadd.f32 %v1684_v19, %v1619_v9  ;;  %v1817_v54 = vpop.f32.mrf.mxu3  ;;  %vm1850_vm14 = vcmp.ne.f32.partialorder %v5260_v40, 0.0 }
 0x4ed   : > { %v1945_v13 = vsub.f32 %v5080_v52, %v1904_v62  ;;  %v1946_v61 = vsub.f32 %v5085_v58, %v1904_v62  ;;  %v5273_v58 = vsel %vm1847_vm13, %v5245_v23, -1e+30  ;;  %v1752_v3 = vpop.f32.mrf.mxu2  ;;  %v1622_v62 = vpop.f32.mrf.mxu0 }
 0x4ee   : > { %v1923_v55 = vmax.f32 %v5273_v58, %v5258_v11 }
 0x4ef   : > { %v2976_v41 = vpop.eup %2975  ;;  %v1987_v43 = vmul.f32 1.442695, %v1945_v13  ;;  %v1989_v6 = vmul.f32 1.442695, %v1946_v61  ;;  %v1687_v13 = vpop.f32.mrf.mxu1 }
 0x4f0   : > { %v2978_v12 = vpop.eup %2977  ;;  %v5264_v34 = vsel %vm1831_vm15, %v2976_v41, 0.0  ;;  %vm1849_vm15 = vcmp.ne.f32.partialorder %v5275_v56, 0.0 }
 0x4f1   : > { %2979 = vpow2.f32 %v1987_v43  ;;  %v5268_v52 = vsel %vm1832_vm5, %v2978_v12, 0.0 }
 0x4f2   : > { %2981 = vpow2.f32 %v1989_v6  ;;  %v2075_v0 = vadd.f32 %v5268_v52, %v5264_v34  ;;  %v5288_v6 = vsel %vm1850_vm14, %v5260_v40, -1e+30 }
 0x4f4   : > { %2076 = vadd.xlane.f32.xlu2 %v2075_v0  ;;  %1924 = vmax.xlane.f32.xlu1 %v1923_v55  ;;  %v1907_v17 = vpop.xlane.xlu1 %1906  ;;  %v5290_v0 = vadd.f32 %v1817_v54, %v1752_v3 }
 0x4f5   : > { %v1947_v61 = vsub.f32 %v5098_v16, %v1907_v17  ;;  %v1948_v9 = vsub.f32 %v5103_v59, %v1907_v17  ;;  %v5303_v59 = vsel %vm1849_vm15, %v5275_v56, -1e+30  ;;  %v5305_v17 = vadd.f32 %v1687_v13, %v1622_v62  ;;  %v1755_v54 = vpop.f32.mrf.mxu2  ;;  %v1625_v13 = vpop.f32.mrf.mxu0 }
 0x4f6   : > { %v1926_v47 = vmax.f32 %v5303_v59, %v5288_v6  ;;  %vm6017_vm5 = vcmp.ne.f32.partialorder %v5290_v0, 0.0 }
 0x4f7   : > { %v2980_v19 = vpop.eup %2979  ;;  %v1991_v41 = vmul.f32 1.442695, %v1947_v61  ;;  %v1993_v43 = vmul.f32 1.442695, %v1948_v9  ;;  %v1820_v61 = vpop.f32.mrf.mxu3  ;;  %v5318_v42 = vsel %vm6017_vm5, %v5290_v0, -1e+30 }
 0x4f8   : > { %v2982_v12 = vpop.eup %2981  ;;  %v5294_v55 = vsel %vm1833_vm6, %v2980_v19, 0.0  ;;  %vm1851_vm6 = vcmp.ne.f32.partialorder %v5305_v17, 0.0  ;;  %vm6242_vm5 = vcmp.ne.f32.partialorder %v5105_v33, 0.0 }
 0x4f9   : > { %2983 = vpow2.f32 %v1991_v41  ;;  %v5298_v16 = vsel %vm1834_vm7, %v2982_v12, 0.0  ;;  %v1690_v41 = vpop.f32.mrf.mxu1  ;;  %vm6241_vm7 = vcmp.ne.f32.partialorder %v5092_v39, 0.0 }
 0x4fa   : > { %2985 = vpow2.f32 %v1993_v43  ;;  %v2078_v3 = vadd.f32 %v5298_v16, %v5294_v55 }
 0x4fc   : > { %2079 = vadd.xlane.f32.xlu0 %v2078_v3  ;;  %1927 = vmax.xlane.f32.xlu2 %v1926_v47  ;;  %v1910_v20 = vpop.xlane.xlu2 %1909  ;;  %v5320_v47 = vadd.f32 %v1820_v61, %v1755_v54 }
 0x4fd   : > { %v1949_v9 = vsub.f32 %v5116_v29, %v1910_v20  ;;  %v1950_v19 = vsub.f32 %v5121_v8, %v1910_v20  ;;  %v5333_v20 = vsel %vm1851_vm6, %v5305_v17, -1e+30 }
 0x4fe   : > { %v1929_v50 = vmax.f32 %v5333_v20, %v5318_v42 }
 0x4ff   : > { %v2984_v62 = vpop.eup %2983  ;;  %v1995_v43 = vmul.f32 1.442695, %v1949_v9  ;;  %v1997_v12 = vmul.f32 1.442695, %v1950_v19  ;;  %v5335_v9 = vadd.f32 %v1690_v41, %v1625_v13 }
 0x500   : > { %v2986_v3 = vpop.eup %2985  ;;  %v5324_v29 = vsel %vm1835_vm8, %v2984_v62, 0.0  ;;  %vm6018_vm8 = vcmp.ne.f32.partialorder %v5320_v47, 0.0 }
 0x501   : > { %2987 = vpow2.f32 %v1995_v43  ;;  %v5328_v8 = vsel %vm6241_vm7, %v2986_v3, 0.0  ;;  %vm1853_vm7 = vcmp.ne.f32.partialorder %v5335_v9, 0.0  ;;  %v5348_v43 = vsel %vm6018_vm8, %v5320_v47, -1e+30 }
 0x502   : > { %2989 = vpow2.f32 %v1997_v12  ;;  %v2081_v54 = vadd.f32 %v5328_v8, %v5324_v29 }
 0x504   : > { %2082 = vadd.xlane.f32.xlu0 %v2081_v54  ;;  %1930 = vmax.xlane.f32.xlu2 %v1929_v50  ;;  %v1913_v39 = vpop.xlane.xlu2 %1912 }
 0x505   : > { %v1951_v61 = vsub.f32 %v5134_v22, %v1913_v39  ;;  %v1952_v19 = vsub.f32 %v5139_v26, %v1913_v39  ;;  %v5361_v26 = vsel %vm1853_vm7, %v5335_v9, -1e+30  ;;  %v6250_v9 = vld [vmem:[#allocation13_spill] sm:$0xff] }
 0x506   : > { %v1932_v50 = vmax.f32 %v5361_v26, %v5348_v43 }
 0x507   : > { %v2988_v62 = vpop.eup %2987  ;;  %v1999_v13 = vmul.f32 1.442695, %v1951_v61  ;;  %v2001_v41 = vmul.f32 1.442695, %v1952_v19 }
 0x508   : > { %v2990_v12 = vpop.eup %2989  ;;  %v5352_v3 = vsel %vm6242_vm5, %v2988_v62, 0.0 }
 0x509   : > { %2991 = vpow2.f32 %v1999_v13  ;;  %v5356_v22 = vsel %vm1838_vm3, %v2990_v12, 0.0  ;;  %vm6244_vm3 = vcmp.ne.f32.partialorder %v5128_v45, 0.0 }
 0x50a   : > { %2993 = vpow2.f32 %v2001_v41  ;;  %v2084_v54 = vadd.f32 %v5356_v22, %v5352_v3 }
 0x50c   : > { %2085 = vadd.xlane.f32.xlu1 %v2084_v54  ;;  %1933 = vmax.xlane.f32.xlu0 %v1932_v50 }
 0x50f   : > { %v2992_v33 = vpop.eup %2991 }
 0x510   : > { %v2994_v39 = vpop.eup %2993  ;;  %v5369_v37 = vsel %vm1839_vm9, %v2992_v33, 0.0 }
 0x511   : > { %6243 = vst [vmem:[#allocation54_spill] sm:$0xff] %v5369_v37  ;;  %v5373_v61 = vsel %vm6244_vm3, %v2994_v39, 0.0 }
 0x512   : > { %6245 = vst [vmem:[#allocation55_spill] sm:$0xff] %v5373_v61  ;;  %v2087_v19 = vadd.f32 %v5373_v61, %v5369_v37 }
 0x514   : > { %2088 = vadd.xlane.f32.xlu1 %v2087_v19 }
 0x547   : > { %v2065_v62 = vpop.xlane.xlu0 %2064 }
 0x548   : > { %vm2111_vm5 = vcmp.gt.f32.partialorder %v2065_v62, 0.0 }
 0x549   : > { %v2127_v13 = vsel %vm2111_vm5, %v2065_v62, 1.0 }
 0x54a   : > { %2995 = vrcp.f32 %v2127_v13 }
 0x54f   : > { %v2068_v41 = vpop.xlane.xlu1 %2067  ;;  %v1916_v12 = vpop.xlane.xlu0 %1915 }
 0x550   : > { %vm2112_vm8 = vcmp.gt.f32.partialorder %v2068_v41, 0.0  ;;  %v1953_v54 = vsub.f32 %v5183_v31, %v1916_v12  ;;  %v1954_v5 = vsub.f32 %v5168_v46, %v1916_v12  ;;  %v2996_v39 = vpop.eup %2995 }
 0x551   : > { %v2128_v50 = vsel %vm2112_vm8, %v2068_v41, 1.0  ;;  %v2159_v13 = vmul.f32 %v2996_v39, %v5151_v14  ;;  %v2160_v31 = vmul.f32 %v2996_v39, %v5155_v7 }
 0x552   : > { %2997 = vrcp.f32 %v2128_v50  ;;  %v2003_v45 = vmul.f32 1.442695, %v1953_v54  ;;  %v2005_v33 = vmul.f32 1.442695, %v1954_v5 }
 0x554   : > { %2999 = vpow2.f32 %v2003_v45 }
 0x555   : > { %3001 = vpow2.f32 %v2005_v33 }
 0x557   : > { %v2071_v61 = vpop.xlane.xlu1 %2070  ;;  %v1919_v19 = vpop.xlane.xlu0 %1918 }
 0x558   : > { %v2998_v37 = vpop.eup %2997  ;;  %v1955_v62 = vsub.f32 %v5213_v24, %v1919_v19  ;;  %v1956_v36 = vsub.f32 %v5198_v57, %v1919_v19  ;;  %vm2113_vm9 = vcmp.gt.f32.partialorder %v2071_v61, 0.0 }
 0x559   : > { %v2161_v46 = vmul.f32 %v2998_v37, %v5174_v38  ;;  %v2162_v41 = vmul.f32 %v2998_v37, %v5178_v48  ;;  %v2129_v7 = vsel %vm2113_vm9, %v2071_v61, 1.0  ;;  %vm2529_vm9 = vcmask 261120  }
 0x55a   : > { %v3000_v12 = vpop.eup %2999  ;;  %v2007_v54 = vmul.f32 1.442695, %v1955_v62  ;;  %v2009_v5 = vmul.f32 1.442695, %v1956_v36 }
 0x55b   : > { %v3002_v50 = vpop.eup %3001  ;;  %v2191_v45 = vpack.c.bf16 %v2161_v46, %v2159_v13  ;;  %v2192_v33 = vpack.c.bf16 %v2162_v41, %v2160_v31  ;;  %v5387_v24 = vsel %vm1841_vm2, %v3000_v12, 0.0 }
 0x55c   : > { %3003 = vpow2.f32 %v2007_v54  ;;  %v5391_v14 = vsel %vm1842_vm1, %v3002_v50, 0.0 }
 0x55d   : > { %3005 = vpow2.f32 %v2009_v5  ;;  %2215 = vmatmul.bf16.vlgmr.msrb.gmra.mxu0 %v2191_v45  ;;  %2264 = vmatmul.bf16.vlgmr.msrb.gmra.mxu1 %v2192_v33  ;;  %v2090_v38 = vadd.f32 %v5391_v14, %v5387_v24 }
 0x55e   : > { %3007 = vrcp.f32 %v2129_v7 }
 0x55f   : > { %2091 = vadd.xlane.f32.xlu2 %v2090_v38  ;;  %v2074_v36 = vpop.xlane.xlu2 %2073  ;;  %v1922_v48 = vpop.xlane.xlu1 %1921 }
 0x560   : > { %vm2114_vm8 = vcmp.gt.f32.partialorder %v2074_v36, 0.0  ;;  %v1957_v35 = vsub.f32 %v5243_v49, %v1922_v48  ;;  %v1958_v57 = vsub.f32 %v5228_v60, %v1922_v48 }
 0x561   : > { %v2130_v37 = vsel %vm2114_vm8, %v2074_v36, 1.0  ;;  %vm2563_vm8 = vcmask 785408  }
 0x562   : > { %v3004_v1 = vpop.eup %3003  ;;  %3009 = vrcp.f32 %v2130_v37  ;;  %v2011_v39 = vmul.f32 1.442695, %v1957_v35  ;;  %v2013_v61 = vmul.f32 1.442695, %v1958_v57 }
 0x563   : > { %v3006_v19 = vpop.eup %3005  ;;  %v5399_v62 = vsel %vm1843_vm4, %v3004_v1, 0.0 }
 0x564   : > { %3011 = vpow2.f32 %v2011_v39  ;;  %v5403_v13 = vsel %vm1844_vm0, %v3006_v19, 0.0  ;;  %v3008_v60 = vpop.eup %3007 }
 0x565   : > { %3013 = vpow2.f32 %v2013_v61  ;;  %v2093_v49 = vadd.f32 %v5403_v13, %v5399_v62  ;;  %v2163_v54 = vmul.f32 %v3008_v60, %v5204_v51  ;;  %v2164_v10 = vmul.f32 %v3008_v60, %v5208_v30 }
 0x567   : > { %2094 = vadd.xlane.f32.xlu0 %v2093_v49  ;;  %v2077_v31 = vpop.xlane.xlu2 %2076  ;;  %v1925_v46 = vpop.xlane.xlu1 %1924 }
 0x568   : > { %v3010_v41 = vpop.eup %3009  ;;  %v1959_v12 = vsub.f32 %v5273_v58, %v1925_v46  ;;  %v1960_v25 = vsub.f32 %v5258_v11, %v1925_v46  ;;  %vm2115_vm1 = vcmp.gt.f32.partialorder %v2077_v31, 0.0 }
 0x569   : > { %v2165_v5 = vmul.f32 %v3010_v41, %v5234_v32  ;;  %v2166_v50 = vmul.f32 %v3010_v41, %v5238_v18  ;;  %v2131_v32 = vsel %vm2115_vm1, %v2077_v31, 1.0  ;;  %vm2546_vm1 = vcmask 523264  }
 0x56a   : > { %v3012_v45 = vpop.eup %3011  ;;  %v2015_v33 = vmul.f32 1.442695, %v1959_v12  ;;  %v2017_v7 = vmul.f32 1.442695, %v1960_v25 }
 0x56b   : > { %v3014_v38 = vpop.eup %3013  ;;  %v2193_v36 = vpack.c.bf16 %v2165_v5, %v2163_v54  ;;  %v2194_v48 = vpack.c.bf16 %v2166_v50, %v2164_v10  ;;  %v5415_v58 = vsel %vm1845_vm10, %v3012_v45, 0.0  ;;  %vm6247_vm10 = vcmp.ne.f32.partialorder %v5320_v47, 0.0  ;;  %v6252_v47 = vld [vmem:[#allocation22_spill] sm:$0xff] }
 0x56c   : > { %3015 = vpow2.f32 %v2015_v33  ;;  %v5419_v51 = vsel %vm1846_vm12, %v3014_v38, 0.0  ;;  %vm6246_vm12 = vcmp.ne.f32.partialorder %v5290_v0, 0.0 }
 0x56d   : > { %3017 = vpow2.f32 %v2017_v7  ;;  %2220 = vmatmul.bf16.gmra.mxu0 %v2193_v36  ;;  %2269 = vmatmul.bf16.gmra.mxu1 %v2194_v48  ;;  %v2096_v30 = vadd.f32 %v5419_v51, %v5415_v58 }
 0x56e   : > { %3019 = vrcp.f32 %v2131_v32 }
 0x56f   : > { %2097 = vadd.xlane.f32.xlu1 %v2096_v30  ;;  %v2080_v18 = vpop.xlane.xlu0 %2079  ;;  %v1928_v11 = vpop.xlane.xlu2 %1927 }
 0x570   : > { %vm2116_vm2 = vcmp.gt.f32.partialorder %v2080_v18, 0.0  ;;  %v1961_v21 = vsub.f32 %v5303_v59, %v1928_v11  ;;  %v1962_v35 = vsub.f32 %v5288_v6, %v1928_v11 }
 0x571   : > { %v2132_v57 = vsel %vm2116_vm2, %v2080_v18, 1.0 }
 0x572   : > { %v3016_v63 = vpop.eup %3015  ;;  %3021 = vrcp.f32 %v2132_v57  ;;  %v2019_v37 = vmul.f32 1.442695, %v1961_v21  ;;  %v2021_v1 = vmul.f32 1.442695, %v1962_v35 }
 0x573   : > { %v3018_v39 = vpop.eup %3017  ;;  %v5427_v61 = vsel %vm1847_vm13, %v3016_v63, 0.0 }
 0x574   : > { %3023 = vpow2.f32 %v2019_v37  ;;  %v5431_v19 = vsel %vm1848_vm11, %v3018_v39, 0.0  ;;  %v3020_v6 = vpop.eup %3019 }
 0x575   : > { %3025 = vpow2.f32 %v2021_v1  ;;  %v2099_v59 = vadd.f32 %v5431_v19, %v5427_v61  ;;  %v2167_v41 = vmul.f32 %v3020_v6, %v5264_v34  ;;  %v2168_v53 = vmul.f32 %v3020_v6, %v5268_v52  ;;  %v6251_v6 = vld [vmem:[#allocation14_spill] sm:$0xff] }
 0x577   : > { %2100 = vadd.xlane.f32.xlu2 %v2099_v59  ;;  %v2083_v49 = vpop.xlane.xlu0 %2082  ;;  %v1931_v60 = vpop.xlane.xlu2 %1930 }
 0x578   : > { %v3022_v31 = vpop.eup %3021  ;;  %v1963_v46 = vsub.f32 %v5333_v20, %v1931_v60  ;;  %v1964_v23 = vsub.f32 %v5318_v42, %v1931_v60  ;;  %vm2117_vm0 = vcmp.gt.f32.partialorder %v2083_v49, 0.0  ;;  %v6253_v60 = vld [vmem:[#allocation11_spill] sm:$0xff] }
 0x579   : > { %v2169_v12 = vmul.f32 %v3022_v31, %v5294_v55  ;;  %v2170_v25 = vmul.f32 %v3022_v31, %v5298_v16  ;;  %v2133_v34 = vsel %vm2117_vm0, %v2083_v49, 1.0  ;;  %v5485_v49 = vadd.f32 %v6251_v6, %v6250_v9 }
 0x57a   : > { %v3024_v54 = vpop.eup %3023  ;;  %v2023_v5 = vmul.f32 1.442695, %v1963_v46  ;;  %v2025_v10 = vmul.f32 1.442695, %v1964_v23  ;;  %v5491_v31 = vadd.f32 %v6253_v60, %v6252_v47  ;;  %v6254_v46 = vld [vmem:[#allocation24_spill] sm:$0xff]  ;;  %v6255_v23 = vld [vmem:[#allocation25_spill] sm:$0xff] }
 0x57b   : > { %v3026_v50 = vpop.eup %3025  ;;  %v2195_v45 = vpack.c.bf16 %v2169_v12, %v2167_v41  ;;  %v2196_v33 = vpack.c.bf16 %v2170_v25, %v2168_v53  ;;  %v5443_v20 = vsel %vm1849_vm15, %v3024_v54, 0.0  ;;  %v5497_v41 = vadd.f32 %v6255_v23, %v6254_v46  ;;  %v6256_v12 = vld [vmem:[#allocation8_spill] sm:$0xff]  ;;  %v6257_v53 = vld [vmem:[#allocation9_spill] sm:$0xff]  ;;  %v6258_v54 = vld [vmem:[#allocation18_spill] sm:$0xff] }
 0x57c   : > { %3027 = vpow2.f32 %v2023_v5  ;;  %v5447_v42 = vsel %vm1850_vm14, %v3026_v50, 0.0  ;;  %v5503_v25 = vadd.f32 %v6257_v53, %v6256_v12  ;;  %v6259_v5 = vld [vmem:[#allocation19_spill] sm:$0xff]  ;;  %v6260_v50 = vld [vmem:[#allocation33_spill] sm:$0xff]  ;;  %v6281_v47 = vld [vmem:[#allocation52_spill] sm:$0xff] }
 0x57d   : > { %3029 = vpow2.f32 %v2025_v10  ;;  %2225 = vmatmul.bf16.gmra.mxu0 %v2195_v45  ;;  %2274 = vmatmul.bf16.gmra.mxu1 %v2196_v33  ;;  %v2102_v52 = vadd.f32 %v5447_v42, %v5443_v20  ;;  %v5507_v10 = vadd.f32 %v6259_v5, %v6258_v54  ;;  %v6261_v45 = vld [vmem:[#allocation34_spill] sm:$0xff]  ;;  %v6282_v60 = vld [vmem:[#allocation53_spill] sm:$0xff]  ;;  %v6283_v23 = vld [vmem:[#allocation39_spill] sm:$0xff] }
 0x57e   : > { %3031 = vrcp.f32 %v2133_v34  ;;  %v5515_v33 = vadd.f32 %v6261_v45, %v6260_v50  ;;  %v6262_v34 = vld [vmem:[#allocation46_spill] sm:$0xff]  ;;  %v5591_v46 = vadd.f32 %v6282_v60, %v6281_v47  ;;  %v6292_v47 = vld [vmem:[#allocation40_spill] sm:$0xff] }
 0x57f   : > { %2103 = vadd.xlane.f32.xlu0 %v2102_v52  ;;  %v2086_v55 = vpop.xlane.xlu1 %2085  ;;  %v1934_v16 = vpop.xlane.xlu0 %1933  ;;  %v6263_v52 = vld [vmem:[#allocation16_spill] sm:$0xff]  ;;  %v6284_v12 = vld [vmem:[#allocation38_spill] sm:$0xff] }
 0x580   : > { %vm2118_vm4 = vcmp.gt.f32.partialorder %v2086_v55, 0.0  ;;  %v1965_v56 = vsub.f32 %v5361_v26, %v1934_v16  ;;  %v1966_v7 = vsub.f32 %v5348_v43, %v1934_v16  ;;  %v6264_v16 = vld [vmem:[#allocation21_spill] sm:$0xff]  ;;  %v5595_v53 = vadd.f32 %v6284_v12, %v6283_v23  ;;  %v6293_v23 = vld [vmem:[#allocation44_spill] sm:$0xff] }
 0x581   : > { %v2134_v38 = vsel %vm2118_vm4, %v2086_v55, 1.0  ;;  %v5521_v55 = vadd.f32 %v6263_v52, %v6262_v34  ;;  %v6285_v52 = vld [vmem:[#allocation42_spill] sm:$0xff] }
 0x582   : > { %v3028_v40 = vpop.eup %3027  ;;  %3033 = vrcp.f32 %v2134_v38  ;;  %v2027_v36 = vmul.f32 1.442695, %v1965_v56  ;;  %v2029_v48 = vmul.f32 1.442695, %v1966_v7  ;;  %v6265_v56 = vld [vmem:[#allocation17_spill] sm:$0xff]  ;;  %v6266_v7 = vld [vmem:[#allocation27_spill] sm:$0xff] }
 0x583   : > { %v3030_v32 = vpop.eup %3029  ;;  %v5455_v30 = vsel %vm1851_vm6, %v3028_v40, 0.0  ;;  %v6267_v38 = vld [vmem:[#allocation28_spill] sm:$0xff] }
 0x584   : > { %3035 = vpow2.f32 %v2027_v36  ;;  %v5459_v18 = vsel %vm6246_vm12, %v3030_v32, 0.0  ;;  %v3032_v43 = vpop.eup %3031  ;;  %v5531_v40 = vadd.f32 %v6267_v38, %v6266_v7  ;;  %v6268_v36 = vld [vmem:[#allocation15_spill] sm:$0xff]  ;;  %v6286_v7 = vld [vmem:[#allocation54_spill] sm:$0xff] }
 0x585   : > { %3037 = vpow2.f32 %v2029_v48  ;;  %v2105_v26 = vadd.f32 %v5459_v18, %v5455_v30  ;;  %v2171_v21 = vmul.f32 %v3032_v43, %v5324_v29  ;;  %v2172_v17 = vmul.f32 %v3032_v43, %v5328_v8  ;;  %v6248_v8 = vld [vmem:[#allocation30_spill] sm:$0xff]  ;;  %v6269_v48 = vld [vmem:[#allocation45_spill] sm:$0xff]  ;;  %v6271_v43 = vld [vmem:[#allocation31_spill] sm:$0xff] }
 0x586   : > { %v5535_v32 = vadd.f32 %v6269_v48, %v6268_v36  ;;  %v6287_v48 = vld [vmem:[#allocation55_spill] sm:$0xff] }
 0x587   : > { %2106 = vadd.xlane.f32.xlu1 %v2105_v26  ;;  %v6270_v26 = vld [vmem:[#allocation29_spill] sm:$0xff] }
 0x588   : > { %v3034_v11 = vpop.eup %3033 }
 0x589   : > { %v2173_v35 = vmul.f32 %v3034_v11, %v5352_v3  ;;  %v2174_v57 = vmul.f32 %v3034_v11, %v5356_v22  ;;  %v6249_v3 = vld [vmem:[#allocation10_spill] sm:$0xff]  ;;  %v5543_v11 = vadd.f32 %v6271_v43, %v6270_v26 }
 0x58a   : > { %v3036_v63 = vpop.eup %3035  ;;  %v5479_v22 = vadd.f32 %v6249_v3, %v6248_v8 }
 0x58b   : > { %v3038_v37 = vpop.eup %3037  ;;  %v2197_v0 = vpack.c.bf16 %v2173_v35, %v2171_v21  ;;  %v2198_v1 = vpack.c.bf16 %v2174_v57, %v2172_v17  ;;  %v5469_v39 = vsel %vm1853_vm7, %v3036_v63, 0.0  ;;  %v6272_v21 = vld [vmem:[#allocation12_spill] sm:$0xff]  ;;  %v6273_v35 = vld [vmem:[#allocation26_spill] sm:$0xff]  ;;  %v5553_v17 = vadd.f32 %v4915_v2, %v4913_v27  ;;  %v6275_v63 = vld [vmem:[#allocation23_spill] sm:$0xff]  ;;  %v2089_v2 = vpop.xlane.xlu1 %2088 }
 0x58c   : > { %v5473_v59 = vsel %vm6247_vm10, %v3038_v37, 0.0  ;;  %v6274_v57 = vld [vmem:[#allocation20_spill] sm:$0xff]  ;;  %v5571_v27 = vadd.f32 %v4933_v44, %v4931_v28  ;;  %vm2119_vm11 = vcmp.gt.f32.partialorder %v2089_v2, 0.0  ;;  %v6280_v44 = vld [vmem:[#allocation41_spill] sm:$0xff] }
 0x58d   : > { %2230 = vmatmul.bf16.gmra.mxu0 %v2197_v0  ;;  %2279 = vmatmul.bf16.gmra.mxu1 %v2198_v1  ;;  %v2108_v29 = vadd.f32 %v5473_v59, %v5469_v39  ;;  %v5559_v37 = vadd.f32 %v6275_v63, %v6274_v57  ;;  %v5563_v0 = vadd.f32 %v4907_v15, %v4905_v4  ;;  %v6276_v1 = vld [vmem:[#allocation50_spill] sm:$0xff]  ;;  %v6278_v4 = vld [vmem:[#allocation35_spill] sm:$0xff]  ;;  %v6279_v15 = vld [vmem:[#allocation32_spill] sm:$0xff]  ;;  %v2135_v9 = vsel %vm2119_vm11, %v2089_v2, 1.0 }
 0x58e   : > { %v5581_v3 = vadd.f32 %v6279_v15, %v6278_v4  ;;  %3039 = vrcp.f32 %v2135_v9  ;;  %v6288_v57 = vld [vmem:[#allocation37_spill] sm:$0xff]  ;;  %v6289_v63 = vld [vmem:[#allocation36_spill] sm:$0xff]  ;;  %v6290_v15 = vld [vmem:[#allocation43_spill] sm:$0xff] }
 0x58f   : > { %2109 = vadd.xlane.f32.xlu2 %v2108_v29  ;;  %v6277_v29 = vld [vmem:[#allocation51_spill] sm:$0xff]  ;;  %v5609_v2 = vadd.f32 %v6289_v63, %v6288_v57 }
 0x590   : > { %v5577_v8 = vadd.f32 %v6277_v29, %v6276_v1 }
 0x593   : > { %2353 = vrot.lane.b32.xlu0 %v5479_v22, %s3188_s3 }
 0x594   : > { %v3040_v54 = vpop.eup %3039 }
 0x595   : > { %v2175_v38 = vmul.f32 %v3040_v54, %v6286_v7  ;;  %v2176_v26 = vmul.f32 %v3040_v54, %v6287_v48 }
 0x59b   : > { %2359 = vrot.lane.b32.xlu0 %v5485_v49, %s3188_s3 }
 0x5a0   : > { %2355 = vrot.lane.b32.xlu1 %v5491_v31, %s3188_s3 }
 0x5a3   : > { %2365 = vrot.lane.b32.xlu0 %v5497_v41, %s3188_s3 }
 0x5a7   : > { %2357 = vrot.lane.b32.xlu2 %v5503_v25, %s3188_s3 }
 0x5a8   : > { %2363 = vrot.lane.b32.xlu1 %v5507_v10, %s3188_s3 }
 0x5ab   : > { %2371 = vrot.lane.b32.xlu0 %v5515_v33, %s3188_s3 }
 0x5af   : > { %2361 = vrot.lane.b32.xlu2 %v5521_v55, %s3188_s3 }
 0x5b0   : > { %2369 = vrot.lane.b32.xlu1 %v6264_v16, %s3188_s3 }
 0x5b3   : > { %2377 = vrot.lane.b32.xlu0 %v6265_v56, %s3188_s3 }
 0x5b7   : > { %2367 = vrot.lane.b32.xlu2 %v5531_v40, %s3188_s3 }
 0x5b8   : > { %2375 = vrot.lane.b32.xlu1 %v5535_v32, %s3188_s3 }
 0x5bb   : > { %2383 = vrot.lane.b32.xlu0 %v5543_v11, %s3188_s3 }
 0x5bf   : > { %2373 = vrot.lane.b32.xlu2 %v6272_v21, %s3188_s3 }
 0x5c0   : > { %2381 = vrot.lane.b32.xlu1 %v6273_v35, %s3188_s3 }
 0x5c3   : > { %2421 = vrot.lane.b32.xlu0 %v5553_v17, %s3189_s22 }
 0x5c7   : > { %2379 = vrot.lane.b32.xlu2 %v5559_v37, %s3188_s3 }
 0x5c8   : > { %2419 = vrot.lane.b32.xlu1 %v5563_v0, %s3189_s22 }
 0x5cb   : > { %2427 = vrot.lane.b32.xlu0 %v5571_v27, %s3189_s22 }
 0x5cf   : > { %2417 = vrot.lane.b32.xlu2 %v5577_v8, %s3189_s22 }
 0x5d0   : > { %2425 = vrot.lane.b32.xlu1 %v5581_v3, %s3189_s22 }
 0x5d2   : > { %v2092_v28 = vpop.xlane.xlu2 %2091 }
 0x5d3   : > { %vm2120_vm13 = vcmp.gt.f32.partialorder %v2092_v28, 0.0  ;;  %2433 = vrot.lane.b32.xlu0 %v6280_v44, %s3189_s22 }
 0x5d4   : > { %v2136_v6 = vsel %vm2120_vm13, %v2092_v28, 1.0  ;;  %v6291_v28 = vld [vmem:[#allocation49_spill] sm:$0xff] }
 0x5d5   : > { %3041 = vrcp.f32 %v2136_v6 }
 0x5d7   : > { %2423 = vrot.lane.b32.xlu2 %v5591_v46, %s3189_s22 }
 0x5d8   : > { %2431 = vrot.lane.b32.xlu1 %v5595_v53, %s3189_s22 }
 0x5da   : > { %v2095_v5 = vpop.xlane.xlu0 %2094  ;;  %v2216_v50 = vpop.f32.mrf.mxu0 }
 0x5db   : > { %v3042_v45 = vpop.eup %3041  ;;  %v2265_v34 = vpop.f32.mrf.mxu1  ;;  %2439 = vrot.lane.b32.xlu0 %v6285_v52, %s3189_s22  ;;  %vm2121_vm14 = vcmp.gt.f32.partialorder %v2095_v5, 0.0 }
 0x5dc   : > { %v2177_v36 = vmul.f32 %v3042_v45, %v5387_v24  ;;  %v2178_v43 = vmul.f32 %v3042_v45, %v5391_v14  ;;  %v2137_v4 = vsel %vm2121_vm14, %v2095_v5, 1.0 }
 0x5dd   : > { %3043 = vrcp.f32 %v2137_v4 }
 0x5de   : > { %v2199_v1 = vpack.c.bf16 %v2177_v36, %v2175_v38  ;;  %v2200_v29 = vpack.c.bf16 %v2178_v43, %v2176_v26  ;;  %v2266_v43 = vadd.f32 %v2265_v34, %v2216_v50  ;;  %v6295_v50 = vld [vmem:[#allocation48_spill] sm:$0xff] }
 0x5df   : > { %2429 = vrot.lane.b32.xlu2 %v5609_v2, %s3189_s22 }
 0x5e0   : > { %2437 = vrot.lane.b32.xlu1 %v6290_v15, %s3189_s22  ;;  %2235 = vmatmul.bf16.gmra.mxu0 %v2199_v1 }
 0x5e1   : > { %2284 = vmatmul.bf16.gmra.mxu1 %v2200_v29  ;;  %v6294_v29 = vld [vmem:[#allocation47_spill] sm:$0xff] }
 0x5e2   : > { %v2098_v24 = vpop.xlane.xlu1 %2097  ;;  %v2218_v9 = vpop.f32.mrf.mxu0 }
 0x5e3   : > { %vm2122_vm15 = vcmp.gt.f32.partialorder %v2098_v24, 0.0  ;;  %v2267_v14 = vpop.f32.mrf.mxu1  ;;  %2445 = vrot.lane.b32.xlu0 %v6291_v28, %s3189_s22  ;;  %v3044_v60 = vpop.eup %3043 }
 0x5e4   : > { %v2138_v6 = vsel %vm2122_vm15, %v2098_v24, 1.0  ;;  %v5621_v12 = vadd.f32 %v2267_v14, %v2218_v9  ;;  %v2179_v38 = vmul.f32 %v3044_v60, %v5399_v62  ;;  %v2180_v48 = vmul.f32 %v3044_v60, %v5403_v13  ;;  %v227_v24 = vld [vmem:[%s5636_s26] sm:$0xff] }
 0x5e5   : > { %3045 = vrcp.f32 %v2138_v6  ;;  %v789_v60 = vadd.f32 %v5479_v22, %v227_v24 }
 0x5e7   : > { %2435 = vrot.lane.b32.xlu2 %v6292_v47, %s3189_s22 }
 0x5e8   : > { %2443 = vrot.lane.b32.xlu1 %v6293_v23, %s3189_s22 }
 0x5ea   : > { %v2101_v54 = vpop.xlane.xlu2 %2100  ;;  %v2221_v5 = vpop.f32.mrf.mxu0 }
 0x5eb   : > { %v3046_v45 = vpop.eup %3045  ;;  %v2270_v7 = vpop.f32.mrf.mxu1  ;;  %2483 = vrot.lane.b32.xlu0 %v5621_v12, %s3190_s23  ;;  %vm2123_vm6 = vcmp.gt.f32.partialorder %v2101_v54, 0.0 }
 0x5ec   : > { %v2181_v36 = vmul.f32 %v3046_v45, %v5415_v58  ;;  %v2182_v26 = vmul.f32 %v3046_v45, %v5419_v51  ;;  %v2139_v1 = vsel %vm2123_vm6, %v2101_v54, 1.0 }
 0x5ed   : > { %3047 = vrcp.f32 %v2139_v1  ;;  %v1547_v1 = vadd.f32 %v5577_v8, %v789_v60 }
 0x5ee   : > { %v2201_v57 = vpack.c.bf16 %v2181_v36, %v2179_v38  ;;  %v2202_v63 = vpack.c.bf16 %v2182_v26, %v2180_v48 }
 0x5ef   : > { %2441 = vrot.lane.b32.xlu2 %v6294_v29, %s3189_s22 }
 0x5f0   : > { %2481 = vrot.lane.b32.xlu1 %v2266_v43, %s3190_s23  ;;  %2240 = vmatmul.bf16.gmra.mxu0 %v2201_v57  ;;  %v2271_v57 = vadd.f32 %v2270_v7, %v2221_v5 }
 0x5f1   : > { %2289 = vmatmul.bf16.gmra.mxu1 %v2202_v63  ;;  %v229_v63 = vld [vmem:[%s5636_s26 + $0x10] sm:$0xff] }
 0x5f2   : > { %v2104_v62 = vpop.xlane.xlu0 %2103  ;;  %v2223_v4 = vpop.f32.mrf.mxu0 }
 0x5f3   : > { %vm2124_vm7 = vcmp.gt.f32.partialorder %v2104_v62, 0.0  ;;  %v2272_v58 = vpop.f32.mrf.mxu1  ;;  %v3048_v34 = vpop.eup %3047 }
 0x5f4   : > { %v2140_v13 = vsel %vm2124_vm7, %v2104_v62, 1.0  ;;  %v2273_v51 = vadd.f32 %v2272_v58, %v2223_v4  ;;  %v2183_v45 = vmul.f32 %v3048_v34, %v5427_v61  ;;  %v2184_v38 = vmul.f32 %v3048_v34, %v5431_v19  ;;  %v230_v61 = vld [vmem:[%s5636_s26 + $0x18] sm:$0xff] }
 0x5f5   : > { %3049 = vrcp.f32 %v2140_v13  ;;  %v2305_v19 = vadd.f32 %v2266_v43, %v1547_v1  ;;  %v791_v58 = vadd.f32 %v5503_v25, %v229_v63  ;;  %v792_v8 = vadd.f32 %v5485_v49, %v230_v61  ;;  %v228_v43 = vld [vmem:[%s5636_s26 + $0x8] sm:$0xff] }
 0x5f7   : > { %2447 = vrot.lane.b32.xlu2 %v6295_v50, %s3189_s22  ;;  %v1549_v5 = vadd.f32 %v5553_v17, %v791_v58  ;;  %v2321_v13 = vmul.f32 0.25, %v2305_v19 }
 0x5f8   : > { %2487 = vrot.lane.b32.xlu1 %v2273_v51, %s3190_s23 }
 0x5f9   : > { %v2307_v25 = vadd.f32 %v2271_v57, %v1549_v5 }
 0x5fa   : > { %v2107_v9 = vpop.xlane.xlu1 %2106  ;;  %v2226_v14 = vpop.f32.mrf.mxu0 }
 0x5fb   : > { %v3050_v6 = vpop.eup %3049  ;;  %v2275_v54 = vpop.f32.mrf.mxu1  ;;  %vm2125_vm3 = vcmp.gt.f32.partialorder %v2107_v9, 0.0 }
 0x5fc   : > { %v2276_v36 = vadd.f32 %v2275_v54, %v2226_v14  ;;  %v2185_v48 = vmul.f32 %v3050_v6, %v5443_v20  ;;  %v2186_v26 = vmul.f32 %v3050_v6, %v5447_v42  ;;  %v2141_v4 = vsel %vm2125_vm3, %v2107_v9, 1.0  ;;  %v231_v6 = vld [vmem:[%s5636_s26 + $0x20] sm:$0xff]  ;;  %v233_v54 = vld [vmem:[%s5636_s26 + $0x30] sm:$0xff] }
 0x5fd   : > { %3051 = vrcp.f32 %v2141_v4  ;;  %v1550_v9 = vadd.f32 %v5591_v46, %v792_v8 }
 0x5fe   : > { %2489 = vrot.lane.b32.xlu0 %v2276_v36, %s3190_s23  ;;  %v2203_v62 = vpack.c.bf16 %v2185_v48, %v2183_v45  ;;  %v2204_v22 = vpack.c.bf16 %v2186_v26, %v2184_v38  ;;  %v790_v45 = vadd.f32 %v5491_v31, %v228_v43  ;;  %v793_v38 = vadd.f32 %v5521_v55, %v231_v6 }
 0x5ff   : > { %2485 = vrot.lane.b32.xlu2 %v2271_v57, %s3190_s23  ;;  %v2308_v49 = vadd.f32 %v2273_v51, %v1550_v9  ;;  %v2323_v48 = vmul.f32 0.25, %v2307_v25  ;;  %v795_v26 = vadd.f32 %v5497_v41, %v233_v54 }
 0x600   : > { %2245 = vmatmul.bf16.gmra.mxu0 %v2203_v62  ;;  %v1548_v46 = vadd.f32 %v5563_v0, %v790_v45  ;;  %v1551_v62 = vadd.f32 %v5581_v3, %v793_v38  ;;  %v232_v3 = vld [vmem:[%s5636_s26 + $0x28] sm:$0xff] }
 0x601   : > { %2294 = vmatmul.bf16.gmra.mxu1 %v2204_v22  ;;  %v2324_v22 = vmul.f32 0.25, %v2308_v49 }
 0x602   : > { %v2110_v20 = vpop.xlane.xlu2 %2109  ;;  %v2228_v42 = vpop.f32.mrf.mxu0  ;;  %v2306_v19 = vadd.f32 %v5621_v12, %v1548_v46  ;;  %v2309_v58 = vadd.f32 %v2276_v36, %v1551_v62 }
 0x603   : > { %vm2126_vm5 = vcmp.gt.f32.partialorder %v2110_v20, 0.0  ;;  %v2277_v7 = vpop.f32.mrf.mxu1  ;;  %v3052_v17 = vpop.eup %3051 }
 0x604   : > { %v2142_v34 = vsel %vm2126_vm5, %v2110_v20, 1.0  ;;  %v2278_v24 = vadd.f32 %v2277_v7, %v2228_v42  ;;  %v2187_v31 = vmul.f32 %v3052_v17, %v5455_v30  ;;  %v2188_v41 = vmul.f32 %v3052_v17, %v5459_v18  ;;  %v234_v7 = vld [vmem:[%s5636_s26 + $0x38] sm:$0xff] }
 0x605   : > { %3053 = vrcp.f32 %v2142_v34  ;;  %v2354_v14 = vpop.permute.xlu0 %2353  ;;  %v1553_v42 = vadd.f32 %v5609_v2, %v795_v26  ;;  %v794_v18 = vadd.f32 %v5507_v10, %v232_v3  ;;  %v796_v12 = vadd.f32 %v5531_v40, %v234_v7 }
 0x606   : > { %v5659_v60 = vsel %vm2529_vm9, %v2321_v13, %v2354_v14  ;;  %v2325_v13 = vmul.f32 0.25, %v2309_v58 }
 0x607   : > { %2491 = vrot.lane.b32.xlu2 %v2278_v24, %s3190_s23  ;;  %v1552_v2 = vadd.f32 %v5571_v27, %v794_v18  ;;  %v1554_v6 = vadd.f32 %v5595_v53, %v796_v12 }
 0x609   : > { %v2310_v49 = vadd.f32 %v2278_v24, %v1552_v2 }
 0x60a   : > { %v2358_v57 = vpop.permute.xlu2 %2357  ;;  %v2231_v63 = vpop.f32.mrf.mxu0 }
 0x60b   : > { %v3054_v1 = vpop.eup %3053  ;;  %v5669_v51 = vsel %vm2529_vm9, %v2323_v48, %v2358_v57  ;;  %v2280_v4 = vpop.f32.mrf.mxu1  ;;  %v2326_v38 = vmul.f32 0.25, %v2310_v49 }
 0x60c   : > { %v2281_v55 = vadd.f32 %v2280_v4, %v2231_v63  ;;  %v2189_v61 = vmul.f32 %v3054_v1, %v5469_v39  ;;  %v2190_v0 = vmul.f32 %v3054_v1, %v5473_v59  ;;  %v2322_v59 = vmul.f32 0.25, %v2306_v19 }
 0x60d   : > { %v2360_v20 = vpop.permute.xlu0 %2359 }
 0x60e   : > { %v5679_v8 = vsel %vm2529_vm9, %v2324_v22, %v2360_v20  ;;  %2493 = vrot.lane.b32.xlu1 %v2281_v55, %s3190_s23  ;;  %v2205_v30 = vpack.c.bf16 %v2189_v61, %v2187_v31  ;;  %v2206_v5 = vpack.c.bf16 %v2190_v0, %v2188_v41  ;;  %v2311_v39 = vadd.f32 %v2281_v55, %v1553_v42 }
 0x610   : > { %2250 = vmatmul.bf16.gmra.mxu0 %v2205_v30  ;;  %v2327_v54 = vmul.f32 0.25, %v2311_v39 }
 0x611   : > { %2299 = vmatmul.bf16.gmra.mxu1 %v2206_v5 }
 0x612   : > { %v2356_v36 = vpop.permute.xlu1 %2355  ;;  %v2362_v34 = vpop.permute.xlu2 %2361 }
 0x613   : > { %v2531_v43 = vsel %vm2529_vm9, %v2322_v59, %v2356_v36  ;;  %v5688_v9 = vsel %vm2529_vm9, %v2325_v13, %v2362_v34  ;;  %v2233_v25 = vpop.f32.mrf.mxu0  ;;  %v2282_v14 = vpop.f32.mrf.mxu1  ;;  %v235_v59 = vld [vmem:[%s5636_s26 + $0x40] sm:$0xff] }
 0x614   : > { %v2283_v10 = vadd.f32 %v2282_v14, %v2233_v25  ;;  %v797_v36 = vadd.f32 %v6264_v16, %v235_v59  ;;  %v236_v16 = vld [vmem:[%s5636_s26 + $0x48] sm:$0xff] }
 0x615   : > { %v2366_v17 = vpop.permute.xlu0 %2365 }
 0x616   : > { %v2312_v45 = vadd.f32 %v2283_v10, %v1554_v6  ;;  %v5692_v40 = vsel %vm2529_vm9, %v2327_v54, %v2366_v17  ;;  %2495 = vrot.lane.b32.xlu0 %v2283_v10, %s3190_s23  ;;  %v1555_v54 = vadd.f32 %v6280_v44, %v797_v36 }
 0x618   : > { %v2328_v27 = vmul.f32 0.25, %v2312_v45 }
 0x61a   : > { %v2364_v48 = vpop.permute.xlu1 %2363  ;;  %v2368_v26 = vpop.permute.xlu2 %2367 }
 0x61b   : > { %v5696_v46 = vsel %vm2529_vm9, %v2326_v38, %v2364_v48  ;;  %v5699_v57 = vsel %vm2529_vm9, %v2328_v27, %v2368_v26  ;;  %v798_v26 = vadd.f32 %v5515_v33, %v236_v16 }
 0x61d   : > { %v5701_v53 = vpop.permute.xlu0 %2371 }
 0x622   : > { %v2370_v24 = vpop.permute.xlu1 %2369  ;;  %v5703_v63 = vpop.permute.xlu2 %2373 }
 0x625   : > { %v5705_v1 = vpop.permute.xlu0 %2377 }
 0x62a   : > { %v5707_v62 = vpop.permute.xlu1 %2375  ;;  %v5709_v22 = vpop.permute.xlu2 %2379 }
 0x62d   : > { %v5711_v4 = vpop.permute.xlu0 %2383 }
 0x632   : > { %v5713_v31 = vpop.permute.xlu1 %2381  ;;  %v2418_v55 = vpop.permute.xlu2 %2417 }
 0x635   : > { %v2422_v61 = vpop.permute.xlu0 %2421 }
 0x636   : > { %v2549_v17 = vsel %vm2546_vm1, %v5669_v51, %v2422_v61 }
 0x63a   : > { %v2420_v41 = vpop.permute.xlu1 %2419  ;;  %v2424_v0 = vpop.permute.xlu2 %2423 }
 0x63b   : > { %v2548_v34 = vsel %vm2546_vm1, %v2531_v43, %v2420_v41  ;;  %v2547_v43 = vsel %vm2546_vm1, %v5659_v60, %v2418_v55  ;;  %v1556_v55 = vadd.f32 %v6292_v47, %v798_v26  ;;  %v2550_v33 = vsel %vm2546_vm1, %v5679_v8, %v2424_v0 }
 0x63d   : > { %v2428_v19 = vpop.permute.xlu0 %2427 }
 0x642   : > { %v5715_v58 = vpop.permute.xlu1 %2425  ;;  %v5717_v20 = vpop.permute.xlu2 %2429 }
 0x645   : > { %v2434_v3 = vpop.permute.xlu0 %2433 }
 0x64a   : > { %v5719_v42 = vpop.permute.xlu1 %2431  ;;  %v2436_v30 = vpop.permute.xlu2 %2435 }
 0x64d   : > { %v5721_v5 = vpop.permute.xlu0 %2439 }
 0x652   : > { %v5723_v7 = vpop.permute.xlu1 %2437  ;;  %v5725_v39 = vpop.permute.xlu2 %2441 }
 0x655   : > { %v5727_v18 = vpop.permute.xlu0 %2445 }
 0x65a   : > { %v5733_v13 = vpop.permute.xlu1 %2443  ;;  %v5735_v12 = vpop.permute.xlu2 %2447 }
 0x65d   : > { %v2236_v2 = vpop.f32.mrf.mxu0  ;;  %v2484_v25 = vpop.permute.xlu0 %2483 }
 0x65e   : > { %v2285_v14 = vpop.f32.mrf.mxu1  ;;  %v2565_v6 = vsel %vm2563_vm8, %v2548_v34, %v2484_v25  ;;  %v237_v34 = vld [vmem:[%s5636_s26 + $0x50] sm:$0xff] }
 0x65f   : > { %v2286_v10 = vadd.f32 %v2285_v14, %v2236_v2  ;;  %2581 = vst [vmem:[%s5741_s30 + $0x8] sm:$0xff] %v2565_v6  ;;  %v2552_v2 = vsel %vm2546_vm1, %v5696_v46, %v2428_v19  ;;  %v799_v47 = vadd.f32 %v6272_v21, %v237_v34 }
 0x661   : > { %v2313_v49 = vadd.f32 %v2286_v10, %v1555_v54  ;;  %2497 = vrot.lane.b32.xlu2 %v2286_v10, %s3190_s23  ;;  %v1557_v19 = vadd.f32 %v6290_v15, %v799_v47 }
 0x662   : > { %v2482_v45 = vpop.permute.xlu1 %2481  ;;  %v2486_v44 = vpop.permute.xlu2 %2485 }
 0x663   : > { %v2329_v27 = vmul.f32 0.25, %v2313_v49  ;;  %v2564_v38 = vsel %vm2563_vm8, %v2547_v43, %v2482_v45  ;;  %v2566_v48 = vsel %vm2563_vm8, %v2549_v17, %v2486_v44  ;;  %v2551_v49 = vsel %vm2546_vm1, %v5688_v9, %v5715_v58  ;;  %v238_v17 = vld [vmem:[%s5636_s26 + $0x58] sm:$0xff] }
 0x664   : > { %2580 = vst [vmem:[%s5741_s30] sm:$0xff] %v2564_v38 }
 0x665   : > { %2582 = vst [vmem:[%s5741_s30 + $0x10] sm:$0xff] %v2566_v48  ;;  %v2238_v41 = vpop.f32.mrf.mxu0  ;;  %v2538_v59 = vsel %vm2529_vm9, %v2329_v27, %v2370_v24  ;;  %v239_v48 = vld [vmem:[%s5636_s26 + $0x60] sm:$0xff] }
 0x666   : > { %v2287_v60 = vpop.f32.mrf.mxu1  ;;  %v5757_v51 = vsel %vm2546_vm1, %v2538_v59, %v2434_v3 }
 0x667   : > { %v2288_v61 = vadd.f32 %v2287_v60, %v2238_v41 }
 0x669   : > { %v2314_v36 = vadd.f32 %v2288_v61, %v1556_v55  ;;  %2499 = vrot.lane.b32.xlu1 %v2288_v61, %s3190_s23  ;;  %v2553_v55 = vsel %vm2546_vm1, %v5692_v40, %v5717_v20 }
 0x66a   : > { %v2488_v25 = vpop.permute.xlu1 %2487  ;;  %v2492_v24 = vpop.permute.xlu2 %2491 }
 0x66b   : > { %v2330_v14 = vmul.f32 0.25, %v2314_v36  ;;  %v2567_v6 = vsel %vm2563_vm8, %v2550_v33, %v2488_v25  ;;  %v2569_v3 = vsel %vm2563_vm8, %v2552_v2, %v2492_v24  ;;  %v2554_v24 = vsel %vm2546_vm1, %v5699_v57, %v5719_v42 }
 0x66c   : > { %2583 = vst [vmem:[%s5741_s30 + $0x18] sm:$0xff] %v2567_v6 }
 0x66d   : > { %2585 = vst [vmem:[%s5741_s30 + $0x28] sm:$0xff] %v2569_v3  ;;  %v2241_v54 = vpop.f32.mrf.mxu0  ;;  %v2539_v8 = vsel %vm2529_vm9, %v2330_v14, %v5701_v53  ;;  %v241_v3 = vld [vmem:[%s5636_s26 + $0x70] sm:$0xff] }
 0x66e   : > { %v2290_v0 = vpop.f32.mrf.mxu1  ;;  %v5774_v46 = vsel %vm2546_vm1, %v2539_v8, %v2436_v30  ;;  %v800_v30 = vadd.f32 %v5535_v32, %v238_v17  ;;  %v801_v32 = vadd.f32 %v6265_v56, %v239_v48  ;;  %v240_v56 = vld [vmem:[%s5636_s26 + $0x68] sm:$0xff]  ;;  %v803_v47 = vadd.f32 %v6273_v35, %v241_v3 }
 0x66f   : > { %v2291_v10 = vadd.f32 %v2290_v0, %v2241_v54 }
 0x670   : > { %v2490_v16 = vpop.permute.xlu0 %2489  ;;  %v1558_v58 = vadd.f32 %v6285_v52, %v800_v30  ;;  %v1559_v52 = vadd.f32 %v6294_v29, %v801_v32  ;;  %v1561_v42 = vadd.f32 %v6291_v28, %v803_v47 }
 0x671   : > { %v2315_v43 = vadd.f32 %v2291_v10, %v1557_v19  ;;  %2501 = vrot.lane.b32.xlu0 %v2291_v10, %s3190_s23  ;;  %v2568_v21 = vsel %vm2563_vm8, %v2551_v49, %v2490_v16  ;;  %v242_v19 = vld [vmem:[%s5636_s26 + $0x78] sm:$0xff] }
 0x672   : > { %2584 = vst [vmem:[%s5741_s30 + $0x20] sm:$0xff] %v2568_v21  ;;  %v804_v49 = vadd.f32 %v5543_v11, %v242_v19 }
 0x673   : > { %v2331_v53 = vmul.f32 0.25, %v2315_v43 }
 0x674   : > { %v1562_v28 = vadd.f32 %v6295_v50, %v804_v49 }
 0x675   : > { %v2243_v45 = vpop.f32.mrf.mxu0  ;;  %v2540_v15 = vsel %vm2529_vm9, %v2331_v53, %v5703_v63 }
 0x676   : > { %v2292_v44 = vpop.f32.mrf.mxu1  ;;  %v5789_v9 = vsel %vm2546_vm1, %v2540_v15, %v5723_v7 }
 0x677   : > { %v2293_v27 = vadd.f32 %v2292_v44, %v2243_v45 }
 0x679   : > { %v2316_v38 = vadd.f32 %v2293_v27, %v1558_v58  ;;  %2503 = vrot.lane.b32.xlu2 %v2293_v27, %s3190_s23 }
 0x67b   : > { %v2332_v26 = vmul.f32 0.25, %v2316_v38 }
 0x67d   : > { %v2246_v41 = vpop.f32.mrf.mxu0  ;;  %v2541_v63 = vsel %vm2529_vm9, %v2332_v26, %v5707_v62 }
 0x67e   : > { %v2295_v59 = vpop.f32.mrf.mxu1  ;;  %v2558_v7 = vsel %vm2546_vm1, %v2541_v63, %v5721_v5  ;;  %v802_v5 = vadd.f32 %v5559_v37, %v240_v56 }
 0x67f   : > { %v2296_v60 = vadd.f32 %v2295_v59, %v2246_v41 }
 0x680   : > { %v2494_v61 = vpop.permute.xlu1 %2493  ;;  %v1560_v20 = vadd.f32 %v6293_v23, %v802_v5 }
 0x681   : > { %v2317_v36 = vadd.f32 %v2296_v60, %v1559_v52  ;;  %v2570_v34 = vsel %vm2563_vm8, %v2553_v55, %v2494_v61  ;;  %2505 = vrot.lane.b32.xlu1 %v2296_v60, %s3190_s23 }
 0x682   : > { %2586 = vst [vmem:[%s5741_s30 + $0x30] sm:$0xff] %v2570_v34 }
 0x683   : > { %v2333_v62 = vmul.f32 0.25, %v2317_v36 }
 0x685   : > { %v2248_v33 = vpop.f32.mrf.mxu0  ;;  %v2542_v29 = vsel %vm2529_vm9, %v2333_v62, %v5705_v1 }
 0x686   : > { %v2297_v2 = vpop.f32.mrf.mxu1  ;;  %v2559_v40 = vsel %vm2546_vm1, %v2542_v29, %v5725_v39 }
 0x687   : > { %v2298_v25 = vadd.f32 %v2297_v2, %v2248_v33 }
 0x688   : > { %v2496_v14 = vpop.permute.xlu0 %2495 }
 0x689   : > { %v2318_v6 = vadd.f32 %v2298_v25, %v1560_v20  ;;  %2507 = vrot.lane.b32.xlu0 %v2298_v25, %s3190_s23  ;;  %v2571_v37 = vsel %vm2563_vm8, %v2554_v24, %v2496_v14 }
 0x68a   : > { %2587 = vst [vmem:[%s5741_s30 + $0x38] sm:$0xff] %v2571_v37 }
 0x68b   : > { %v2334_v1 = vmul.f32 0.25, %v2318_v6 }
 0x68d   : > { %v2251_v39 = vpop.f32.mrf.mxu0  ;;  %v2543_v23 = vsel %vm2529_vm9, %v2334_v1, %v5709_v22 }
 0x68e   : > { %v2300_v54 = vpop.f32.mrf.mxu1  ;;  %v2560_v57 = vsel %vm2546_vm1, %v2543_v23, %v5733_v13 }
 0x68f   : > { %v2301_v8 = vadd.f32 %v2300_v54, %v2251_v39 }
 0x691   : > { %v2319_v0 = vadd.f32 %v2301_v8, %v1561_v42  ;;  %2509 = vrot.lane.b32.xlu2 %v2301_v8, %s3190_s23 }
 0x693   : > { %v2335_v10 = vmul.f32 0.25, %v2319_v0 }
 0x695   : > { %v2253_v35 = vpop.f32.mrf.mxu0  ;;  %v2544_v22 = vsel %vm2529_vm9, %v2335_v10, %v5713_v31 }
 0x696   : > { %v2302_v16 = vpop.f32.mrf.mxu1  ;;  %v2561_v13 = vsel %vm2546_vm1, %v2544_v22, %v5727_v18 }
 0x697   : > { %v2303_v43 = vadd.f32 %v2302_v16, %v2253_v35 }
 0x699   : > { %v2320_v21 = vadd.f32 %v2303_v43, %v1562_v28  ;;  %2511 = vrot.lane.b32.xlu1 %v2303_v43, %s3190_s23 }
 0x69b   : > { %v2336_v17 = vmul.f32 0.25, %v2320_v21 }
 0x69d   : > { %v2545_v11 = vsel %vm2529_vm9, %v2336_v17, %v5711_v4 }
 0x69e   : > { %v2562_v31 = vsel %vm2546_vm1, %v2545_v11, %v5735_v12 }
 0x6bb   : > { %v2498_v53 = vpop.permute.xlu2 %2497 }
 0x6bc   : > { %v2572_v18 = vsel %vm2563_vm8, %v5757_v51, %v2498_v53 }
 0x6bd   : > { %2588 = vst [vmem:[%s5741_s30 + $0x40] sm:$0xff] %v2572_v18 }
 0x6d3   : > { %v2504_v50 = vpop.permute.xlu2 %2503 }
 0x6d4   : > { %v2575_v30 = vsel %vm2563_vm8, %v2558_v7, %v2504_v50 }
 0x6d5   : > { %2591 = vst [vmem:[%s5741_s30 + $0x58] sm:$0xff] %v2575_v30 }
 0x6db   : > { %v2500_v45 = vpop.permute.xlu1 %2499 }
 0x6dc   : > { %v2573_v4 = vsel %vm2563_vm8, %v5774_v46, %v2500_v45 }
 0x6dd   : > { %2589 = vst [vmem:[%s5741_s30 + $0x48] sm:$0xff] %v2573_v4 }
 0x6e3   : > { %v2502_v15 = vpop.permute.xlu0 %2501 }
 0x6e4   : > { %v2574_v12 = vsel %vm2563_vm8, %v5789_v9, %v2502_v15 }
 0x6e5   : > { %2590 = vst [vmem:[%s5741_s30 + $0x50] sm:$0xff] %v2574_v12 }
 0x6eb   : > { %v2510_v51 = vpop.permute.xlu2 %2509 }
 0x6ec   : > { %v2578_v44 = vsel %vm2563_vm8, %v2561_v13, %v2510_v51 }
 0x6ed   : > { %2594 = vst [vmem:[%s5741_s30 + $0x70] sm:$0xff] %v2578_v44 }
 0x6f3   : > { %v2506_v58 = vpop.permute.xlu1 %2505 }
 0x6f4   : > { %v2576_v27 = vsel %vm2563_vm8, %v2559_v40, %v2506_v58 }
 0x6f5   : > { %2592 = vst [vmem:[%s5741_s30 + $0x60] sm:$0xff] %v2576_v27 }
 0x6fb   : > { %v2508_v38 = vpop.permute.xlu0 %2507 }
 0x6fc   : > { %v2577_v46 = vsel %vm2563_vm8, %v2560_v57, %v2508_v38 }
 0x6fd   : > { %2593 = vst [vmem:[%s5741_s30 + $0x68] sm:$0xff] %v2577_v46 }
 0x70b   : > { %v2512_v9 = vpop.permute.xlu1 %2511 }
 0x70c   : > { %v2579_v48 = vsel %vm2563_vm8, %v2562_v31, %v2512_v9 }
 0x70d   : > { %2595 = vst [vmem:[%s5741_s30 + $0x78] sm:$0xff] %v2579_v48 }
 0x70e   : > { %3144 = shalt.err (!%p3141_p7)
}
 0x70f   : > { %s3191_s23 = smov 128   ;;  %s3192_s24 = smov 8  }
 0x710   : > { %2714 = dma.vmem_to_hbm [thread:$0]  (%p3246_p5), %s2610_s7, 2048, %s2612_s8, %s2597_s13, %s3191_s23, %s3191_s23, %s3192_s24  }
 0x711 PF: > { %p2726_p8 = scmp.ge.s32.totalorder %s3183_s12, 2  ;;  %s2626_s25 = sand.u32 1, %s3171_s9  }
 0x712   : > { %s2627_s26 = scalar_lea.sflag [#allocation4], %s2626_s25 }
 0x713   : > { %p2721_p9 = pnand %p2726_p8, %p3250_p6 }
 0x715   : > { %p2722_p10 = pneg %p2721_p9 }
 0x717   : > { %3166 = dma.done.wait (%p2722_p10), %s2627_s26, 2048  }
 0x718   : > { %3168 = vsyncadd (%p2722_p10), %s2627_s26, 4294965248  ;;  %p13_p11 = scmp.ge.s32.totalorder %s3233_s15, 4   ;;  %s6296_s9 = smov %s3175_s10 }
 0x719   : > { %s6297_s10 = smov %s3179_s11  ;;  %s6298_s11 = smov %s3244_s18 }
 0x71a   : > { %s6299_s12 = smov %s3233_s15  ;;  %15 = sbr.rel (!%p13_p11) target bundleno = 4 (0x4), region = 67 }
 0x71f   :  { %2633 = vsyncpa [#allocation3], 1 }
 0x720   :  { %2635 = vsyncpa [#allocation3 + $0x1], 1 }
 0x721   :  { %2636 = vsyncpa [#allocation4], 1 }
 0x722   :  { %2638 = vsyncpa [#allocation4 + $0x1], 1 }

</bundles_post_ra>
